<compile_context>
chip_gen: v7x
topology: tpu7x:2x2x1
jax: 0.10.0
libtpu: 0.0.40
codegen_flags: <defaults>
</compile_context>

<pallas_src>
import math
import functools

import jax
import jax.numpy as jnp
from jax.experimental import pallas as pl
from jax.experimental.pallas import tpu as pltpu


def _round_up(a: int, b: int) -> int:
    return ((a + b - 1) // b) * b


def _fourier_kernel(x_ref, o_ref, s_ref, *, include_input, input_dim, num_freq,
                    out_dims, transpose_out):
    # x_ref: (D, TN)  lane-dense input tile (channels on sublanes, points on lanes)
    # s_ref: (R, TN)  VMEM scratch slab, R = round_up(out_dims, 8); row r == channel r
    # o_ref: (TN, out_dims) channels-last tile if transpose_out else (out_dims, TN)
    x = x_ref[...]                                   # (D, TN) f32
    tn = x.shape[1]
    rows = s_ref.shape[0]
    half_pi = jnp.float32(math.pi / 2.0)

    off = input_dim if include_input else 0
    nfd = num_freq * input_dim

    if include_input:
        s_ref[0:input_dim, :] = x

    # Stage the sin arguments (phases) at their final channel rows.  Scales are
    # static Python floats (2**f) -> plain VPU muls, no captured array consts.
    for f in range(num_freq):
        xf = x * jnp.float32(2.0 ** f)
        s_ref[off + f * input_dim: off + (f + 1) * input_dim, :] = xf
        s_ref[off + nfd + f * input_dim: off + nfd + (f + 1) * input_dim, :] = (
            xf + half_pi)

    # One batched transcendental pass over all 2*F*D rows (full 8-sublane
    # vregs) instead of 2*F separate sins on (D, TN) slices.
    s_ref[off:off + 2 * nfd, :] = jnp.sin(s_ref[off:off + 2 * nfd, :])

    # Zero the sublane padding rows so the transpose below sees defined data
    # (they are sliced off before the store either way).
    if rows > out_dims:
        s_ref[out_dims:rows, :] = jnp.zeros((rows - out_dims, tn), jnp.float32)

    if transpose_out:
        # Emit channels-last directly from the kernel: transpose the lane-dense
        # slab in 256-lane chunks (source + result fit in vregs, XLU does the
        # shuffles) and store each chunk once.
        chunk = 256
        for j in range(0, tn, chunk):
            w = min(chunk, tn - j)
            t = s_ref[:, j:j + w].T                  # (w, R)
            o_ref[j:j + w, :] = t[:, :out_dims]
    else:
        # Fallback layout: lane-dense (out_dims, TN); wrapper transposes.
        o_ref[...] = s_ref[0:out_dims, :]


_CHANNELS_LAST_OK = True  # flips to False if the fused-transpose path cannot lower


def fourier_embedding(x, num_frequencies: int, include_input: bool = True,
                      input_dim: int = 3, tile_n: int = 16384):
    """Pallas implementation of FourierEmbedding.forward.

    x: (..., input_dim) float.  Returns (..., out_dims) float32 with
    out_dims = (input_dim if include_input else 0) + 2*num_frequencies*input_dim.
    """
    global _CHANNELS_LAST_OK
    assert x.shape[-1] == input_dim, (
        f"Channel dimension is {x.shape[-1]} but should be {input_dim}")
    assert num_frequencies >= 1

    out_dims = (input_dim if include_input else 0) + 2 * num_frequencies * input_dim
    rows = _round_up(out_dims, 8)

    lead_shape = x.shape[:-1]
    n = 1
    for s in lead_shape:
        n *= s

    # Lane-dense input layout: points on the 128-wide lane axis.  (N, D) -> (D, N).
    # TODO(synk): accept a (D, N) input (or use allow_input_fusion) to also drop
    # this small (~24 B/point) wrapper-side transpose.
    xt = x.reshape(n, input_dim).astype(jnp.float32).T

    # Lane tile: multiple of 128, big enough to amortize the ~0.35us per-grid-step
    # overhead, small enough that the (tn, out_dims) output block (lane-padded to
    # 128 in VMEM) stays inside the scoped-VMEM limit when double-buffered.
    # Keep >= 2 grid steps whenever possible so ("parallel",) can use both v7x TCs.
    tn = max(128, (tile_n // 128) * 128)
    tn = min(tn, _round_up(n, 128))
    if n > 128 and pl.cdiv(n, tn) < 2:
        tn = _round_up(pl.cdiv(n, 2), 128)
    grid = (pl.cdiv(n, tn),)

    def call(transpose_out: bool):
        kernel = functools.partial(
            _fourier_kernel,
            include_input=include_input, input_dim=input_dim,
            num_freq=num_frequencies, out_dims=out_dims,
            transpose_out=transpose_out)
        if transpose_out:
            out_shape = jax.ShapeDtypeStruct((n, out_dims), jnp.float32)
            out_spec = pl.BlockSpec((tn, out_dims), lambda i: (i, 0))
        else:
            out_shape = jax.ShapeDtypeStruct((out_dims, n), jnp.float32)
            out_spec = pl.BlockSpec((out_dims, tn), lambda i: (0, i))
        return pl.pallas_call(
            kernel,
            out_shape=out_shape,
            grid_spec=pltpu.PrefetchScalarGridSpec(
                num_scalar_prefetch=0,
                grid=grid,
                in_specs=[pl.BlockSpec((input_dim, tn), lambda i: (0, i))],
                out_specs=out_spec,
                scratch_shapes=[pltpu.VMEM((rows, tn), jnp.float32)]),
            compiler_params=pltpu.CompilerParams(
                dimension_semantics=("parallel",),
                vmem_limit_bytes=32 * 1024 * 1024),
        )(xt)

    if _CHANNELS_LAST_OK:
        try:
            out = call(True)               # channels-last written by the kernel
            jax.block_until_ready(out)     # surface any deferred lowering error
            return out.reshape(*lead_shape, out_dims)
        except Exception:
            # Graceful degradation: lane-dense output + XLA transpose (the
            # previously-validated path) if the in-kernel transpose can't lower.
            _CHANNELS_LAST_OK = False
    out_t = call(False)
    return out_t.T.reshape(*lead_shape, out_dims)


def _reference(x, num_frequencies, include_input, input_dim):
    scales = jnp.asarray([2.0 ** i for i in range(num_frequencies)], dtype=jnp.float32)
    x = x.astype(jnp.float32)
    x_shape = x.shape
    xb = (x[..., None, :] * scales[:, None]).reshape(*x_shape[:-1], -1)
    four_feat = jnp.sin(jnp.concatenate([xb, xb + math.pi / 2.0], axis=-1))
    parts = ([x] if include_input else []) + [four_feat]
    return jnp.concatenate(parts, axis=-1)


if __name__ == "__main__":
    key = jax.random.PRNGKey(0)
    k0, k1, k2 = jax.random.split(key, 3)
    input_dim = 3
    num_frequencies = 4

    # Small NeRF-style input: 2 rays x 256 samples of 3-D points.
    x = jax.random.normal(k0, (2, 256, input_dim), dtype=jnp.float32)
    out = jax.block_until_ready(fourier_embedding(x, num_frequencies, True, input_dim))
    ref = _reference(x, num_frequencies, True, input_dim)
    expected_dims = input_dim + 2 * num_frequencies * input_dim
    assert out.shape == ref.shape == (2, 256, expected_dims)
    assert jnp.allclose(out, ref, atol=1e-5, rtol=1e-5)

    # include_input=False path (out_dims = 24).
    out2 = jax.block_until_ready(fourier_embedding(x, num_frequencies, False, input_dim))
    ref2 = _reference(x, num_frequencies, False, input_dim)
    assert out2.shape == ref2.shape
    assert jnp.allclose(out2, ref2, atol=1e-5, rtol=1e-5)

    # Ragged N (not a multiple of 128 / tile): exercises the clipped last block.
    x3 = jax.random.normal(k1, (2, 300, input_dim), dtype=jnp.float32)
    out3 = jax.block_until_ready(fourier_embedding(x3, num_frequencies, True, input_dim))
    assert jnp.allclose(out3, _reference(x3, num_frequencies, True, input_dim),
                        atol=1e-5, rtol=1e-5)

    # Tiny N < 128: single block wider than the array.
    x4 = jax.random.normal(k2, (1, 50, input_dim), dtype=jnp.float32)
    out4 = jax.block_until_ready(fourier_embedding(x4, num_frequencies, True, input_dim))
    assert jnp.allclose(out4, _reference(x4, num_frequencies, True, input_dim),
                        atol=1e-5, rtol=1e-5)

    print("KERNEL_OK")
</pallas_src>

<mosaic_0001>
module attributes {stable_mosaic.version = 11 : i64} {
  func.func @_fourier_kernel(%arg0: i32, %arg1: memref<3x256xf32, #tpu.memory_space<vmem>>, %arg2: memref<256x27xf32, #tpu.memory_space<vmem>>, %arg3: memref<32x256xf32, #tpu.memory_space<vmem>>) attributes {dimension_semantics = [#tpu.dimension_semantics<parallel>], iteration_bounds = array<i64: 2>, scalar_prefetch = 0 : i64, scratch_operands = 1 : i64, tpu.core_type = #tpu.core_type<tc>, window_params = [{transform_indices = @transform_0, window_bounds = array<i64: 3, 256>}, {transform_indices = @transform_1, window_bounds = array<i64: 256, 27>}]} {
    %c0 = arith.constant 0 : index
    %c0_0 = arith.constant 0 : index
    %0 = vector.load %arg1[%c0, %c0_0] : memref<3x256xf32, #tpu.memory_space<vmem>>, vector<3x256xf32>
    %c0_1 = arith.constant 0 : index
    %c0_2 = arith.constant 0 : index
    %1 = vector.load %arg3[%c0_1, %c0_2] : memref<32x256xf32, #tpu.memory_space<vmem>>, vector<3x256xf32>
    tpu.vector_store %arg3[%c0_1, %c0_2], %0 {strides = array<i32>} : memref<32x256xf32, #tpu.memory_space<vmem>>, vector<3x256xf32>,
    %cst = arith.constant 1.000000e+00 : f32
    %2 = vector.broadcast %cst : f32 to vector<3x256xf32>
    %3 = arith.mulf %0, %2 : vector<3x256xf32>
    %c3 = arith.constant 3 : index
    %c0_3 = arith.constant 0 : index
    %4 = vector.load %arg3[%c3, %c0_3] : memref<32x256xf32, #tpu.memory_space<vmem>>, vector<3x256xf32>
    tpu.vector_store %arg3[%c3, %c0_3], %3 {strides = array<i32>} : memref<32x256xf32, #tpu.memory_space<vmem>>, vector<3x256xf32>,
    %cst_4 = arith.constant 1.57079637 : f32
    %5 = vector.broadcast %cst_4 : f32 to vector<3x256xf32>
    %6 = arith.addf %3, %5 : vector<3x256xf32>
    %c15 = arith.constant 15 : index
    %c0_5 = arith.constant 0 : index
    %7 = vector.load %arg3[%c15, %c0_5] : memref<32x256xf32, #tpu.memory_space<vmem>>, vector<3x256xf32>
    tpu.vector_store %arg3[%c15, %c0_5], %6 {strides = array<i32>} : memref<32x256xf32, #tpu.memory_space<vmem>>, vector<3x256xf32>,
    %cst_6 = arith.constant 2.000000e+00 : f32
    %8 = vector.broadcast %cst_6 : f32 to vector<3x256xf32>
    %9 = arith.mulf %0, %8 : vector<3x256xf32>
    %c6 = arith.constant 6 : index
    %c0_7 = arith.constant 0 : index
    %10 = vector.load %arg3[%c6, %c0_7] : memref<32x256xf32, #tpu.memory_space<vmem>>, vector<3x256xf32>
    tpu.vector_store %arg3[%c6, %c0_7], %9 {strides = array<i32>} : memref<32x256xf32, #tpu.memory_space<vmem>>, vector<3x256xf32>,
    %cst_8 = arith.constant 1.57079637 : f32
    %11 = vector.broadcast %cst_8 : f32 to vector<3x256xf32>
    %12 = arith.addf %9, %11 : vector<3x256xf32>
    %c18 = arith.constant 18 : index
    %c0_9 = arith.constant 0 : index
    %13 = vector.load %arg3[%c18, %c0_9] : memref<32x256xf32, #tpu.memory_space<vmem>>, vector<3x256xf32>
    tpu.vector_store %arg3[%c18, %c0_9], %12 {strides = array<i32>} : memref<32x256xf32, #tpu.memory_space<vmem>>, vector<3x256xf32>,
    %cst_10 = arith.constant 4.000000e+00 : f32
    %14 = vector.broadcast %cst_10 : f32 to vector<3x256xf32>
    %15 = arith.mulf %0, %14 : vector<3x256xf32>
    %c9 = arith.constant 9 : index
    %c0_11 = arith.constant 0 : index
    %16 = vector.load %arg3[%c9, %c0_11] : memref<32x256xf32, #tpu.memory_space<vmem>>, vector<3x256xf32>
    tpu.vector_store %arg3[%c9, %c0_11], %15 {strides = array<i32>} : memref<32x256xf32, #tpu.memory_space<vmem>>, vector<3x256xf32>,
    %cst_12 = arith.constant 1.57079637 : f32
    %17 = vector.broadcast %cst_12 : f32 to vector<3x256xf32>
    %18 = arith.addf %15, %17 : vector<3x256xf32>
    %c21 = arith.constant 21 : index
    %c0_13 = arith.constant 0 : index
    %19 = vector.load %arg3[%c21, %c0_13] : memref<32x256xf32, #tpu.memory_space<vmem>>, vector<3x256xf32>
    tpu.vector_store %arg3[%c21, %c0_13], %18 {strides = array<i32>} : memref<32x256xf32, #tpu.memory_space<vmem>>, vector<3x256xf32>,
    %cst_14 = arith.constant 8.000000e+00 : f32
    %20 = vector.broadcast %cst_14 : f32 to vector<3x256xf32>
    %21 = arith.mulf %0, %20 : vector<3x256xf32>
    %c12 = arith.constant 12 : index
    %c0_15 = arith.constant 0 : index
    %22 = vector.load %arg3[%c12, %c0_15] : memref<32x256xf32, #tpu.memory_space<vmem>>, vector<3x256xf32>
    tpu.vector_store %arg3[%c12, %c0_15], %21 {strides = array<i32>} : memref<32x256xf32, #tpu.memory_space<vmem>>, vector<3x256xf32>,
    %cst_16 = arith.constant 1.57079637 : f32
    %23 = vector.broadcast %cst_16 : f32 to vector<3x256xf32>
    %24 = arith.addf %21, %23 : vector<3x256xf32>
    %c24 = arith.constant 24 : index
    %c0_17 = arith.constant 0 : index
    %25 = vector.load %arg3[%c24, %c0_17] : memref<32x256xf32, #tpu.memory_space<vmem>>, vector<3x256xf32>
    tpu.vector_store %arg3[%c24, %c0_17], %24 {strides = array<i32>} : memref<32x256xf32, #tpu.memory_space<vmem>>, vector<3x256xf32>,
    %c3_18 = arith.constant 3 : index
    %c0_19 = arith.constant 0 : index
    %26 = vector.load %arg3[%c3_18, %c0_19] : memref<32x256xf32, #tpu.memory_space<vmem>>, vector<24x256xf32>
    %27 = math.sin %26 : vector<24x256xf32>
    %c3_20 = arith.constant 3 : index
    %c0_21 = arith.constant 0 : index
    %28 = vector.load %arg3[%c3_20, %c0_21] : memref<32x256xf32, #tpu.memory_space<vmem>>, vector<24x256xf32>
    tpu.vector_store %arg3[%c3_20, %c0_21], %27 {strides = array<i32>} : memref<32x256xf32, #tpu.memory_space<vmem>>, vector<24x256xf32>,
    %cst_22 = arith.constant 0.000000e+00 : f32
    %29 = vector.broadcast %cst_22 : f32 to vector<5x256xf32>
    %c27 = arith.constant 27 : index
    %c0_23 = arith.constant 0 : index
    %30 = vector.load %arg3[%c27, %c0_23] : memref<32x256xf32, #tpu.memory_space<vmem>>, vector<5x256xf32>
    tpu.vector_store %arg3[%c27, %c0_23], %29 {strides = array<i32>} : memref<32x256xf32, #tpu.memory_space<vmem>>, vector<5x256xf32>,
    %c0_24 = arith.constant 0 : index
    %c0_25 = arith.constant 0 : index
    %31 = vector.load %arg3[%c0_24, %c0_25] : memref<32x256xf32, #tpu.memory_space<vmem>>, vector<32x256xf32>
    %32 = tpu.transpose %31, [1, 0] : vector<32x256xf32> -> vector<256x32xf32>
    %33 = vector.extract_strided_slice %32 {offsets = [0, 0], sizes = [256, 27], strides = [1, 1]} : vector<256x32xf32> to vector<256x27xf32>
    %c0_26 = arith.constant 0 : index
    %c0_27 = arith.constant 0 : index
    %34 = vector.load %arg2[%c0_26, %c0_27] : memref<256x27xf32, #tpu.memory_space<vmem>>, vector<256x27xf32>
    tpu.vector_store %arg2[%c0_26, %c0_27], %33 {strides = array<i32>} : memref<256x27xf32, #tpu.memory_space<vmem>>, vector<256x27xf32>,
    return
  }
  func.func @transform_0(%arg0: i32) -> (i32, i32) {
    %c0_i32 = arith.constant 0 : i32
    %c0_i32_0 = arith.constant 0 : i32
    return %c0_i32, %arg0 : i32, i32
  }
  func.func @transform_1(%arg0: i32) -> (i32, i32) {
    %c0_i32 = arith.constant 0 : i32
    %c0_i32_0 = arith.constant 0 : i32
    return %arg0, %c0_i32 : i32, i32
  }
}

module attributes {stable_mosaic.version = 11 : i64} {
  func.func @_fourier_kernel(%arg0: i32, %arg1: memref<3x256xf32, #tpu.memory_space<vmem>>, %arg2: memref<27x256xf32, #tpu.memory_space<vmem>>, %arg3: memref<32x256xf32, #tpu.memory_space<vmem>>) attributes {dimension_semantics = [#tpu.dimension_semantics<parallel>], iteration_bounds = array<i64: 2>, scalar_prefetch = 0 : i64, scratch_operands = 1 : i64, tpu.core_type = #tpu.core_type<tc>, window_params = [{transform_indices = @transform_0, window_bounds = array<i64: 3, 256>}, {transform_indices = @transform_1, window_bounds = array<i64: 27, 256>}]} {
    %c0 = arith.constant 0 : index
    %c0_0 = arith.constant 0 : index
    %0 = vector.load %arg1[%c0, %c0_0] : memref<3x256xf32, #tpu.memory_space<vmem>>, vector<3x256xf32>
    %c0_1 = arith.constant 0 : index
    %c0_2 = arith.constant 0 : index
    %1 = vector.load %arg3[%c0_1, %c0_2] : memref<32x256xf32, #tpu.memory_space<vmem>>, vector<3x256xf32>
    tpu.vector_store %arg3[%c0_1, %c0_2], %0 {strides = array<i32>} : memref<32x256xf32, #tpu.memory_space<vmem>>, vector<3x256xf32>,
    %cst = arith.constant 1.000000e+00 : f32
    %2 = vector.broadcast %cst : f32 to vector<3x256xf32>
    %3 = arith.mulf %0, %2 : vector<3x256xf32>
    %c3 = arith.constant 3 : index
    %c0_3 = arith.constant 0 : index
    %4 = vector.load %arg3[%c3, %c0_3] : memref<32x256xf32, #tpu.memory_space<vmem>>, vector<3x256xf32>
    tpu.vector_store %arg3[%c3, %c0_3], %3 {strides = array<i32>} : memref<32x256xf32, #tpu.memory_space<vmem>>, vector<3x256xf32>,
    %cst_4 = arith.constant 1.57079637 : f32
    %5 = vector.broadcast %cst_4 : f32 to vector<3x256xf32>
    %6 = arith.addf %3, %5 : vector<3x256xf32>
    %c15 = arith.constant 15 : index
    %c0_5 = arith.constant 0 : index
    %7 = vector.load %arg3[%c15, %c0_5] : memref<32x256xf32, #tpu.memory_space<vmem>>, vector<3x256xf32>
    tpu.vector_store %arg3[%c15, %c0_5], %6 {strides = array<i32>} : memref<32x256xf32, #tpu.memory_space<vmem>>, vector<3x256xf32>,
    %cst_6 = arith.constant 2.000000e+00 : f32
    %8 = vector.broadcast %cst_6 : f32 to vector<3x256xf32>
    %9 = arith.mulf %0, %8 : vector<3x256xf32>
    %c6 = arith.constant 6 : index
    %c0_7 = arith.constant 0 : index
    %10 = vector.load %arg3[%c6, %c0_7] : memref<32x256xf32, #tpu.memory_space<vmem>>, vector<3x256xf32>
    tpu.vector_store %arg3[%c6, %c0_7], %9 {strides = array<i32>} : memref<32x256xf32, #tpu.memory_space<vmem>>, vector<3x256xf32>,
    %cst_8 = arith.constant 1.57079637 : f32
    %11 = vector.broadcast %cst_8 : f32 to vector<3x256xf32>
    %12 = arith.addf %9, %11 : vector<3x256xf32>
    %c18 = arith.constant 18 : index
    %c0_9 = arith.constant 0 : index
    %13 = vector.load %arg3[%c18, %c0_9] : memref<32x256xf32, #tpu.memory_space<vmem>>, vector<3x256xf32>
    tpu.vector_store %arg3[%c18, %c0_9], %12 {strides = array<i32>} : memref<32x256xf32, #tpu.memory_space<vmem>>, vector<3x256xf32>,
    %cst_10 = arith.constant 4.000000e+00 : f32
    %14 = vector.broadcast %cst_10 : f32 to vector<3x256xf32>
    %15 = arith.mulf %0, %14 : vector<3x256xf32>
    %c9 = arith.constant 9 : index
    %c0_11 = arith.constant 0 : index
    %16 = vector.load %arg3[%c9, %c0_11] : memref<32x256xf32, #tpu.memory_space<vmem>>, vector<3x256xf32>
    tpu.vector_store %arg3[%c9, %c0_11], %15 {strides = array<i32>} : memref<32x256xf32, #tpu.memory_space<vmem>>, vector<3x256xf32>,
    %cst_12 = arith.constant 1.57079637 : f32
    %17 = vector.broadcast %cst_12 : f32 to vector<3x256xf32>
    %18 = arith.addf %15, %17 : vector<3x256xf32>
    %c21 = arith.constant 21 : index
    %c0_13 = arith.constant 0 : index
    %19 = vector.load %arg3[%c21, %c0_13] : memref<32x256xf32, #tpu.memory_space<vmem>>, vector<3x256xf32>
    tpu.vector_store %arg3[%c21, %c0_13], %18 {strides = array<i32>} : memref<32x256xf32, #tpu.memory_space<vmem>>, vector<3x256xf32>,
    %cst_14 = arith.constant 8.000000e+00 : f32
    %20 = vector.broadcast %cst_14 : f32 to vector<3x256xf32>
    %21 = arith.mulf %0, %20 : vector<3x256xf32>
    %c12 = arith.constant 12 : index
    %c0_15 = arith.constant 0 : index
    %22 = vector.load %arg3[%c12, %c0_15] : memref<32x256xf32, #tpu.memory_space<vmem>>, vector<3x256xf32>
    tpu.vector_store %arg3[%c12, %c0_15], %21 {strides = array<i32>} : memref<32x256xf32, #tpu.memory_space<vmem>>, vector<3x256xf32>,
    %cst_16 = arith.constant 1.57079637 : f32
    %23 = vector.broadcast %cst_16 : f32 to vector<3x256xf32>
    %24 = arith.addf %21, %23 : vector<3x256xf32>
    %c24 = arith.constant 24 : index
    %c0_17 = arith.constant 0 : index
    %25 = vector.load %arg3[%c24, %c0_17] : memref<32x256xf32, #tpu.memory_space<vmem>>, vector<3x256xf32>
    tpu.vector_store %arg3[%c24, %c0_17], %24 {strides = array<i32>} : memref<32x256xf32, #tpu.memory_space<vmem>>, vector<3x256xf32>,
    %c3_18 = arith.constant 3 : index
    %c0_19 = arith.constant 0 : index
    %26 = vector.load %arg3[%c3_18, %c0_19] : memref<32x256xf32, #tpu.memory_space<vmem>>, vector<24x256xf32>
    %27 = math.sin %26 : vector<24x256xf32>
    %c3_20 = arith.constant 3 : index
    %c0_21 = arith.constant 0 : index
    %28 = vector.load %arg3[%c3_20, %c0_21] : memref<32x256xf32, #tpu.memory_space<vmem>>, vector<24x256xf32>
    tpu.vector_store %arg3[%c3_20, %c0_21], %27 {strides = array<i32>} : memref<32x256xf32, #tpu.memory_space<vmem>>, vector<24x256xf32>,
    %cst_22 = arith.constant 0.000000e+00 : f32
    %29 = vector.broadcast %cst_22 : f32 to vector<5x256xf32>
    %c27 = arith.constant 27 : index
    %c0_23 = arith.constant 0 : index
    %30 = vector.load %arg3[%c27, %c0_23] : memref<32x256xf32, #tpu.memory_space<vmem>>, vector<5x256xf32>
    tpu.vector_store %arg3[%c27, %c0_23], %29 {strides = array<i32>} : memref<32x256xf32, #tpu.memory_space<vmem>>, vector<5x256xf32>,
    %c0_24 = arith.constant 0 : index
    %c0_25 = arith.constant 0 : index
    %31 = vector.load %arg3[%c0_24, %c0_25] : memref<32x256xf32, #tpu.memory_space<vmem>>, vector<27x256xf32>
    %c0_26 = arith.constant 0 : index
    %c0_27 = arith.constant 0 : index
    %32 = vector.load %arg2[%c0_26, %c0_27] : memref<27x256xf32, #tpu.memory_space<vmem>>, vector<27x256xf32>
    tpu.vector_store %arg2[%c0_26, %c0_27], %31 {strides = array<i32>} : memref<27x256xf32, #tpu.memory_space<vmem>>, vector<27x256xf32>,
    return
  }
  func.func @transform_0(%arg0: i32) -> (i32, i32) {
    %c0_i32 = arith.constant 0 : i32
    %c0_i32_0 = arith.constant 0 : i32
    return %c0_i32, %arg0 : i32, i32
  }
  func.func @transform_1(%arg0: i32) -> (i32, i32) {
    %c0_i32 = arith.constant 0 : i32
    %c0_i32_0 = arith.constant 0 : i32
    return %c0_i32, %arg0 : i32, i32
  }
}

</mosaic_0001>

<bundles_post_ra>
// kernel: tpu_custom_call.1
= control target key start
LH: loop header
LB: loop body
LE: loop exit
PB: predicated region body
PF: predicated region fallthrough
CT: control target
= control target key end

     0   :  { %6 = vsyncpa [#allocation4], 0  ;;  %s2284_s0 = inlined_call_operand.hbm [shape: f32[3,512], index: 0, kind: input, shape index: {}]   ;;  %s2285_s1 = inlined_call_operand.vmem [shape: f32[512,27], index: 1, kind: output, shape index: {}]  }
   0x1   :  { %8 = vsyncpa [#allocation4 + $0x1], 0  ;;  %s1473_s6 = smov 0   ;;  %s1475_s7 = smov 0  }
   0x2   :  { %s1477_s8 = smov 0   ;;  %s1479_s9 = smov 0  }
   0x3 LB: > { %s1232_s10 = sadd.s32 4294967295, %s1453_s9   ;;  %s1493_s11 = sadd.s32 1, %s1453_s9   ;;  %s1453_s9 = sphi %s1479_s9, %s2305_s9   ;;  %s1449_s8 = sphi %s1477_s8, %s2304_s8   ;;  %s1445_s7 = sphi %s1475_s7, %s2303_s7   ;;  %s1441_s6 = sphi %s1473_s6, %s2302_s6  }
   0x4   : > { %s18_s12 = ssub.s32 %s1453_s9, %s1493_s11  ;;  %s21_s13 = sadd.s32 1, %s1449_s8 }
   0x5   : > { %p19_p0 = scmp.eq.s32.totalorder %s18_s12, 0  ;;  %p28_p1 = scmp.ne.s32.totalorder %s1449_s8, %s1445_s7 }
   0x6   : > { %p29_p2 = scmp.eq.s32.totalorder %s1453_s9, 0  ;;  %p34_p3 = scmp.ne.s32.totalorder %s1445_s7, %s1441_s6 }
   0x7   : > { %s1503_s14 = scalar_select %p19_p0, %s1449_s8, %s21_s13  }
   0x8   : > { %p30_p4 = por %p29_p2, %p28_p1  ;;  %p35_p5 = scmp.eq.s32.totalorder %s1232_s10, 0 }
   0x9   : > { %p1316_p6 = scmp.lt.s32.totalorder %s1453_s9, 2  ;;  %s84_s16 = sand.u32 1, %s1449_s8  }
   0xa   : > { %p1508_p7 = por %p35_p5, %p34_p3  ;;  %s1236_s17 = sshll.u32 %s84_s16, 3 }
   0xb   : > { %s1277_s18 = sshll.u32 %s1453_s9, 7  ;;  %s88_s22 = scalar_lea.vmem [#allocation3], %s1236_s17 }
   0xc   : > { %s1517_s21 = scalar_lea.hbm %s2284_s0, %s1277_s18  ;;  %s96_s23 = sshll.u32 %s88_s22, 4  ;;  %s1519_s23 = int_to_ptr.vmem [resolvable:$true] %s96_s23 }
   0xd   : > { %p1521_p8 = pnand %p1316_p6, %p30_p4  ;;  %s85_s25 = scalar_lea.sflag [#allocation4], %s84_s16 }
   0xe   : > { %s1389_s26 = scalar_lea.hbm %s1517_s21, 128  ;;  %s1394_s29 = scalar_lea.hbm %s2284_s0, 256 }
   0xf   : > { %p1390_p11 = scmp.ne.s32.totalorder %s1517_s21, %s1389_s26  ;;  %p1391_p12 = pneg %p1521_p8 }
  0x10   : > { %p1395_p1 = scmp.lt.u32.totalorder %s1517_s21, %s2284_s0  ;;  %p1396_p2 = scmp.lt.u32.totalorder %s1394_s29, %s1389_s26 }
  0x11   : > { %p1392_p13 = pnand %p1391_p12, %p1390_p11  ;;  %p1398_p4 = scmp.lt.u32.totalorder %s1389_s26, %s1517_s21 }
  0x12   : > { %p1397_p3 = por %p1396_p2, %p1395_p1 }
  0x13   : > { %p1393_p0 = pneg %p1392_p13 }
  0x14   : > { %p1399_p5 = por %p1398_p4, %p1397_p3 }
  0x16   : > { %p1400_p6 = pnand %p1399_p5, %p1393_p0 }
  0x18   : > { %1403 = shalt.err (!%p1400_p6)
}
  0x19   : > { %s1404_s3 = scalar_lea.vmem %s1519_s23, 128  ;;  %s1455_s4 = smov [#allocation3]  }
  0x1a   : > { %p1405_p11 = scmp.ne.s32.totalorder %s1519_s23, %s1404_s3  ;;  %s1409_s5 = sshll.u32 %s1455_s4, 4  ;;  %s1410_s5 = int_to_ptr.vmem [resolvable:$false] %s1409_s5 }
  0x1b   : > { %s1411_s6 = scalar_lea.vmem %s1410_s5, 256  ;;  %p1412_p10 = scmp.lt.s32.totalorder %s1519_s23, %s1410_s5 }
  0x1c   : > { %p1407_p13 = pnand %p1405_p11, %p1391_p12  ;;  %p1413_p1 = scmp.lt.s32.totalorder %s1411_s6, %s1404_s3 }
  0x1e   : > { %p1408_p9 = pneg %p1407_p13  ;;  %p1414_p2 = por %p1413_p1, %p1412_p10 }
  0x20   : > { %p1415_p3 = pnand %p1414_p2, %p1408_p9 }
  0x22   : > { %1418 = shalt.err (!%p1415_p3)
}
  0x23   : > { %1315 = dma.hbm_to_vmem [thread:$0]  (!%p1521_p8), %s1517_s21, 128, %s1519_s23, %s85_s25  }
  0x24   : > { %p2288_p0 = scmp.lt.s32.totalorder %s1453_s9, 3  ;;  %p2289_p4 = scmp.ge.s32.totalorder %s1453_s9, 1 }
  0x26   : > { %p102_p12 = pnand %p2289_p4, %p2288_p0 }
  0x27   : > { %s107_s12 = sand.u32 (!%p102_p12), 1, %s1445_s7  }
  0x28   : > { %105 = sbr.rel (%p102_p12) target bundleno = 482 (0x1e2), region = 24  ;;  %s1240_s13 = sshll.u32 (!%p102_p12), %s107_s12, 3 }
  0x29   : > { %s108_s16 = scalar_lea.sflag (!%p102_p12), [#allocation4], %s107_s12  ;;  %s111_s17 = scalar_lea.vmem (!%p102_p12), [#allocation3], %s1240_s13 }
  0x2f   : > { %1436 = dma.done.wait (%p1508_p7), %s108_s16, 128  }
  0x30   : > { %1438 = vsyncadd (%p1508_p7), %s108_s16, 4294967168  ;;  %v137_v0 = vld [vmem:[%s111_s17] sm:$0x77]  ;;  %v1456_v57 = vmov 683565275   ;;  %s1241_s15 = sshll.u32 %s1232_s10, 5 }
  0x31   : > { %141 = vst [vmem:[#allocation2] sm:$0x7] %v137_v0  ;;  %v143_v1 = vrot.slane %v137_v0, 5  ;;  %v160_v2 = vmul.f32 2.0, %v137_v0  ;;  %v139_v3 = vcombine.high %v137_v0, %v137_v0  ;;  %v149_v4 = vadd.f32 1.5707964, %v137_v0 }
  0x32   : > { %v180_v5 = vmul.f32 4.0, %v137_v0  ;;  %v198_v6 = vmul.f32 8.0, %v137_v0  ;;  %v1457_v59 = vmov 2475754826   ;;  %v1458_v61 = vmov 2131351028  }
  0x33   : > { %147 = vst [vmem:[#allocation2] sm:$0x38] %v143_v1  ;;  %v163_v7 = vrot.slane %v160_v2, 2  ;;  %142 = vst [vmem:[#allocation2 + $0x8] sm:$0x7] %v139_v3  ;;  %v144_v8 = vrot.slane %v139_v3, 5  ;;  %v162_v9 = vcombine.high %v160_v2, %v160_v2  ;;  %v151_v13 = vcombine.high %v149_v4, %v149_v4 }
  0x34   : > { %v152_v10 = vrot.slane %v149_v4, 1  ;;  %v183_v11 = vrot.slane %v180_v5, 7  ;;  %v200_v12 = vcombine.low %v198_v6, %v198_v6  ;;  %203 = vst [vmem:[#allocation2 + $0x18] sm:$0x70] %v198_v6  ;;  %v182_v14 = vcombine.high %v180_v5, %v180_v5  ;;  %p132_p7 = scmp.lt.s32.totalorder %s1241_s15, 63 }
  0x35   : > { %167 = vst [vmem:[#allocation2 + $0x10] ss:$-12 sps:$4 sm:$0xc1] %v163_v7   ;;  %148 = vst [vmem:[#allocation2 + $0x8] sm:$0x38] %v144_v8  ;;  %v164_v15 = vrot.slane %v162_v9, 2 }
  0x36   : > { %156 = vst [vmem:[#allocation2 + $0x20] ss:$-12 sps:$4 sm:$0x83] %v152_v10   ;;  %v171_v16 = vadd.f32 1.5707964, %v160_v2  ;;  %v153_v18 = vrot.slane %v151_v13, 1 }
  0x37   : > { %v189_v17 = vadd.f32 1.5707964, %v180_v5  ;;  %187 = vst [vmem:[#allocation2 + $0x10] sm:$0xe] %v183_v11  ;;  %202 = vst [vmem:[#allocation2 + $0x10] sm:$0x70] %v200_v12 }
  0x38   : > { %v184_v19 = vrot.slane %v182_v14, 7  ;;  %v204_v20 = vadd.f32 1.5707964, %v198_v6  ;;  %168 = vst [vmem:[#allocation2 + $0x18] ss:$-12 sps:$4 sm:$0xc1] %v164_v15   ;;  %v173_v23 = vcombine.high %v171_v16, %v171_v16 }
  0x39   : > { %v174_v21 = vrot.slane %v171_v16, 6  ;;  %v192_v22 = vrot.slane %v189_v17, 3  ;;  %v191_v24 = vcombine.high %v189_v17, %v189_v17  ;;  %157 = vst [vmem:[#allocation2 + $0x28] ss:$-12 sps:$4 sm:$0x83] %v153_v18   ;;  %s2307_s15 = smov (!%p132_p7, %s1241_s15), 63 }
  0x3a   : > { %188 = vst [vmem:[#allocation2 + $0x18] sm:$0xe] %v184_v19  ;;  %208 = vst [vmem:[#allocation2 + $0x30] sm:$0x7] %v204_v20  ;;  %v175_v25 = vrot.slane %v173_v23, 6  ;;  %v206_v27 = vcombine.high %v204_v20, %v204_v20  ;;  %s1242_s18 = sshll.u32 %s2307_s15, 3 }
  0x3b   : > { %178 = vst [vmem:[#allocation2 + $0x20] sm:$0x1c] %v174_v21  ;;  %196 = vst [vmem:[#allocation2 + $0x20] sm:$0xe0] %v192_v22  ;;  %v193_v26 = vrot.slane %v191_v24, 3  ;;  %s2205_s21 = scalar_lea.vmem %s2285_s1, %s1242_s18 }
  0x3c   : > { %179 = vst [vmem:[#allocation2 + $0x28] sm:$0x1c] %v175_v25  ;;  %v1561_v28 = vld [vmem:[#allocation2] sm:$0xf8]  ;;  %209 = vst [vmem:[#allocation2 + $0x38] sm:$0x7] %v206_v27 }
  0x3d   : > { %197 = vst [vmem:[#allocation2 + $0x28] sm:$0xe0] %v193_v26  ;;  %v218_v29 = vand.u32 2147483647, %v1561_v28  ;;  %v221_v30 = vand.u32 2139095040, %v1561_v28  ;;  %vm220_vm12 = vcmp.lt.s32.totalorder %v1561_v28, 0 }
  0x3e   : > { %v1565_v31 = vld [vmem:[#allocation2 + $0x10] sm:$0xff]  ;;  %v1459_v63 = vmov 2102212464   ;;  %v1460_v1 = vmov 920167782  }
  0x3f   : > { %v1567_v32 = vld [vmem:[#allocation2 + $0x8] sm:$0xf8]  ;;  %v429_v33 = vand.u32 2139095040, %v1565_v31  ;;  %v222_v34 = vshrl.u32 %v221_v30, 23  ;;  %v225_v35 = vand.u32 8388607, %v218_v29 }
  0x40   : > { %v322_v36 = vand.u32 2147483647, %v1567_v32  ;;  %v325_v37 = vand.u32 2139095040, %v1567_v32  ;;  %v426_v43 = vand.u32 2147483647, %v1565_v31  ;;  %vm324_vm15 = vcmp.lt.s32.totalorder %v1567_v32, 0 }
  0x41   : > { %v1243_v38 = vadd.s32 4294967169, %v222_v34  ;;  %v430_v39 = vshrl.u32 %v429_v33, 23  ;;  %v226_v44 = vor.u32 8388608, %v225_v35  ;;  %v1461_v8 = vmov 1326507024  }
  0x42   : > { %v326_v40 = vshrl.u32 %v325_v37, 23  ;;  %v329_v41 = vand.u32 8388607, %v322_v36  ;;  %v1579_v52 = vand.u32 8388607, %v426_v43 }
  0x43   : > { %v228_v42 = vadd.s32 1, %v1243_v38  ;;  %v1251_v47 = vadd.s32 4294967169, %v430_v39  ;;  %v1581_v53 = vshll.u32 %v226_v44, 8 }
  0x44   : > { %v1247_v45 = vadd.s32 4294967169, %v326_v40  ;;  %v330_v46 = vor.u32 8388608, %v329_v41 }
  0x45   : > { %vm229_vm0 = vcmp.gt.s32.totalorder %v228_v42, 0  ;;  %v1585_v55 = vadd.s32 1, %v1251_v47 }
  0x46   : > { %v230_v48 = vsel %vm229_vm0, %v228_v42, 0  ;;  %v332_v49 = vadd.s32 1, %v1247_v45  ;;  %v1583_v54 = vshll.u32 %v330_v46, 8 }
  0x47   : > { %v231_v50 = vshrl.u32 %v230_v48, 5  ;;  %v232_v51 = vand.u32 31, %v230_v48  ;;  %vm437_vm8 = vcmp.gt.s32.totalorder %v1585_v55, 0 }
  0x48   : > { %vm333_vm1 = vcmp.gt.s32.totalorder %v332_v49, 0 }
  0x49   : > { %v233_v56 = vsub.s32 32, %v232_v51  ;;  %v235_v58 = vshll.u32 %v1456_v57, %v232_v51  ;;  %v238_v60 = vshll.u32 %v1457_v59, %v232_v51  ;;  %v241_v62 = vshll.u32 %v1458_v61, %v232_v51 }
  0x4a   : > { %v244_v0 = vshll.u32 %v1459_v63, %v232_v51  ;;  %v247_v2 = vshll.u32 %v1460_v1, %v232_v51  ;;  %vm250_vm2 = vcmp.lt.s32.totalorder %v231_v50, 1  ;;  %vm251_vm3 = vcmp.lt.s32.totalorder %v231_v50, 2 }
  0x4b   : > { %v234_v3 = vshrl.u32 %v1456_v57, %v233_v56  ;;  %v236_v4 = vshrl.u32 %v1457_v59, %v233_v56  ;;  %v239_v5 = vshrl.u32 %v1458_v61, %v233_v56  ;;  %v242_v6 = vshrl.u32 %v1459_v63, %v233_v56 }
  0x4c   : > { %v245_v7 = vshrl.u32 %v1460_v1, %v233_v56  ;;  %v248_v9 = vshrl.u32 %v1461_v8, %v233_v56  ;;  %vm252_vm4 = vcmp.lt.s32.totalorder %v231_v50, 3  ;;  %vm253_vm5 = vcmp.lt.s32.totalorder %v231_v50, 4 }
  0x4d   : > { %v237_v10 = vor.u32 %v236_v4, %v235_v58  ;;  %v240_v11 = vor.u32 %v239_v5, %v238_v60  ;;  %v243_v12 = vor.u32 %v242_v6, %v241_v62  ;;  %v334_v13 = vsel %vm333_vm1, %v332_v49, 0 }
  0x4e   : > { %v246_v14 = vor.u32 %v245_v7, %v244_v0  ;;  %v249_v15 = vor.u32 %v248_v9, %v247_v2  ;;  %v335_v16 = vshrl.u32 %v334_v13, 5  ;;  %v336_v17 = vand.u32 31, %v334_v13 }
  0x4f   : > { %v254_v18 = vsel %vm250_vm2, %v234_v3, %v237_v10  ;;  %v255_v19 = vsel %vm253_vm5, %v243_v12, 2102212464  ;;  %v258_v20 = vsel %vm250_vm2, %v237_v10, %v240_v11  ;;  %v262_v21 = vsel %vm250_vm2, %v240_v11, %v243_v12 }
  0x50   : > { %v256_v22 = vsel %vm252_vm4, %v240_v11, %v255_v19  ;;  %v259_v23 = vsel %vm253_vm5, %v246_v14, 920167782  ;;  %v263_v24 = vsel %vm253_vm5, %v249_v15, 1326507024  ;;  %v337_v25 = vsub.s32 32, %v336_v17 }
  0x51   : > { %v257_v26 = vsel %vm251_vm3, %v254_v18, %v256_v22  ;;  %v260_v27 = vsel %vm252_vm4, %v243_v12, %v259_v23  ;;  %v264_v30 = vsel %vm252_vm4, %v246_v14, %v263_v24  ;;  %v339_v33 = vshll.u32 %v1456_v57, %v336_v17 }
  0x52   : > { %v261_v34 = vsel %vm251_vm3, %v258_v20, %v260_v27  ;;  %v265_v35 = vsel %vm251_vm3, %v262_v21, %v264_v30  ;;  %v273_v37 = vmul.u32 %v1581_v53, %v257_v26  ;;  %v338_v38 = vshrl.u32 %v1456_v57, %v337_v25  ;;  %v1653_v27 = vld [vmem:[#allocation2 + $0x18] sm:$0xff] }
  0x53   : > { %v1612_v39 = vmul.u32.u64.low %v1581_v53, %v265_v35  ;;  %v1613_v40 = vmul.u32.u64.high %v1581_v53, %v265_v35, %v1612_v39  ;;  %v1616_v41 = vmul.u32.u64.low %v1581_v53, %v261_v34  ;;  %v1617_v42 = vmul.u32.u64.high %v1581_v53, %v261_v34, %v1616_v41 }
  0x54   : > { %v340_v44 = vshrl.u32 %v1457_v59, %v337_v25  ;;  %v342_v45 = vshll.u32 %v1457_v59, %v336_v17  ;;  %v343_v46 = vshrl.u32 %v1458_v61, %v337_v25  ;;  %v345_v47 = vshll.u32 %v1458_v61, %v336_v17 }
  0x55   : > { %v346_v48 = vshrl.u32 %v1459_v63, %v337_v25  ;;  %v348_v49 = vshll.u32 %v1459_v63, %v336_v17  ;;  %v349_v50 = vshrl.u32 %v1460_v1, %v337_v25  ;;  %v351_v51 = vshll.u32 %v1460_v1, %v336_v17 }
  0x56   : > { %v341_v56 = vor.u32 %v340_v44, %v339_v33  ;;  %v344_v53 = vor.u32 %v343_v46, %v342_v45  ;;  %v352_v58 = vshrl.u32 %v1461_v8, %v337_v25  ;;  %vm354_vm6 = vcmp.lt.s32.totalorder %v335_v16, 1 }
  0x57   : > { %vm275_vm7 = vc.u32 %v1613_v40, %v1616_v41  ;;  %v276_v60 = vadd.s32 1, %v1617_v42  ;;  %v347_v62 = vor.u32 %v346_v48, %v345_v47  ;;  %v350_v0 = vor.u32 %v349_v50, %v348_v49 }
  0x58   : > { %v353_v2 = vor.u32 %v352_v58, %v351_v51  ;;  %vm355_vm9 = vcmp.lt.s32.totalorder %v335_v16, 2  ;;  %vm356_vm10 = vcmp.lt.s32.totalorder %v335_v16, 3  ;;  %vm357_vm11 = vcmp.lt.s32.totalorder %v335_v16, 4 }
  0x59   : > { %v277_v3 = vsel %vm275_vm7, %v276_v60, %v1617_v42  ;;  %v358_v4 = vsel %vm354_vm6, %v338_v38, %v341_v56  ;;  %v362_v5 = vsel %vm354_vm6, %v341_v56, %v344_v53  ;;  %v359_v7 = vsel %vm357_vm11, %v347_v62, 2102212464 }
  0x5a   : > { %v278_v6 = vadd.s32 %v277_v3, %v273_v37  ;;  %v363_v9 = vsel %vm357_vm11, %v350_v0, 920167782  ;;  %v366_v10 = vsel %vm354_vm6, %v344_v53, %v347_v62  ;;  %v360_v11 = vsel %vm356_vm10, %v344_v53, %v359_v7 }
  0x5b   : > { %v364_v12 = vsel %vm356_vm10, %v347_v62, %v363_v9  ;;  %v367_v13 = vsel %vm357_vm11, %v353_v2, 1326507024  ;;  %v438_v14 = vsel %vm437_vm8, %v1585_v55, 0  ;;  %v434_v19 = vor.u32 8388608, %v1579_v52 }
  0x5c   : > { %v279_v15 = vadd.s32 536870912, %v278_v6  ;;  %v365_v17 = vsel %vm355_vm9, %v362_v5, %v364_v12  ;;  %v368_v18 = vsel %vm356_vm10, %v350_v0, %v367_v13  ;;  %v361_v20 = vsel %vm355_vm9, %v358_v4, %v360_v11 }
  0x5d   : > { %v369_v21 = vsel %vm355_vm9, %v366_v10, %v368_v18  ;;  %v1645_v22 = vmul.u32.u64.low %v1583_v54, %v365_v17  ;;  %v1646_v23 = vmul.u32.u64.high %v1583_v54, %v365_v17, %v1645_v22  ;;  %v440_v55 = vand.u32 31, %v438_v14 }
  0x5e   : > { %v280_v24 = vshrl.u32 %v279_v15, 30  ;;  %v1650_v25 = vmul.u32.u64.low %v1583_v54, %v369_v21  ;;  %v1651_v26 = vmul.u32.u64.high %v1583_v54, %v369_v21, %v1650_v25  ;;  %v377_v52 = vmul.u32 %v1583_v54, %v361_v20 }
  0x5f   : > { %v1656_v33 = vshrl.u32 %v438_v14, 5  ;;  %v441_v16 = vsub.s32 32, %v440_v55  ;;  %v380_v34 = vadd.s32 1, %v1646_v23  ;;  %v1660_v35 = vshll.u32 %v434_v19, 8 }
  0x60   : > { %v281_v30 = vshll.u32 %v280_v24, 30  ;;  %v530_v37 = vand.u32 2147483647, %v1653_v27  ;;  %v533_v38 = vand.u32 2139095040, %v1653_v27  ;;  %vm379_vm13 = vc.u32 %v1651_v26, %v1645_v22 }
  0x61   : > { %v443_v54 = vshll.u32 %v1456_v57, %v440_v55  ;;  %v446_v42 = vshll.u32 %v1457_v59, %v440_v55  ;;  %v381_v44 = vsel %vm379_vm13, %v380_v34, %v1646_v23  ;;  %v444_v45 = vshrl.u32 %v1457_v59, %v441_v16 }
  0x62   : > { %v1664_v39 = vsub.s32 %v278_v6, %v281_v30  ;;  %v449_v46 = vshll.u32 %v1458_v61, %v440_v55  ;;  %v452_v47 = vshll.u32 %v1459_v63, %v440_v55  ;;  %v382_v49 = vadd.s32 %v381_v44, %v377_v52 }
  0x63   : > { %v447_v50 = vshrl.u32 %v1458_v61, %v441_v16  ;;  %vm461_vm14 = vcmp.lt.s32.totalorder %v1656_v33, 4  ;;  %v304_v51 = vsub.s32 4, %v280_v24  ;;  %v450_v56 = vshrl.u32 %v1459_v63, %v441_v16 }
  0x64   : > { %v284_v48 = vsub.s32 0, %v1664_v39  ;;  %v453_v53 = vshrl.u32 %v1460_v1, %v441_v16  ;;  %v455_v58 = vshll.u32 %v1460_v1, %v440_v55  ;;  %v383_v62 = vadd.s32 536870912, %v382_v49 }
  0x65   : > { %v442_v0 = vshrl.u32 %v1456_v57, %v441_v16  ;;  %v445_v2 = vor.u32 %v444_v45, %v443_v54  ;;  %v448_v3 = vor.u32 %v447_v50, %v446_v42  ;;  %v451_v4 = vor.u32 %v450_v56, %v449_v46 }
  0x66   : > { %v1244_v60 = vmin.u32 %v284_v48, %v1664_v39  ;;  %v454_v5 = vor.u32 %v453_v53, %v452_v47  ;;  %v456_v6 = vshrl.u32 %v1461_v8, %v441_v16  ;;  %vm458_vm0 = vcmp.lt.s32.totalorder %v1656_v33, 1 }
  0x67   : > { %vm460_vm1 = vcmp.lt.s32.totalorder %v1656_v33, 3  ;;  %v534_v9 = vshrl.u32 %v533_v38, 23  ;;  %v274_v10 = vadd.s32 %v1616_v41, %v1613_v40  ;;  %v384_v11 = vshrl.u32 %v383_v62, 30 }
  0x68   : > { %v286_v7 = vclz %v1244_v60  ;;  %v457_v12 = vor.u32 %v456_v6, %v455_v58  ;;  %v463_v13 = vsel %vm461_vm14, %v451_v4, 2102212464  ;;  %v305_v15 = vsel %vm220_vm12, %v304_v51, %v280_v24 }
  0x69   : > { %vm459_vm2 = vcmp.lt.s32.totalorder %v1656_v33, 2  ;;  %v467_v17 = vsel %vm461_vm14, %v454_v5, 920167782  ;;  %v385_v18 = vshll.u32 %v384_v11, 30  ;;  %v462_v19 = vsel %vm458_vm0, %v442_v0, %v445_v2 }
  0x6a   : > { %v1245_v14 = vadd.s32 4294967294, %v286_v7  ;;  %v466_v40 = vsel %vm458_vm0, %v445_v2, %v448_v3  ;;  %v468_v41 = vsel %vm460_vm1, %v451_v4, %v467_v17  ;;  %v464_v20 = vsel %vm460_vm1, %v448_v3, %v463_v13 }
  0x6b   : > { %v470_v21 = vsel %vm458_vm0, %v448_v3, %v451_v4  ;;  %v471_v23 = vsel %vm461_vm14, %v457_v12, 1326507024  ;;  %v1707_v25 = vsub.s32 %v382_v49, %v385_v18  ;;  %v408_v55 = vsub.s32 4, %v384_v11 }
  0x6c   : > { %vm1246_vm3 = vcmp.lt.s32.totalorder %v1245_v14, 0  ;;  %v472_v30 = vsel %vm460_vm1, %v454_v5, %v471_v23  ;;  %v469_v38 = vsel %vm459_vm2, %v466_v40, %v468_v41  ;;  %v465_v42 = vsel %vm459_vm2, %v462_v19, %v464_v20 }
  0x6d   : > { %v289_v24 = vsel %vm1246_vm3, 0, %v1245_v14  ;;  %v388_v54 = vsub.s32 0, %v1707_v25  ;;  %v473_v44 = vsel %vm459_vm2, %v470_v21, %v472_v30  ;;  %v1255_v45 = vadd.s32 4294967169, %v534_v9 }
  0x6e   : > { %v290_v52 = vsub.s32 32, %v289_v24  ;;  %v291_v16 = vshll.u32 %v1664_v39, %v289_v24  ;;  %v294_v34 = vsub.s32 4294967266, %v289_v24  ;;  %v409_v50 = vsel %vm324_vm15, %v408_v55, %v384_v11 }
  0x6f   : > { %v1720_v48 = vmul.u32.u64.low %v1660_v35, %v473_v44  ;;  %v1721_v49 = vmul.u32.u64.high %v1660_v35, %v473_v44, %v1720_v48  ;;  %v1248_v39 = vmin.u32 %v388_v54, %v1707_v25  ;;  %vm1733_vm4 = vcmp.le.f32.partialorder %v218_v29, 0.7853982 }
  0x70   : > { %v292_v46 = vshrl.u32 %v274_v10, %v290_v52  ;;  %v295_v47 = vadd.s32 127, %v294_v34  ;;  %v1727_v51 = vmul.u32.u64.low %v1660_v35, %v469_v38  ;;  %v1728_v56 = vmul.u32.u64.high %v1660_v35, %v469_v38, %v1727_v51 }
  0x71   : > { %v540_v60 = vadd.s32 1, %v1255_v45  ;;  %v307_v62 = vsel %vm1733_vm4, 0, %v305_v15  ;;  %vm1741_vm5 = vcmp.le.f32.partialorder %v322_v36, 0.7853982  ;;  %v390_v2 = vclz %v1248_v39 }
  0x72   : > { %v293_v53 = vor.u32 %v292_v46, %v291_v16  ;;  %v296_v58 = vshll.u32 %v295_v47, 23  ;;  %v481_v3 = vmul.u32 %v1660_v35, %v465_v42  ;;  %v411_v5 = vsel %vm1741_vm5, 0, %v409_v50 }
  0x73   : > { %vm483_vm6 = vc.u32 %v1721_v49, %v1727_v51  ;;  %v1249_v6 = vadd.s32 4294967294, %v390_v2  ;;  %v484_v7 = vadd.s32 1, %v1728_v56  ;;  %v537_v36 = vand.u32 8388607, %v530_v37 }
  0x74   : > { %v297_v4 = vor.u32 4788187, %v296_v58  ;;  %v300_v29 = vcvt.s32.f32 %v293_v53  ;;  %vm541_vm7 = vcmp.gt.s32.totalorder %v540_v60, 0  ;;  %v311_v10 = vadd.s32 3, %v307_v62 }
  0x75   : > { %v378_v35 = vadd.s32 %v1645_v22, %v1651_v26  ;;  %v542_v11 = vsel %vm541_vm7, %v540_v60, 0  ;;  %vm1250_vm8 = vcmp.lt.s32.totalorder %v1249_v6, 0  ;;  %v415_v12 = vadd.s32 3, %v411_v5 }
  0x76   : > { %v298_v9 = vand.u32 2147483647, %v297_v4  ;;  %v485_v13 = vsel %vm483_vm6, %v484_v7, %v1728_v56  ;;  %v544_v14 = vand.u32 31, %v542_v11  ;;  %v393_v17 = vsel %vm1250_vm8, 0, %v1249_v6  ;;  %v1790_v7 = vld [vmem:[#allocation2 + $0x20] sm:$0xff] }
  0x77   : > { %v486_v18 = vadd.s32 %v485_v13, %v481_v3  ;;  %v394_v19 = vsub.s32 32, %v393_v17  ;;  %v395_v40 = vshll.u32 %v1707_v25, %v393_v17  ;;  %v398_v41 = vsub.s32 4294967266, %v393_v17 }
  0x78   : > { %v301_v15 = vmul.f32 %v300_v29, %v298_v9  ;;  %v1757_v21 = vand.u32 3, %v311_v10  ;;  %v545_v24 = vsub.s32 32, %v544_v14  ;;  %v1759_v26 = vand.u32 3, %v415_v12 }
  0x79   : > { %v487_v23 = vadd.s32 536870912, %v486_v18  ;;  %v396_v55 = vshrl.u32 %v378_v35, %v394_v19  ;;  %v399_v22 = vadd.s32 127, %v398_v41  ;;  %v538_v30 = vor.u32 8388608, %v537_v36 }
  0x7a   : > { %v302_v20 = vxor.u32 2147483648, %v301_v15  ;;  %v1763_v34 = vshrl.u32 %v542_v11, 5  ;;  %v547_v38 = vshll.u32 %v1456_v57, %v544_v14  ;;  %vm428_vm9 = vcmp.lt.s32.totalorder %v1565_v31, 0 }
  0x7b   : > { %v488_v16 = vshrl.u32 %v487_v23, 30  ;;  %v397_v54 = vor.u32 %v396_v55, %v395_v40  ;;  %v400_v42 = vshll.u32 %v399_v22, 23  ;;  %v550_v44 = vshll.u32 %v1457_v59, %v544_v14 }
  0x7c   : > { %v303_v52 = vsel %vm220_vm12, %v302_v20, %v301_v15  ;;  %v548_v46 = vshrl.u32 %v1457_v59, %v545_v24  ;;  %v551_v47 = vshrl.u32 %v1458_v61, %v545_v24  ;;  %v553_v50 = vshll.u32 %v1458_v61, %v544_v14 }
  0x7d   : > { %v306_v25 = vsel %vm1733_vm4, %v1561_v28, %v303_v52  ;;  %v489_v45 = vshll.u32 %v488_v16, 30  ;;  %v401_v48 = vor.u32 4788187, %v400_v42  ;;  %v404_v39 = vcvt.s32.f32 %v397_v54 }
  0x7e   : > { %1357 = vcosq.f32 %v306_v25  ;;  %vm317_vm10 = vcmp.eq.s32.totalorder %v1757_v21, 2  ;;  %v554_v33 = vshrl.u32 %v1459_v63, %v545_v24  ;;  %v556_v53 = vshll.u32 %v1459_v63, %v544_v14 }
  0x7f   : > { %1359 = vsinq.f32 %v306_v25  ;;  %v1775_v56 = vsub.s32 %v486_v18, %v489_v45  ;;  %v557_v58 = vshrl.u32 %v1460_v1, %v545_v24  ;;  %vm314_vm11 = vcmp.eq.s32.totalorder %v1757_v21, 0 }
  0x80   : > { %v402_v60 = vand.u32 2147483647, %v401_v48  ;;  %v482_v62 = vadd.s32 %v1727_v51, %v1721_v49  ;;  %v559_v2 = vshll.u32 %v1460_v1, %v544_v14  ;;  %v1784_v3 = vshll.u32 %v538_v30, 8 }
  0x81   : > { %vm313_vm12 = vcmp.lt.s32.totalorder %v1757_v21, 2  ;;  %v492_v4 = vsub.s32 0, %v1775_v56  ;;  %v512_v29 = vsub.s32 4, %v488_v16  ;;  %v546_v5 = vshrl.u32 %v1456_v57, %v545_v24 }
  0x82   : > { %v560_v6 = vshrl.u32 %v1461_v8, %v545_v24  ;;  %vm310_vm13 = vweird.f32 %v1561_v28  ;;  %v405_v36 = vmul.f32 %v404_v39, %v402_v60  ;;  %v549_v9 = vor.u32 %v548_v46, %v547_v38 }
  0x83   : > { %v552_v49 = vor.u32 %v551_v47, %v550_v44  ;;  %v558_v51 = vor.u32 %v557_v58, %v556_v53  ;;  %v1252_v10 = vmin.u32 %v492_v4, %v1775_v56  ;;  %v555_v35 = vor.u32 %v554_v33, %v553_v50 }
  0x84   : > { %vm562_vm14 = vcmp.lt.s32.totalorder %v1763_v34, 1  ;;  %vm565_vm0 = vcmp.lt.s32.totalorder %v1763_v34, 4  ;;  %v406_v11 = vxor.u32 2147483648, %v405_v36  ;;  %vm1798_vm1 = vcmp.le.f32.partialorder %v426_v43, 0.7853982 }
  0x85   : > { %v561_v13 = vor.u32 %v560_v6, %v559_v2  ;;  %vm564_vm2 = vcmp.lt.s32.totalorder %v1763_v34, 3  ;;  %v637_v14 = vand.u32 2139095040, %v1790_v7  ;;  %v494_v15 = vclz %v1252_v10 }
  0x86   : > { %v513_v17 = vsel %vm428_vm9, %v512_v29, %v488_v16  ;;  %vm563_vm3 = vcmp.lt.s32.totalorder %v1763_v34, 2  ;;  %v567_v18 = vsel %vm565_vm0, %v555_v35, 2102212464  ;;  %v407_v43 = vsel %vm324_vm15, %v406_v11, %v405_v36 }
  0x87   : > { %v566_v19 = vsel %vm562_vm14, %v546_v5, %v549_v9  ;;  %v570_v40 = vsel %vm562_vm14, %v549_v9, %v552_v49  ;;  %v571_v41 = vsel %vm565_vm0, %v558_v51, 920167782  ;;  %v410_v23 = vsel %vm1741_vm5, %v1567_v32, %v407_v43 }
  0x88   : > { %v1358_v20 = vpop.eup %1357  ;;  %v1253_v24 = vadd.s32 4294967294, %v494_v15  ;;  %v572_v55 = vsel %vm564_vm2, %v555_v35, %v571_v41  ;;  %v574_v22 = vsel %vm562_vm14, %v552_v49, %v555_v35  ;;  %1361 = vcosq.f32 %v410_v23 }
  0x89   : > { %v1360_v30 = vpop.eup %1359  ;;  %v318_v52 = vxor.u32 2147483648, %v1358_v20  ;;  %v568_v16 = vsel %vm564_vm2, %v552_v49, %v567_v18  ;;  %v575_v38 = vsel %vm565_vm0, %v561_v13, 1326507024  ;;  %1363 = vsinq.f32 %v410_v23 }
  0x8a   : > { %v315_v25 = vxor.u32 2147483648, %v1360_v30  ;;  %vm1254_vm15 = vcmp.lt.s32.totalorder %v1253_v24, 0  ;;  %v576_v0 = vsel %vm564_vm2, %v558_v51, %v575_v38  ;;  %v573_v44 = vsel %vm563_vm3, %v570_v40, %v572_v55 }
  0x8b   : > { %v319_v54 = vsel %vm317_vm10, %v318_v52, %v1360_v30  ;;  %v497_v42 = vsel %vm1254_vm15, 0, %v1253_v24  ;;  %v577_v45 = vsel %vm563_vm3, %v574_v22, %v576_v0  ;;  %v638_v58 = vshrl.u32 %v637_v14, 23 }
  0x8c   : > { %v316_v46 = vsel %vm314_vm11, %v1358_v20, %v315_v25  ;;  %v498_v47 = vsub.s32 32, %v497_v42  ;;  %v499_v48 = vshll.u32 %v1775_v56, %v497_v42  ;;  %v502_v39 = vsub.s32 4294967266, %v497_v42 }
  0x8d   : > { %v320_v50 = vsel %vm313_vm12, %v316_v46, %v319_v54  ;;  %v1842_v33 = vmul.u32.u64.low %v1784_v3, %v577_v45  ;;  %v1843_v53 = vmul.u32.u64.high %v1784_v3, %v577_v45, %v1842_v33  ;;  %v515_v29 = vsel %vm1798_vm1, 0, %v513_v17  ;;  %v1876_v54 = vld [vmem:[#allocation2 + $0x28] sm:$0xff] }
  0x8e   : > { %v321_v60 = vsel %vm310_vm13, nan, %v320_v50  ;;  %v500_v2 = vshrl.u32 %v482_v62, %v498_v47  ;;  %v503_v4 = vadd.s32 127, %v502_v39  ;;  %v569_v56 = vsel %vm563_vm3, %v566_v19, %v568_v16 }
  0x8f   : > { %1050 = vst [vmem:[#allocation2] sm:$0xf8] %v321_v60  ;;  %v1852_v21 = vmul.u32.u64.low %v1784_v3, %v573_v44  ;;  %v1853_v5 = vmul.u32.u64.high %v1784_v3, %v573_v44, %v1852_v21  ;;  %v1259_v6 = vadd.s32 4294967169, %v638_v58  ;;  %vm414_vm4 = vweird.f32 %v1567_v32 }
  0x90   : > { %v501_v36 = vor.u32 %v500_v2, %v499_v48  ;;  %v504_v9 = vshll.u32 %v503_v4, 23  ;;  %v519_v28 = vadd.s32 3, %v515_v29  ;;  %v634_v62 = vand.u32 2147483647, %v1790_v7 }
  0x91   : > { %v644_v49 = vadd.s32 1, %v1259_v6  ;;  %v585_v35 = vmul.u32 %v1784_v3, %v569_v56  ;;  %vm587_vm5 = vc.u32 %v1843_v53, %v1852_v21  ;;  %vm417_vm6 = vcmp.lt.s32.totalorder %v1759_v26, 2 }
  0x92   : > { %v505_v51 = vor.u32 4788187, %v504_v9  ;;  %v508_v10 = vcvt.s32.f32 %v501_v36  ;;  %v1362_v34 = vpop.eup %1361  ;;  %vm421_vm7 = vcmp.eq.s32.totalorder %v1759_v26, 2  ;;  %v588_v11 = vadd.s32 1, %v1853_v5 }
  0x93   : > { %vm645_vm8 = vcmp.gt.s32.totalorder %v644_v49, 0  ;;  %v1364_v13 = vpop.eup %1363  ;;  %vm418_vm10 = vcmp.eq.s32.totalorder %v1759_v26, 0  ;;  %v422_v14 = vxor.u32 2147483648, %v1362_v34  ;;  %v1865_v43 = vand.u32 3, %v519_v28 }
  0x94   : > { %v506_v15 = vand.u32 2147483647, %v505_v51  ;;  %v646_v17 = vsel %vm645_vm8, %v644_v49, 0  ;;  %v419_v18 = vxor.u32 2147483648, %v1364_v13  ;;  %v589_v3 = vsel %vm587_vm5, %v588_v11, %v1853_v5 }
  0x95   : > { %v648_v19 = vand.u32 31, %v646_v17  ;;  %v423_v41 = vsel %vm421_vm7, %v422_v14, %v1364_v13  ;;  %v590_v23 = vadd.s32 %v589_v3, %v585_v35  ;;  %v641_v24 = vand.u32 8388607, %v634_v62 }
  0x96   : > { %v1060_v40 = vld [vmem:[#allocation2] sm:$0xff]  ;;  %v509_v20 = vmul.f32 %v508_v10, %v506_v15  ;;  %v420_v55 = vsel %vm418_vm10, %v1362_v34, %v419_v18  ;;  %v1870_v22 = vshrl.u32 %v646_v17, 5  ;;  %v741_v58 = vand.u32 2139095040, %v1876_v54 }
  0x97   : > { %1068 = vxpose.xlu0.b32.start [1/4] (short) %v1060_v40, 128  ;;  %v649_v30 = vsub.s32 32, %v648_v19  ;;  %v651_v52 = vshll.u32 %v1456_v57, %v648_v19  ;;  %v424_v16 = vsel %vm417_vm6, %v420_v55, %v423_v41  ;;  %v591_v25 = vadd.s32 536870912, %v590_v23 }
  0x98   : > { %v510_v38 = vxor.u32 2147483648, %v509_v20  ;;  %v654_v0 = vshll.u32 %v1457_v59, %v648_v19  ;;  %v425_v42 = vsel %vm414_vm4, nan, %v424_v16  ;;  %v657_v46 = vshll.u32 %v1458_v61, %v648_v19 }
  0x99   : > { %v652_v44 = vshrl.u32 %v1457_v59, %v649_v30  ;;  %v655_v45 = vshrl.u32 %v1458_v61, %v649_v30  ;;  %1051 = vst [vmem:[#allocation2 + $0x8] sm:$0xf8] %v425_v42  ;;  %v592_v47 = vshrl.u32 %v591_v25, 30  ;;  %v658_v48 = vshrl.u32 %v1459_v63, %v649_v30 }
  0x9a   : > { %v511_v26 = vsel %vm428_vm9, %v510_v38, %v509_v20  ;;  %v660_v39 = vshll.u32 %v1459_v63, %v648_v19  ;;  %v642_v50 = vor.u32 8388608, %v641_v24  ;;  %v661_v33 = vshrl.u32 %v1460_v1, %v649_v30 }
  0x9b   : > { %v514_v32 = vsel %vm1798_vm1, %v1565_v31, %v511_v26  ;;  %v593_v60 = vshll.u32 %v592_v47, 30  ;;  %v653_v2 = vor.u32 %v652_v44, %v651_v52  ;;  %v656_v4 = vor.u32 %v655_v45, %v654_v0 }
  0x9c   : > { %1365 = vcosq.f32 %v514_v32  ;;  %v662_v29 = vor.u32 %v661_v33, %v660_v39  ;;  %v663_v56 = vshll.u32 %v1460_v1, %v648_v19  ;;  %v664_v5 = vshrl.u32 %v1461_v8, %v649_v30 }
  0x9d   : > { %1367 = vsinq.f32 %v514_v32  ;;  %vm532_vm9 = vcmp.lt.s32.totalorder %v1653_v27, 0  ;;  %v1895_v6 = vsub.s32 %v590_v23, %v593_v60  ;;  %v650_v12 = vshrl.u32 %v1456_v57, %v649_v30 }
  0x9e   : > { %v659_v36 = vor.u32 %v658_v48, %v657_v46  ;;  %vm666_vm11 = vcmp.lt.s32.totalorder %v1870_v22, 1  ;;  %v665_v9 = vor.u32 %v664_v5, %v663_v56  ;;  %vm668_vm12 = vcmp.lt.s32.totalorder %v1870_v22, 3 }
  0x9f   : > { %vm669_vm13 = vcmp.lt.s32.totalorder %v1870_v22, 4  ;;  %v742_v28 = vshrl.u32 %v741_v58, 23  ;;  %vm521_vm14 = vcmp.lt.s32.totalorder %v1865_v43, 2  ;;  %v596_v49 = vsub.s32 0, %v1895_v6 }
  0xa0   : > { %vm667_vm0 = vcmp.lt.s32.totalorder %v1870_v22, 2  ;;  %v671_v51 = vsel %vm669_vm13, %v659_v36, 2102212464  ;;  %v738_v10 = vand.u32 2147483647, %v1876_v54  ;;  %v1061_v35 = vld [vmem:[#allocation2 + $0x8] sm:$0xff]  ;;  %vm518_vm1 = vweird.f32 %v1565_v31 }
  0xa1   : > { %v616_v34 = vsub.s32 4, %v592_v47  ;;  %v674_v11 = vsel %vm666_vm11, %v653_v2, %v656_v4  ;;  %v675_v13 = vsel %vm669_vm13, %v662_v29, 920167782  ;;  %v682_v14 = vshll.u32 %v642_v50, 8  ;;  %1100 = vxpose.xlu1.b32.start [1/4] (short) %v1061_v35, 128 }
  0xa2   : > { %v1256_v15 = vmin.u32 %v596_v49, %v1895_v6  ;;  %v670_v17 = vsel %vm666_vm11, %v650_v12, %v653_v2  ;;  %v672_v18 = vsel %vm668_vm12, %v656_v4, %v671_v51  ;;  %v676_v3 = vsel %vm668_vm12, %v659_v36, %v675_v13 }
  0xa3   : > { %v677_v19 = vsel %vm667_vm0, %v674_v11, %v676_v3  ;;  %v678_v40 = vsel %vm666_vm11, %v656_v4, %v659_v36  ;;  %v679_v41 = vsel %vm669_vm13, %v665_v9, 1326507024  ;;  %v1263_v20 = vadd.s32 4294967169, %v742_v28 }
  0xa4   : > { %vm522_vm2 = vcmp.eq.s32.totalorder %v1865_v43, 0  ;;  %vm525_vm3 = vcmp.eq.s32.totalorder %v1865_v43, 2  ;;  %v586_v23 = vadd.s32 %v1852_v21, %v1843_v53  ;;  %v598_v24 = vclz %v1256_v15 }
  0xa5   : > { %v673_v55 = vsel %vm667_vm0, %v670_v17, %v672_v18  ;;  %v680_v30 = vsel %vm668_vm12, %v662_v29, %v679_v41  ;;  %v1933_v52 = vmul.u32.u64.low %v682_v14, %v677_v19  ;;  %v1934_v16 = vmul.u32.u64.high %v682_v14, %v677_v19, %v1933_v52 }
  0xa6   : > { %v1366_v38 = vpop.eup %1365  ;;  %v1257_v25 = vadd.s32 4294967294, %v598_v24  ;;  %v681_v0 = vsel %vm667_vm0, %v678_v40, %v680_v30  ;;  %v1941_v42 = vand.u32 8388607, %v738_v10  ;;  %v748_v53 = vadd.s32 1, %v1263_v20 }
  0xa7   : > { %v1368_v21 = vpop.eup %1367  ;;  %v526_v44 = vxor.u32 2147483648, %v1366_v38  ;;  %v1945_v45 = vsel %vm532_vm9, %v616_v34, %v592_v47  ;;  %v1947_v46 = vmul.u32.u64.low %v682_v14, %v681_v0  ;;  %v1948_v26 = vmul.u32.u64.high %v682_v14, %v681_v0, %v1947_v46 }
  0xa8   : > { %v523_v48 = vxor.u32 2147483648, %v1368_v21  ;;  %vm1258_vm15 = vcmp.lt.s32.totalorder %v1257_v25, 0  ;;  %v689_v39 = vmul.u32 %v682_v14, %v673_v55  ;;  %vm749_vm4 = vcmp.gt.s32.totalorder %v748_v53, 0 }
  0xa9   : > { %v527_v22 = vsel %vm525_vm3, %v526_v44, %v1368_v21  ;;  %v601_v32 = vsel %vm1258_vm15, 0, %v1257_v25  ;;  %v692_v50 = vadd.s32 1, %v1934_v16  ;;  %v750_v33 = vsel %vm749_vm4, %v748_v53, 0 }
  0xaa   : > { %v524_v58 = vsel %vm522_vm2, %v1366_v38, %v523_v48  ;;  %v602_v60 = vsub.s32 32, %v601_v32  ;;  %v603_v47 = vshll.u32 %v1895_v6, %v601_v32  ;;  %v606_v2 = vsub.s32 4294967266, %v601_v32 }
  0xab   : > { %v528_v4 = vsel %vm521_vm14, %v524_v58, %v527_v22  ;;  %vm1960_vm5 = vcmp.le.f32.partialorder %v530_v37, 0.7853982  ;;  %vm691_vm6 = vc.u32 %v1948_v26, %v1933_v52  ;;  %v1966_v56 = vshrl.u32 %v750_v33, 5 }
  0xac   : > { %v529_v5 = vsel %vm518_vm1, nan, %v528_v4  ;;  %v604_v12 = vshrl.u32 %v586_v23, %v602_v60  ;;  %v607_v6 = vadd.s32 127, %v606_v2  ;;  %v693_v36 = vsel %vm691_vm6, %v692_v50, %v1934_v16 }
  0xad   : > { %1052 = vst [vmem:[#allocation2 + $0x10] sm:$0xff] %v529_v5  ;;  %1069 = vxpose.xlu0.b32.cont [2/4] (short) %v529_v5, 128  ;;  %v619_v37 = vsel %vm1960_vm5, 0, %v1945_v45  ;;  %v694_v43 = vadd.s32 %v693_v36, %v689_v39  ;;  %v752_v9 = vand.u32 31, %v750_v33  ;;  %v746_v51 = vor.u32 8388608, %v1941_v42 }
  0xae   : > { %v605_v28 = vor.u32 %v604_v12, %v603_v47  ;;  %v608_v49 = vshll.u32 %v607_v6, 23  ;;  %vm770_vm7 = vcmp.lt.s32.totalorder %v1966_v56, 1  ;;  %vm773_vm8 = vcmp.lt.s32.totalorder %v1966_v56, 4 }
  0xaf   : > { %v695_v31 = vadd.s32 536870912, %v694_v43  ;;  %v753_v35 = vsub.s32 32, %v752_v9  ;;  %v755_v34 = vshll.u32 %v1456_v57, %v752_v9  ;;  %v758_v11 = vshll.u32 %v1457_v59, %v752_v9 }
  0xb0   : > { %v609_v13 = vor.u32 4788187, %v608_v49  ;;  %v612_v14 = vcvt.s32.f32 %v605_v28  ;;  %v761_v15 = vshll.u32 %v1458_v61, %v752_v9  ;;  %v764_v17 = vshll.u32 %v1459_v63, %v752_v9 }
  0xb1   : > { %v696_v18 = vshrl.u32 %v695_v31, 30  ;;  %v756_v3 = vshrl.u32 %v1457_v59, %v753_v35  ;;  %v759_v19 = vshrl.u32 %v1458_v61, %v753_v35  ;;  %v762_v41 = vshrl.u32 %v1459_v63, %v753_v35 }
  0xb2   : > { %v610_v40 = vand.u32 2147483647, %v609_v13  ;;  %v765_v20 = vshrl.u32 %v1460_v1, %v753_v35  ;;  %v767_v23 = vshll.u32 %v1460_v1, %v752_v9  ;;  %v754_v55 = vshrl.u32 %v1456_v57, %v753_v35 }
  0xb3   : > { %v697_v24 = vshll.u32 %v696_v18, 30  ;;  %v757_v30 = vor.u32 %v756_v3, %v755_v34  ;;  %v760_v16 = vor.u32 %v759_v19, %v758_v11  ;;  %v763_v25 = vor.u32 %v762_v41, %v761_v15 }
  0xb4   : > { %v613_v38 = vmul.f32 %v612_v14, %v610_v40  ;;  %v766_v0 = vor.u32 %v765_v20, %v764_v17  ;;  %v768_v42 = vshrl.u32 %v1461_v8, %v753_v35  ;;  %vm771_vm10 = vcmp.lt.s32.totalorder %v1966_v56, 2 }
  0xb5   : > { %v1988_v53 = vsub.s32 %v694_v43, %v697_v24  ;;  %vm772_vm11 = vcmp.lt.s32.totalorder %v1966_v56, 3  ;;  %v786_v21 = vshll.u32 %v746_v51, 8  ;;  %v775_v46 = vsel %vm773_vm8, %v763_v25, 2102212464 }
  0xb6   : > { %v614_v44 = vxor.u32 2147483648, %v613_v38  ;;  %v769_v45 = vor.u32 %v768_v42, %v767_v23  ;;  %v778_v48 = vsel %vm770_vm7, %v757_v30, %v760_v16  ;;  %v623_v39 = vadd.s32 3, %v619_v37  ;;  %v2021_v37 = vld [vmem:[#allocation2 + $0x30] sm:$0x7] }
  0xb7   : > { %v700_v22 = vsub.s32 0, %v1988_v53  ;;  %v779_v32 = vsel %vm773_vm8, %v766_v0, 920167782  ;;  %v774_v33 = vsel %vm770_vm7, %v754_v55, %v757_v30  ;;  %v776_v58 = vsel %vm772_vm11, %v760_v16, %v775_v46 }
  0xb8   : > { %v615_v50 = vsel %vm532_vm9, %v614_v44, %v613_v38  ;;  %v780_v60 = vsel %vm772_vm11, %v763_v25, %v779_v32  ;;  %v782_v5 = vsel %vm770_vm7, %v760_v16, %v763_v25  ;;  %v783_v12 = vsel %vm773_vm8, %v769_v45, 1326507024 }
  0xb9   : > { %v618_v47 = vsel %vm1960_vm5, %v1653_v27, %v615_v50  ;;  %v1260_v2 = vmin.u32 %v700_v22, %v1988_v53  ;;  %v781_v4 = vsel %vm771_vm10, %v778_v48, %v780_v60  ;;  %vm636_vm9 = vcmp.lt.s32.totalorder %v1790_v7, 0  ;;  %v2055_v48 = vld [vmem:[#allocation2 + $0x38] sm:$0x7] }
  0xba   : > { %1369 = vcosq.f32 %v618_v47  ;;  %v2017_v6 = vmul.u32.u64.low %v786_v21, %v781_v4  ;;  %v2018_v36 = vmul.u32.u64.high %v786_v21, %v781_v4, %v2017_v6  ;;  %v720_v43 = vsub.s32 4, %v696_v18 }
  0xbb   : > { %1371 = vsinq.f32 %v618_v47  ;;  %v702_v29 = vclz %v1260_v2  ;;  %v784_v9 = vsel %vm772_vm11, %v766_v0, %v783_v12  ;;  %v777_v49 = vsel %vm771_vm10, %v774_v33, %v776_v58 }
  0xbc   : > { %v785_v51 = vsel %vm771_vm10, %v782_v5, %v784_v9  ;;  %v845_v31 = vand.u32 2139095040, %v2021_v37  ;;  %v624_v35 = vand.u32 3, %v623_v39  ;;  %v690_v34 = vadd.s32 %v1933_v52, %v1948_v26 }
  0xbd   : > { %v1261_v28 = vadd.s32 4294967294, %v702_v29  ;;  %v2033_v11 = vmul.u32.u64.low %v786_v21, %v785_v51  ;;  %v2034_v13 = vmul.u32.u64.high %v786_v21, %v785_v51, %v2033_v11  ;;  %v796_v14 = vadd.s32 1, %v2018_v36 }
  0xbe   : > { %v846_v15 = vshrl.u32 %v845_v31, 23  ;;  %v721_v3 = vsel %vm636_vm9, %v720_v43, %v696_v18  ;;  %v793_v19 = vmul.u32 %v786_v21, %v777_v49  ;;  %v842_v56 = vand.u32 2147483647, %v2021_v37 }
  0xbf   : > { %vm1262_vm12 = vcmp.lt.s32.totalorder %v1261_v28, 0  ;;  %v1462_v40 = vmov 0.0   ;;  %vm622_vm13 = vweird.f32 %v1653_v27  ;;  %vm626_vm14 = vcmp.eq.s32.totalorder %v624_v35, 0 }
  0xc0   : > { %v705_v17 = vsel %vm1262_vm12, 0, %v1261_v28  ;;  %1058 = vst [vmem:[#allocation2 + $0x30] sm:$0xf8] %v1462_v40  ;;  %1059 = vst [vmem:[#allocation2 + $0x38] sm:$0xf8] %v1462_v40  ;;  %v1267_v20 = vadd.s32 4294967169, %v846_v15  ;;  %vm795_vm1 = vc.u32 %v2034_v13, %v2017_v6  ;;  %vm726_vm8 = vweird.f32 %v1790_v7 }
  0xc1   : > { %v706_v41 = vsub.s32 32, %v705_v17  ;;  %v707_v52 = vshll.u32 %v1988_v53, %v705_v17  ;;  %v710_v26 = vsub.s32 4294967266, %v705_v17  ;;  %vm2044_vm0 = vcmp.le.f32.partialorder %v634_v62, 0.7853982 }
  0xc2   : > { %v797_v55 = vsel %vm795_vm1, %v796_v14, %v2018_v36  ;;  %v852_v30 = vadd.s32 1, %v1267_v20  ;;  %vm629_vm2 = vcmp.eq.s32.totalorder %v624_v35, 2  ;;  %v723_v38 = vsel %vm2044_vm0, 0, %v721_v3 }
  0xc3   : > { %v708_v18 = vshrl.u32 %v690_v34, %v706_v41  ;;  %v711_v24 = vadd.s32 127, %v710_v26  ;;  %v798_v25 = vadd.s32 %v797_v55, %v793_v19  ;;  %v849_v62 = vand.u32 8388607, %v842_v56 }
  0xc4   : > { %v1370_v16 = vpop.eup %1369  ;;  %vm853_vm3 = vcmp.gt.s32.totalorder %v852_v30, 0  ;;  %vm625_vm15 = vcmp.lt.s32.totalorder %v624_v35, 2  ;;  %v727_v50 = vadd.s32 3, %v723_v38  ;;  %v949_v5 = vand.u32 2139095040, %v2055_v48 }
  0xc5   : > { %v1372_v0 = vpop.eup %1371  ;;  %v630_v42 = vxor.u32 2147483648, %v1370_v16  ;;  %v709_v53 = vor.u32 %v708_v18, %v707_v52  ;;  %v712_v21 = vshll.u32 %v711_v24, 23  ;;  %v799_v45 = vadd.s32 536870912, %v798_v25 }
  0xc6   : > { %v627_v44 = vxor.u32 2147483648, %v1372_v0  ;;  %v854_v46 = vsel %vm853_vm3, %v852_v30, 0  ;;  %v850_v60 = vor.u32 8388608, %v849_v62  ;;  %v2064_v28 = vand.u32 3, %v727_v50 }
  0xc7   : > { %v631_v39 = vsel %vm629_vm2, %v630_v42, %v1372_v0  ;;  %v713_v22 = vor.u32 4788187, %v712_v21  ;;  %v716_v32 = vcvt.s32.f32 %v709_v53  ;;  %v2058_v58 = vshrl.u32 %v799_v45, 30 }
  0xc8   : > { %v628_v33 = vsel %vm626_vm14, %v1370_v16, %v627_v44  ;;  %v856_v47 = vand.u32 31, %v854_v46  ;;  %v855_v29 = vshrl.u32 %v854_v46, 5  ;;  %v946_v51 = vand.u32 2147483647, %v2055_v48 }
  0xc9   : > { %v632_v2 = vsel %vm625_vm15, %v628_v33, %v631_v39  ;;  %v714_v4 = vand.u32 2147483647, %v713_v22  ;;  %v801_v36 = vshll.u32 %v2058_v58, 30  ;;  %v2072_v34 = vshll.u32 %v850_v60, 8 }
  0xca   : > { %v633_v12 = vsel %vm622_vm13, nan, %v632_v2  ;;  %v857_v43 = vsub.s32 32, %v856_v47  ;;  %v859_v49 = vshll.u32 %v1456_v57, %v856_v47  ;;  %v862_v27 = vshll.u32 %v1457_v59, %v856_v47 }
  0xcb   : > { %1053 = vst [vmem:[#allocation2 + $0x18] sm:$0xff] %v633_v12  ;;  %1101 = vxpose.xlu1.b32.cont [2/4] (short) %v633_v12, 128  ;;  %v717_v9 = vmul.f32 %v716_v32, %v714_v4  ;;  %v2068_v31 = vsub.s32 %v798_v25, %v801_v36  ;;  %v865_v15 = vshll.u32 %v1458_v61, %v856_v47  ;;  %vm874_vm4 = vcmp.lt.s32.totalorder %v855_v29, 1 }
  0xcc   : > { %v860_v35 = vshrl.u32 %v1457_v59, %v857_v43  ;;  %v863_v14 = vshrl.u32 %v1458_v61, %v857_v43  ;;  %v866_v17 = vshrl.u32 %v1459_v63, %v857_v43  ;;  %v868_v19 = vshll.u32 %v1459_v63, %v856_v47 }
  0xcd   : > { %v718_v11 = vxor.u32 2147483648, %v717_v9  ;;  %v804_v3 = vsub.s32 0, %v2068_v31  ;;  %v950_v40 = vshrl.u32 %v949_v5, 23  ;;  %v858_v52 = vshrl.u32 %v1456_v57, %v857_v43 }
  0xce   : > { %v861_v26 = vor.u32 %v860_v35, %v859_v49  ;;  %v869_v20 = vshrl.u32 %v1460_v1, %v857_v43  ;;  %v864_v55 = vor.u32 %v863_v14, %v862_v27  ;;  %v871_v30 = vshll.u32 %v1460_v1, %v856_v47 }
  0xcf   : > { %v719_v41 = vsel %vm636_vm9, %v718_v11, %v717_v9  ;;  %v1264_v24 = vmin.u32 %v804_v3, %v2068_v31  ;;  %v867_v16 = vor.u32 %v866_v17, %v865_v15  ;;  %v872_v25 = vshrl.u32 %v1461_v8, %v857_v43 }
  0xd0   : > { %v722_v18 = vsel %vm2044_vm0, %v1790_v7, %v719_v41  ;;  %v870_v38 = vor.u32 %v869_v20, %v868_v19  ;;  %vm876_vm5 = vcmp.lt.s32.totalorder %v855_v29, 3  ;;  %v1271_v0 = vadd.s32 4294967169, %v950_v40 }
  0xd1   : > { %1373 = vcosq.f32 %v722_v18  ;;  %v806_v62 = vclz %v1264_v24  ;;  %v873_v42 = vor.u32 %v872_v25, %v871_v30  ;;  %vm875_vm6 = vcmp.lt.s32.totalorder %v855_v29, 2 }
  0xd2   : > { %1375 = vsinq.f32 %v722_v18  ;;  %vm877_vm7 = vcmp.lt.s32.totalorder %v855_v29, 4  ;;  %v878_v23 = vsel %vm874_vm4, %v858_v52, %v861_v26  ;;  %v882_v44 = vsel %vm874_vm4, %v861_v26, %v864_v55 }
  0xd3   : > { %v1265_v53 = vadd.s32 4294967294, %v806_v62  ;;  %v879_v21 = vsel %vm877_vm7, %v867_v16, 2102212464  ;;  %v883_v45 = vsel %vm877_vm7, %v870_v38, 920167782  ;;  %v886_v22 = vsel %vm874_vm4, %v864_v55, %v867_v16 }
  0xd4   : > { %v880_v46 = vsel %vm876_vm5, %v864_v55, %v879_v21  ;;  %v884_v39 = vsel %vm876_vm5, %v867_v16, %v883_v45  ;;  %v887_v32 = vsel %vm877_vm7, %v873_v42, 1326507024  ;;  %vm740_vm10 = vcmp.lt.s32.totalorder %v1876_v54, 0 }
  0xd5   : > { %v794_v50 = vadd.s32 %v2017_v6, %v2034_v13  ;;  %vm1266_vm11 = vcmp.lt.s32.totalorder %v1265_v53, 0  ;;  %v885_v33 = vsel %vm875_vm6, %v882_v44, %v884_v39  ;;  %v888_v60 = vsel %vm876_vm5, %v870_v38, %v887_v32 }
  0xd6   : > { %v809_v47 = vsel %vm1266_vm11, 0, %v1265_v53  ;;  %v889_v2 = vsel %vm875_vm6, %v886_v22, %v888_v60  ;;  %v2102_v4 = vmul.u32.u64.low %v2072_v34, %v885_v33  ;;  %v2103_v5 = vmul.u32.u64.high %v2072_v34, %v885_v33, %v2102_v4 }
  0xd7   : > { %v810_v12 = vsub.s32 32, %v809_v47  ;;  %v811_v36 = vshll.u32 %v2068_v31, %v809_v47  ;;  %v814_v43 = vsub.s32 4294967266, %v809_v47  ;;  %v881_v9 = vsel %vm875_vm6, %v878_v23, %v880_v46 }
  0xd8   : > { %vm730_vm9 = vcmp.eq.s32.totalorder %v2064_v28, 0  ;;  %v2110_v6 = vmul.u32.u64.low %v2072_v34, %v889_v2  ;;  %v2111_v13 = vmul.u32.u64.high %v2072_v34, %v889_v2, %v2110_v6  ;;  %v956_v49 = vadd.s32 1, %v1271_v0 }
  0xd9   : > { %vm733_vm12 = vcmp.eq.s32.totalorder %v2064_v28, 2  ;;  %v812_v35 = vshrl.u32 %v794_v50, %v810_v12  ;;  %v815_v27 = vadd.s32 127, %v814_v43  ;;  %v2116_v11 = vand.u32 8388607, %v946_v51 }
  0xda   : > { %v824_v31 = vsub.s32 4, %v2058_v58  ;;  %v897_v29 = vmul.u32 %v2072_v34, %v881_v9  ;;  %v900_v15 = vadd.s32 1, %v2103_v5  ;;  %vm957_vm13 = vcmp.gt.s32.totalorder %v956_v49, 0 }
  0xdb   : > { %v1374_v14 = vpop.eup %1373  ;;  %v813_v19 = vor.u32 %v812_v35, %v811_v36  ;;  %v816_v40 = vshll.u32 %v815_v27, 23  ;;  %v958_v41 = vsel %vm957_vm13, %v956_v49, 0  ;;  %vm729_vm14 = vcmp.lt.s32.totalorder %v2064_v28, 2 }
  0xdc   : > { %v1376_v17 = vpop.eup %1375  ;;  %v734_v3 = vxor.u32 2147483648, %v1374_v14  ;;  %vm2124_vm0 = vcmp.le.f32.partialorder %v738_v10, 0.7853982  ;;  %vm899_vm1 = vc.u32 %v2111_v13, %v2102_v4  ;;  %v825_v10 = vsel %vm740_vm10, %v824_v31, %v2058_v58 }
  0xdd   : > { %v731_v52 = vxor.u32 2147483648, %v1376_v17  ;;  %v817_v20 = vor.u32 4788187, %v816_v40  ;;  %v820_v18 = vcvt.s32.f32 %v813_v19  ;;  %v901_v24 = vsel %vm899_vm1, %v900_v15, %v2103_v5 }
  0xde   : > { %v735_v34 = vsel %vm733_vm12, %v734_v3, %v1376_v17  ;;  %v902_v30 = vadd.s32 %v901_v24, %v897_v29  ;;  %v960_v16 = vand.u32 31, %v958_v41  ;;  %v954_v62 = vor.u32 8388608, %v2116_v11 }
  0xdf   : > { %v732_v55 = vsel %vm730_vm9, %v1374_v14, %v731_v52  ;;  %v818_v25 = vand.u32 2147483647, %v817_v20  ;;  %v959_v0 = vshrl.u32 %v958_v41, 5  ;;  %v827_v58 = vsel %vm2124_vm0, 0, %v825_v10 }
  0xe0   : > { %v736_v38 = vsel %vm729_vm14, %v732_v55, %v735_v34  ;;  %v903_v23 = vadd.s32 536870912, %v902_v30  ;;  %v961_v53 = vsub.s32 32, %v960_v16  ;;  %v963_v21 = vshll.u32 %v1456_v57, %v960_v16 }
  0xe1   : > { %v737_v42 = vsel %vm726_vm8, nan, %v736_v38  ;;  %v821_v28 = vmul.f32 %v820_v18, %v818_v25  ;;  %v966_v44 = vshll.u32 %v1457_v59, %v960_v16  ;;  %v972_v45 = vshll.u32 %v1459_v63, %v960_v16 }
  0xe2   : > { %1054 = vst [vmem:[#allocation2 + $0x20] sm:$0xff] %v737_v42  ;;  %1070 = vxpose.xlu0.b32.cont [3/4] (short) %v737_v42, 128  ;;  %v2146_v46 = vshrl.u32 %v903_v23, 30  ;;  %v964_v39 = vshrl.u32 %v1457_v59, %v961_v53  ;;  %v967_v7 = vshrl.u32 %v1458_v61, %v961_v53  ;;  %v969_v22 = vshll.u32 %v1458_v61, %v960_v16 }
  0xe3   : > { %v822_v32 = vxor.u32 2147483648, %v821_v28  ;;  %v970_v50 = vshrl.u32 %v1459_v63, %v961_v53  ;;  %v973_v33 = vshrl.u32 %v1460_v1, %v961_v53  ;;  %v975_v60 = vshll.u32 %v1460_v1, %v960_v16 }
  0xe4   : > { %v905_v47 = vshll.u32 %v2146_v46, 30  ;;  %v962_v2 = vshrl.u32 %v1456_v57, %v961_v53  ;;  %v965_v5 = vor.u32 %v964_v39, %v963_v21  ;;  %vm978_vm2 = vcmp.lt.s32.totalorder %v959_v0, 1 }
  0xe5   : > { %v823_v59 = vsel %vm740_vm10, %v822_v32, %v821_v28  ;;  %v968_v12 = vor.u32 %v967_v7, %v966_v44  ;;  %v974_v36 = vor.u32 %v973_v33, %v972_v45  ;;  %v976_v61 = vshrl.u32 %v1461_v8, %v961_v53 }
  0xe6   : > { %v826_v63 = vsel %vm2124_vm0, %v1876_v54, %v823_v59  ;;  %v906_v43 = vsub.s32 %v902_v30, %v905_v47  ;;  %v971_v9 = vor.u32 %v970_v50, %v969_v22  ;;  %vm981_vm3 = vcmp.lt.s32.totalorder %v959_v0, 4 }
  0xe7   : > { %1377 = vcosq.f32 %v826_v63  ;;  %v831_v1 = vadd.s32 3, %v827_v58  ;;  %v977_v6 = vor.u32 %v976_v61, %v975_v60  ;;  %vm980_vm15 = vcmp.lt.s32.totalorder %v959_v0, 3 }
  0xe8   : > { %1379 = vsinq.f32 %v826_v63  ;;  %v908_v57 = vsub.s32 0, %v906_v43  ;;  %vm979_vm4 = vcmp.lt.s32.totalorder %v959_v0, 2  ;;  %v983_v49 = vsel %vm981_vm3, %v971_v9, 2102212464 }
  0xe9   : > { %v986_v35 = vsel %vm978_vm2, %v965_v5, %v968_v12  ;;  %v987_v8 = vsel %vm981_vm3, %v974_v36, 920167782  ;;  %v994_v27 = vshll.u32 %v954_v62, 8  ;;  %v982_v14 = vsel %vm978_vm2, %v962_v2, %v965_v5 }
  0xea   : > { %v1268_v11 = vmin.u32 %v908_v57, %v906_v43  ;;  %v988_v31 = vsel %vm980_vm15, %v971_v9, %v987_v8  ;;  %v984_v29 = vsel %vm980_vm15, %v968_v12, %v983_v49  ;;  %v990_v17 = vsel %vm978_vm2, %v968_v12, %v971_v9 }
  0xeb   : > { %v989_v15 = vsel %vm979_vm4, %v986_v35, %v988_v31  ;;  %v991_v3 = vsel %vm981_vm3, %v977_v6, 1326507024  ;;  %v832_v19 = vand.u32 3, %v831_v1  ;;  %v985_v20 = vsel %vm979_vm4, %v982_v14, %v984_v29 }
  0xec   : > { %v910_v40 = vclz %v1268_v11  ;;  %v992_v41 = vsel %vm980_vm15, %v974_v36, %v991_v3  ;;  %v2172_v52 = vmul.u32.u64.low %v994_v27, %v989_v15  ;;  %v2173_v26 = vmul.u32.u64.high %v994_v27, %v989_v15, %v2172_v52 }
  0xed   : > { %v993_v18 = vsel %vm979_vm4, %v990_v17, %v992_v41  ;;  %vm834_vm5 = vcmp.eq.s32.totalorder %v832_v19, 0  ;;  %v898_v10 = vadd.s32 %v2102_v4, %v2111_v13  ;;  %vm837_vm7 = vcmp.eq.s32.totalorder %v832_v19, 2 }
  0xee   : > { %v1269_v34 = vadd.s32 4294967294, %v910_v40  ;;  %v2177_v24 = vmul.u32.u64.low %v994_v27, %v993_v18  ;;  %v2178_v55 = vmul.u32.u64.high %v994_v27, %v993_v18, %v2177_v24  ;;  %v1001_v38 = vmul.u32 %v994_v27, %v985_v20 }
  0xef   : > { %v1004_v25 = vadd.s32 1, %v2173_v26  ;;  %vm830_vm8 = vweird.f32 %v1876_v54  ;;  %vm833_vm10 = vcmp.lt.s32.totalorder %v832_v19, 2  ;;  %v928_v2 = vsub.s32 4, %v2146_v46 }
  0xf0   : > { %vm1270_vm6 = vcmp.lt.s32.totalorder %v1269_v34, 0  ;;  %vm1003_vm11 = vc.u32 %v2178_v55, %v2172_v52  ;;  %vm844_vm9 = vcmp.lt.s32.totalorder %v2021_v37, 0  ;;  %vm843_vm12 = vcmp.le.f32.partialorder %v842_v56, 0.7853982 }
  0xf1   : > { %v1378_v30 = vpop.eup %1377  ;;  %v913_v16 = vsel %vm1270_vm6, 0, %v1269_v34  ;;  %v1005_v58 = vsel %vm1003_vm11, %v1004_v25, %v2173_v26  ;;  %v929_v61 = vsel %vm844_vm9, %v928_v2, %v2146_v46  ;;  %v1002_v8 = vadd.s32 %v2172_v52, %v2178_v55 }
  0xf2   : > { %v1380_v62 = vpop.eup %1379  ;;  %v838_v42 = vxor.u32 2147483648, %v1378_v30  ;;  %v914_v23 = vsub.s32 32, %v913_v16  ;;  %v915_v53 = vshll.u32 %v906_v43, %v913_v16  ;;  %v918_v0 = vsub.s32 4294967266, %v913_v16 }
  0xf3   : > { %v835_v21 = vxor.u32 2147483648, %v1380_v62  ;;  %v1006_v45 = vadd.s32 %v1005_v58, %v1001_v38  ;;  %v931_v1 = vsel %vm843_vm12, 0, %v929_v61  ;;  %vm934_vm2 = vweird.f32 %v2021_v37 }
  0xf4   : > { %v839_v28 = vsel %vm837_vm7, %v838_v42, %v1380_v62  ;;  %v916_v4 = vshrl.u32 %v898_v10, %v914_v23  ;;  %v919_v13 = vadd.s32 127, %v918_v0  ;;  %v935_v49 = vadd.s32 3, %v931_v1 }
  0xf5   : > { %v836_v44 = vsel %vm834_vm5, %v1378_v30, %v835_v21  ;;  %v1007_v50 = vadd.s32 536870912, %v1006_v45  ;;  %vm948_vm3 = vcmp.lt.s32.totalorder %v2055_v48, 0  ;;  %vm947_vm15 = vcmp.le.f32.partialorder %v946_v51, 0.7853982 }
  0xf6   : > { %v840_v39 = vsel %vm833_vm10, %v836_v44, %v839_v28  ;;  %v917_v7 = vor.u32 %v916_v4, %v915_v53  ;;  %v920_v22 = vshll.u32 %v919_v13, 23  ;;  %v936_v27 = vand.u32 3, %v935_v49 }
  0xf7   : > { %v841_v32 = vsel %vm830_vm8, nan, %v840_v39  ;;  %v1008_v60 = vshrl.u32 %v1007_v50, 30  ;;  %vm1038_vm7 = vweird.f32 %v2055_v48  ;;  %vm1132_vm8 = vcmask 220160  }
  0xf8   : > { %1055 = vst [vmem:[#allocation2 + $0x28] sm:$0xff] %v841_v32  ;;  %1102 = vxpose.xlu1.b32.cont [3/4] (short) %v841_v32, 128  ;;  %v921_v54 = vor.u32 4788187, %v920_v22  ;;  %v924_v33 = vcvt.s32.f32 %v917_v7  ;;  %vm941_vm14 = vcmp.eq.s32.totalorder %v936_v27, 2  ;;  %vm938_vm0 = vcmp.eq.s32.totalorder %v936_v27, 0 }
  0xf9   : > { %v1009_v5 = vshll.u32 %v1008_v60, 30  ;;  %vm937_vm1 = vcmp.lt.s32.totalorder %v936_v27, 2  ;;  %v1032_v55 = vsub.s32 4, %v1008_v60 }
  0xfa   : > { %v922_v47 = vand.u32 2147483647, %v921_v54 }
  0xfb   : > { %v1010_v12 = vsub.s32 %v1006_v45, %v1009_v5  ;;  %v1033_v38 = vsel %vm948_vm3, %v1032_v55, %v1008_v60 }
  0xfc   : > { %v925_v59 = vmul.f32 %v924_v33, %v922_v47  ;;  %v1035_v62 = vsel %vm947_vm15, 0, %v1033_v38 }
  0xfd   : > { %v1012_v63 = vsub.s32 0, %v1010_v12  ;;  %v1039_v23 = vadd.s32 3, %v1035_v62 }
  0xfe   : > { %v926_v36 = vxor.u32 2147483648, %v925_v59 }
  0xff   : > { %v1272_v6 = vmin.u32 %v1012_v63, %v1010_v12  ;;  %v1040_v53 = vand.u32 3, %v1039_v23 }
 0x100   : > { %v927_v43 = vsel %vm844_vm9, %v926_v36, %v925_v59 }
 0x101   : > { %v930_v9 = vsel %vm843_vm12, %v2021_v37, %v927_v43  ;;  %v1014_v57 = vclz %v1272_v6  ;;  %vm1045_vm4 = vcmp.eq.s32.totalorder %v1040_v53, 2  ;;  %vm1042_vm5 = vcmp.eq.s32.totalorder %v1040_v53, 0 }
 0x102   : > { %1381 = vcosq.f32 %v930_v9  ;;  %vm1041_vm6 = vcmp.lt.s32.totalorder %v1040_v53, 2 }
 0x103   : > { %1383 = vsinq.f32 %v930_v9  ;;  %v1273_v35 = vadd.s32 4294967294, %v1014_v57 }
 0x105   : > { %vm1274_vm13 = vcmp.lt.s32.totalorder %v1273_v35, 0 }
 0x106   : > { %v1017_v11 = vsel %vm1274_vm13, 0, %v1273_v35 }
 0x107   : > { %v1018_v56 = vsub.s32 32, %v1017_v11  ;;  %v1019_v14 = vshll.u32 %v1010_v12, %v1017_v11  ;;  %v1022_v31 = vsub.s32 4294967266, %v1017_v11 }
 0x109   : > { %v1020_v46 = vshrl.u32 %v1002_v8, %v1018_v56  ;;  %v1023_v29 = vadd.s32 127, %v1022_v31 }
 0x10b   : > { %v1021_v19 = vor.u32 %v1020_v46, %v1019_v14  ;;  %v1024_v40 = vshll.u32 %v1023_v29, 23 }
 0x10c   : > { %v1382_v15 = vpop.eup %1381 }
 0x10d   : > { %v1384_v17 = vpop.eup %1383  ;;  %v942_v3 = vxor.u32 2147483648, %v1382_v15  ;;  %v1025_v26 = vor.u32 4788187, %v1024_v40  ;;  %v1028_v34 = vcvt.s32.f32 %v1021_v19 }
 0x10e   : > { %v939_v41 = vxor.u32 2147483648, %v1384_v17 }
 0x10f   : > { %v943_v52 = vsel %vm941_vm14, %v942_v3, %v1384_v17  ;;  %v1026_v24 = vand.u32 2147483647, %v1025_v26 }
 0x110   : > { %v940_v20 = vsel %vm938_vm0, %v1382_v15, %v939_v41 }
 0x111   : > { %v944_v18 = vsel %vm937_vm1, %v940_v20, %v943_v52  ;;  %v1029_v30 = vmul.f32 %v1028_v34, %v1026_v24 }
 0x112   : > { %v945_v10 = vsel %vm934_vm2, nan, %v944_v18 }
 0x113   : > { %1056 = vst [vmem:[#allocation2 + $0x30] sm:$0x7] %v945_v10  ;;  %v1030_v16 = vxor.u32 2147483648, %v1029_v30 }
 0x115   : > { %v1031_v25 = vsel %vm948_vm3, %v1030_v16, %v1029_v30 }
 0x116   : > { %v1034_v37 = vsel %vm947_vm15, %v2055_v48, %v1031_v25 }
 0x117   : > { %1385 = vcosq.f32 %v1034_v37 }
 0x118   : > { %1387 = vsinq.f32 %v1034_v37 }
 0x11a   : > { %v1066_v42 = vld [vmem:[#allocation2 + $0x30] sm:$0xff] }
 0x11b   : > { %1071 = vxpose.xlu0.b32.end [4/4] (short) %v1066_v42, 128 }
 0x121   : > { %v1386_v0 = vpop.eup %1385 }
 0x122   : > { %v1388_v21 = vpop.eup %1387  ;;  %v1046_v28 = vxor.u32 2147483648, %v1386_v0 }
 0x123   : > { %v1043_v51 = vxor.u32 2147483648, %v1388_v21 }
 0x124   : > { %v1047_v4 = vsel %vm1045_vm4, %v1046_v28, %v1388_v21 }
 0x125   : > { %v1044_v13 = vsel %vm1042_vm5, %v1386_v0, %v1043_v51 }
 0x126   : > { %v1048_v58 = vsel %vm1041_vm6, %v1044_v13, %v1047_v4 }
 0x127   : > { %v1049_v44 = vsel %vm1038_vm7, nan, %v1048_v58 }
 0x128   : > { %1057 = vst [vmem:[#allocation2 + $0x38] sm:$0x7] %v1049_v44 }
 0x12f   : > { %v1067_v45 = vld [vmem:[#allocation2 + $0x38] sm:$0xff] }
 0x130   : > { %1103 = vxpose.xlu1.b32.end [4/4] (short) %v1067_v45, 128 }
 0x18f   : > { %v1084_v48 = vpop.trf.xlu0 }
 0x190   : > { %1133 = vst.msk [vmem:[%s2205_s21] sm:$0xff] %vm1132_vm8, %v1084_v48 }
 0x193   : > { %v1085_v39 = vpop.trf.xlu0 }
 0x194   : > { %1134 = vst.msk [vmem:[%s2205_s21 + $0x8] sm:$0xff] %vm1132_vm8, %v1085_v39 }
 0x197   : > { %v1086_v7 = vpop.trf.xlu0 }
 0x198   : > { %1135 = vst.msk [vmem:[%s2205_s21 + $0x10] sm:$0xff] %vm1132_vm8, %v1086_v7 }
 0x19b   : > { %v1087_v22 = vpop.trf.xlu0 }
 0x19c   : > { %1136 = vst.msk [vmem:[%s2205_s21 + $0x18] sm:$0xff] %vm1132_vm8, %v1087_v22 }
 0x19f   : > { %v1088_v32 = vpop.trf.xlu0 }
 0x1a0   : > { %1137 = vst.msk [vmem:[%s2205_s21 + $0x20] sm:$0xff] %vm1132_vm8, %v1088_v32 }
 0x1a3   : > { %v1089_v50 = vpop.trf.xlu0 }
 0x1a4   : > { %1138 = vst.msk [vmem:[%s2205_s21 + $0x28] sm:$0xff] %vm1132_vm8, %v1089_v50  ;;  %v1116_v54 = vpop.trf.xlu1 }
 0x1a5   : > { %1149 = vst.msk [vmem:[%s2205_s21 + $0x80] sm:$0xff] %vm1132_vm8, %v1116_v54 }
 0x1a7   : > { %v1090_v33 = vpop.trf.xlu0 }
 0x1a8   : > { %1139 = vst.msk [vmem:[%s2205_s21 + $0x30] sm:$0xff] %vm1132_vm8, %v1090_v33  ;;  %v1117_v60 = vpop.trf.xlu1 }
 0x1a9   : > { %1150 = vst.msk [vmem:[%s2205_s21 + $0x88] sm:$0xff] %vm1132_vm8, %v1117_v60 }
 0x1ab   : > { %v1091_v47 = vpop.trf.xlu0 }
 0x1ac   : > { %1140 = vst.msk [vmem:[%s2205_s21 + $0x38] sm:$0xff] %vm1132_vm8, %v1091_v47  ;;  %v1118_v2 = vpop.trf.xlu1 }
 0x1ad   : > { %1151 = vst.msk [vmem:[%s2205_s21 + $0x90] sm:$0xff] %vm1132_vm8, %v1118_v2 }
 0x1af   : > { %v1092_v5 = vpop.trf.xlu0 }
 0x1b0   : > { %1141 = vst.msk [vmem:[%s2205_s21 + $0x40] sm:$0xff] %vm1132_vm8, %v1092_v5  ;;  %v1119_v59 = vpop.trf.xlu1 }
 0x1b1   : > { %1152 = vst.msk [vmem:[%s2205_s21 + $0x98] sm:$0xff] %vm1132_vm8, %v1119_v59 }
 0x1b3   : > { %v1093_v12 = vpop.trf.xlu0 }
 0x1b4   : > { %1142 = vst.msk [vmem:[%s2205_s21 + $0x48] sm:$0xff] %vm1132_vm8, %v1093_v12  ;;  %v1120_v36 = vpop.trf.xlu1 }
 0x1b5   : > { %1153 = vst.msk [vmem:[%s2205_s21 + $0xa0] sm:$0xff] %vm1132_vm8, %v1120_v36 }
 0x1b7   : > { %v1094_v61 = vpop.trf.xlu0 }
 0x1b8   : > { %1143 = vst.msk [vmem:[%s2205_s21 + $0x50] sm:$0xff] %vm1132_vm8, %v1094_v61  ;;  %v1121_v63 = vpop.trf.xlu1 }
 0x1b9   : > { %1154 = vst.msk [vmem:[%s2205_s21 + $0xa8] sm:$0xff] %vm1132_vm8, %v1121_v63 }
 0x1bb   : > { %v1095_v43 = vpop.trf.xlu0 }
 0x1bc   : > { %1144 = vst.msk [vmem:[%s2205_s21 + $0x58] sm:$0xff] %vm1132_vm8, %v1095_v43  ;;  %v1122_v9 = vpop.trf.xlu1 }
 0x1bd   : > { %1155 = vst.msk [vmem:[%s2205_s21 + $0xb0] sm:$0xff] %vm1132_vm8, %v1122_v9 }
 0x1bf   : > { %v1096_v1 = vpop.trf.xlu0 }
 0x1c0   : > { %1145 = vst.msk [vmem:[%s2205_s21 + $0x60] sm:$0xff] %vm1132_vm8, %v1096_v1  ;;  %v1123_v6 = vpop.trf.xlu1 }
 0x1c1   : > { %1156 = vst.msk [vmem:[%s2205_s21 + $0xb8] sm:$0xff] %vm1132_vm8, %v1123_v6 }
 0x1c3   : > { %v1097_v57 = vpop.trf.xlu0 }
 0x1c4   : > { %1146 = vst.msk [vmem:[%s2205_s21 + $0x68] sm:$0xff] %vm1132_vm8, %v1097_v57  ;;  %v1124_v49 = vpop.trf.xlu1 }
 0x1c5   : > { %1157 = vst.msk [vmem:[%s2205_s21 + $0xc0] sm:$0xff] %vm1132_vm8, %v1124_v49 }
 0x1c7   : > { %v1098_v35 = vpop.trf.xlu0 }
 0x1c8   : > { %1147 = vst.msk [vmem:[%s2205_s21 + $0x70] sm:$0xff] %vm1132_vm8, %v1098_v35  ;;  %v1125_v8 = vpop.trf.xlu1 }
 0x1c9   : > { %1158 = vst.msk [vmem:[%s2205_s21 + $0xc8] sm:$0xff] %vm1132_vm8, %v1125_v8 }
 0x1cb   : > { %v1099_v27 = vpop.trf.xlu0 }
 0x1cc   : > { %1148 = vst.msk [vmem:[%s2205_s21 + $0x78] sm:$0xff] %vm1132_vm8, %v1099_v27  ;;  %v1126_v11 = vpop.trf.xlu1 }
 0x1cd   : > { %1159 = vst.msk [vmem:[%s2205_s21 + $0xd0] sm:$0xff] %vm1132_vm8, %v1126_v11 }
 0x1d0   : > { %v1127_v56 = vpop.trf.xlu1 }
 0x1d1   : > { %1160 = vst.msk [vmem:[%s2205_s21 + $0xd8] sm:$0xff] %vm1132_vm8, %v1127_v56 }
 0x1d4   : > { %v1128_v14 = vpop.trf.xlu1 }
 0x1d5   : > { %1161 = vst.msk [vmem:[%s2205_s21 + $0xe0] sm:$0xff] %vm1132_vm8, %v1128_v14 }
 0x1d8   : > { %v1129_v31 = vpop.trf.xlu1 }
 0x1d9   : > { %1162 = vst.msk [vmem:[%s2205_s21 + $0xe8] sm:$0xff] %vm1132_vm8, %v1129_v31 }
 0x1dc   : > { %v1130_v46 = vpop.trf.xlu1 }
 0x1dd   : > { %1163 = vst.msk [vmem:[%s2205_s21 + $0xf0] sm:$0xff] %vm1132_vm8, %v1130_v46 }
 0x1e0   : > { %v1131_v29 = vpop.trf.xlu1 }
 0x1e1   : > { %1164 = vst.msk [vmem:[%s2205_s21 + $0xf8] sm:$0xff] %vm1132_vm8, %v1131_v29 }
 0x1e2 PF: > { %p11_p8 = scmp.ge.s32.totalorder %s1493_s11, 4   ;;  %s2302_s6 = smov %s1445_s7 }
 0x1e3   : > { %s2303_s7 = smov %s1449_s8  ;;  %s2304_s8 = smov %s1503_s14 }
 0x1e4   : > { %s2305_s9 = smov %s1493_s11  ;;  %13 = sbr.rel (!%p11_p8) target bundleno = 3 (0x3), region = 64 }
 0x1eb   :  { %1187 = vsyncpa [#allocation4], 1 }
 0x1ec   :  { %1189 = vsyncpa [#allocation4 + $0x1], 1 }

// kernel: tpu_custom_call.1
= control target key start
LH: loop header
LB: loop body
LE: loop exit
PB: predicated region body
PF: predicated region fallthrough
CT: control target
= control target key end

     0   :  { %6 = vsyncpa [#allocation4], 0  ;;  %s2294_s0 = inlined_call_operand.hbm [shape: f32[3,512], index: 0, kind: input, shape index: {}]   ;;  %s2295_s1 = inlined_call_operand.hbm [shape: f32[27,512], index: 1, kind: output, shape index: {}]  }
   0x1   :  { %8 = vsyncpa [#allocation4 + $0x1], 0 }
   0x2   :  { %9 = vsyncpa [#allocation5], 0 }
   0x3   :  { %11 = vsyncpa [#allocation5 + $0x1], 0  ;;  %s1449_s6 = smov 0   ;;  %s1451_s7 = smov 0  }
   0x4   :  { %s1453_s8 = smov 0   ;;  %s1455_s9 = smov 0  }
   0x5 LB: > { %s1470_s10 = sadd.s32 4294967295, %s1426_s9   ;;  %s1161_s11 = sadd.s32 4294967294, %s1426_s9   ;;  %s1426_s9 = sphi %s1455_s9, %s2322_s9   ;;  %s1422_s8 = sphi %s1453_s8, %s2321_s8   ;;  %s1418_s7 = sphi %s1451_s7, %s2320_s7   ;;  %s1414_s6 = sphi %s1449_s6, %s2319_s6  }
   0x6   : > { %s1474_s12 = sadd.s32 1, %s1426_s9   ;;  %s24_s13 = sadd.s32 1, %s1422_s8 }
   0x7   : > { %s21_s14 = ssub.s32 %s1426_s9, %s1474_s12  ;;  %p31_p0 = scmp.ne.s32.totalorder %s1422_s8, %s1418_s7 }
   0x8   : > { %p22_p1 = scmp.eq.s32.totalorder %s21_s14, 0  ;;  %p32_p2 = scmp.eq.s32.totalorder %s1426_s9, 0 }
   0x9   : > { %p37_p3 = scmp.ne.s32.totalorder %s1418_s7, %s1414_s6  ;;  %p38_p4 = scmp.eq.s32.totalorder %s1470_s10, 0 }
   0xa   : > { %s1486_s15 = scalar_select %p22_p1, %s1422_s8, %s24_s13  }
   0xb   : > { %p1488_p5 = por %p32_p2, %p31_p0  ;;  %p1492_p6 = por %p38_p4, %p37_p3 }
   0xc   : > { %p61_p7 = scmp.eq.s32.totalorder %s1470_s10, 1  ;;  %p67_p8 = scmp.eq.s32.totalorder %s1161_s11, 1 }
   0xd   : > { %p1253_p10 = scmp.lt.s32.totalorder %s1426_s9, 2  ;;  %s87_s20 = sand.u32 1, %s1422_s8  }
   0xe   : > { %p1499_p11 = por %p61_p7, %p31_p0  ;;  %p1503_p12 = por %p67_p8, %p37_p3 }
   0xf   : > { %s1207_s21 = sshll.u32 %s1426_s9, 7  ;;  %s1164_s22 = sshll.u32 %s87_s20, 3 }
  0x10   : > { %s2299_s18 = scalar_select %p1499_p11, 1, 0 }
  0x11   : > { %s2300_s19 = scalar_select %p1503_p12, 1, 0 }
  0x12   : > { %s1512_s25 = scalar_lea.hbm %s2294_s0, %s1207_s21  ;;  %s91_s26 = scalar_lea.vmem [#allocation3], %s1164_s22 }
  0x13   : > { %s99_s27 = sshll.u32 %s91_s26, 4  ;;  %p1516_p13 = pnand %p1253_p10, %p1488_p5  ;;  %s1520_s27 = int_to_ptr.vmem [resolvable:$true] %s99_s27 }
  0x14   : > { %s88_s29 = scalar_lea.sflag [#allocation4], %s87_s20  ;;  %s1330_s30 = scalar_lea.hbm %s1512_s25, 128 }
  0x15   : > { %p1331_p2 = scmp.ne.s32.totalorder %s1512_s25, %s1330_s30  ;;  %p1332_p3 = pneg %p1516_p13 }
  0x16   : > { %s1335_s4 = scalar_lea.hbm %s2294_s0, 256  ;;  %p1336_p5 = scmp.lt.u32.totalorder %s1512_s25, %s2294_s0 }
  0x17   : > { %p1333_p4 = pnand %p1332_p3, %p1331_p2  ;;  %p1337_p8 = scmp.lt.u32.totalorder %s1335_s4, %s1330_s30 }
  0x18   : > { %p1339_p9 = scmp.lt.u32.totalorder %s1330_s30, %s1512_s25 }
  0x19   : > { %p1334_p7 = pneg %p1333_p4  ;;  %p1338_p10 = por %p1337_p8, %p1336_p5 }
  0x1b   : > { %p1340_p0 = por %p1339_p9, %p1338_p10 }
  0x1d   : > { %p1341_p1 = pnand %p1340_p0, %p1334_p7 }
  0x1f   : > { %1344 = shalt.err (!%p1341_p1)
}
  0x20   : > { %s1345_s13 = scalar_lea.vmem %s1520_s27, 128  ;;  %s1428_s14 = smov [#allocation3]  }
  0x21   : > { %p1346_p2 = scmp.ne.s32.totalorder %s1520_s27, %s1345_s13  ;;  %s1350_s16 = sshll.u32 %s1428_s14, 4  ;;  %s1351_s16 = int_to_ptr.vmem [resolvable:$false] %s1350_s16 }
  0x22   : > { %s1352_s20 = scalar_lea.vmem %s1351_s16, 256  ;;  %p1353_p11 = scmp.lt.s32.totalorder %s1520_s27, %s1351_s16 }
  0x23   : > { %p1348_p4 = pnand %p1346_p2, %p1332_p3  ;;  %p1354_p5 = scmp.lt.s32.totalorder %s1352_s20, %s1345_s13 }
  0x25   : > { %p1349_p12 = pneg %p1348_p4  ;;  %p1355_p8 = por %p1354_p5, %p1353_p11 }
  0x27   : > { %p1356_p9 = pnand %p1355_p8, %p1349_p12 }
  0x29   : > { %1359 = shalt.err (!%p1356_p9)
}
  0x2a   : > { %1248 = dma.hbm_to_vmem [thread:$0]  (!%p1516_p13), %s1512_s25, 128, %s1520_s27, %s88_s29  }
  0x2b   : > { %p2302_p0 = scmp.lt.s32.totalorder %s1426_s9, 3  ;;  %p2303_p1 = scmp.ge.s32.totalorder %s1426_s9, 1 }
  0x2d   : > { %p105_p3 = pnand %p2303_p1, %p2302_p0 }
  0x2e   : > { %s1554_s21 = sand.u32 (!%p105_p3), 1, %s1418_s7  }
  0x2f   : > { %108 = sbr.rel (%p105_p3) target bundleno = 319 (0x13f), region = 24  ;;  %s1168_s22 = sshll.u32 (!%p105_p3), %s1554_s21, 3 }
  0x30   : > { %s111_s23 = scalar_lea.sflag (!%p105_p3), [#allocation4], %s1554_s21  ;;  %s114_s24 = scalar_lea.vmem (!%p105_p3), [#allocation3], %s1168_s22 }
  0x36   : > { %1405 = dma.done.wait (%p1492_p6), %s111_s23, 128  }
  0x37   : > { %1407 = vsyncadd (%p1492_p6), %s111_s23, 4294967168  ;;  %v135_v0 = vld [vmem:[%s114_s24] sm:$0x77]  ;;  %v1429_v58 = vmov 683565275   ;;  %s1169_s17 = sshll.u32 %s1554_s21, 6 }
  0x38   : > { %v141_v1 = vrot.slane %v135_v0, 5  ;;  %139 = vst [vmem:[#allocation2] sm:$0x7] %v135_v0  ;;  %v147_v2 = vadd.f32 1.5707964, %v135_v0  ;;  %v158_v3 = vmul.f32 2.0, %v135_v0  ;;  %v137_v6 = vcombine.high %v135_v0, %v135_v0 }
  0x39   : > { %v178_v4 = vmul.f32 4.0, %v135_v0  ;;  %v196_v5 = vmul.f32 8.0, %v135_v0  ;;  %v1430_v60 = vmov 2475754826   ;;  %v1431_v62 = vmov 2131351028  }
  0x3a   : > { %145 = vst [vmem:[#allocation2] sm:$0x38] %v141_v1  ;;  %v150_v7 = vrot.slane %v147_v2, 1  ;;  %v161_v8 = vrot.slane %v158_v3, 2  ;;  %v149_v10 = vcombine.high %v147_v2, %v147_v2  ;;  %v142_v13 = vrot.slane %v137_v6, 5  ;;  %s1981_s25 = scalar_lea.vmem [#allocation6], %s1169_s17 }
  0x3b   : > { %v181_v9 = vrot.slane %v178_v4, 7  ;;  %v198_v11 = vcombine.low %v196_v5, %v196_v5  ;;  %201 = vst [vmem:[#allocation2 + $0x18] sm:$0x70] %v196_v5  ;;  %v202_v12 = vadd.f32 1.5707964, %v196_v5  ;;  %v160_v14 = vcombine.high %v158_v3, %v158_v3  ;;  %s1088_s26 = sshll.u32 %s1981_s25, 4  ;;  %s2243_s26 = int_to_ptr.vmem [resolvable:$true] %s1088_s26 }
  0x3c   : > { %140 = vst [vmem:[#allocation2 + $0x8] sm:$0x7] %v137_v6  ;;  %154 = vst [vmem:[#allocation2 + $0x20] ss:$-12 sps:$4 sm:$0x83] %v150_v7   ;;  %v151_v15 = vrot.slane %v149_v10, 1  ;;  %v180_v17 = vcombine.high %v178_v4, %v178_v4 }
  0x3d   : > { %165 = vst [vmem:[#allocation2 + $0x10] ss:$-12 sps:$4 sm:$0xc1] %v161_v8   ;;  %185 = vst [vmem:[#allocation2 + $0x10] sm:$0xe] %v181_v9  ;;  %v162_v19 = vrot.slane %v160_v14, 2  ;;  %v204_v20 = vcombine.high %v202_v12, %v202_v12 }
  0x3e   : > { %v169_v16 = vadd.f32 1.5707964, %v158_v3  ;;  %v187_v18 = vadd.f32 1.5707964, %v178_v4  ;;  %200 = vst [vmem:[#allocation2 + $0x10] sm:$0x70] %v198_v11 }
  0x3f   : > { %206 = vst [vmem:[#allocation2 + $0x30] sm:$0x7] %v202_v12  ;;  %146 = vst [vmem:[#allocation2 + $0x8] sm:$0x38] %v142_v13  ;;  %v182_v22 = vrot.slane %v180_v17, 7  ;;  %s1208_s27 = sshll.u32 %s1470_s10, 8 }
  0x40   : > { %155 = vst [vmem:[#allocation2 + $0x28] ss:$-12 sps:$4 sm:$0x83] %v151_v15   ;;  %v172_v21 = vrot.slane %v169_v16, 6  ;;  %v190_v23 = vrot.slane %v187_v18, 3  ;;  %v171_v24 = vcombine.high %v169_v16, %v169_v16  ;;  %v189_v25 = vcombine.high %v187_v18, %v187_v18  ;;  %s2248_s30 = scalar_lea.hbm %s2295_s1, %s1208_s27  ;;  %s1075_s10 = scalar_lea.sflag [#allocation5], %s1554_s21 }
  0x41   : > { %166 = vst [vmem:[#allocation2 + $0x18] ss:$-12 sps:$4 sm:$0xc1] %v162_v19   ;;  %207 = vst [vmem:[#allocation2 + $0x38] sm:$0x7] %v204_v20  ;;  %s1360_s2 = scalar_lea.vmem %s2243_s26, 1024 }
  0x42   : > { %176 = vst [vmem:[#allocation2 + $0x20] sm:$0x1c] %v172_v21  ;;  %186 = vst [vmem:[#allocation2 + $0x18] sm:$0xe] %v182_v22  ;;  %v173_v26 = vrot.slane %v171_v24, 6  ;;  %v191_v27 = vrot.slane %v189_v25, 3  ;;  %p1361_p6 = scmp.ne.s32.totalorder %s2243_s26, %s1360_s2 }
  0x43   : > { %194 = vst [vmem:[#allocation2 + $0x20] sm:$0xe0] %v190_v23  ;;  %v1432_v0 = vmov 2102212464   ;;  %v1433_v2 = vmov 920167782  }
  0x44   : > { %177 = vst [vmem:[#allocation2 + $0x28] sm:$0x1c] %v173_v26  ;;  %195 = vst [vmem:[#allocation2 + $0x28] sm:$0xe0] %v191_v27  ;;  %v1562_v28 = vld [vmem:[#allocation2] sm:$0xf8] }
  0x45   : > { %v216_v29 = vand.u32 2147483647, %v1562_v28  ;;  %v219_v30 = vand.u32 2139095040, %v1562_v28  ;;  %v1566_v31 = vld [vmem:[#allocation2 + $0x10] sm:$0xff]  ;;  %v1434_v11 = vmov 1326507024  }
  0x46   : > { %v424_v32 = vand.u32 2147483647, %v1566_v31  ;;  %v427_v33 = vand.u32 2139095040, %v1566_v31  ;;  %v1570_v34 = vld [vmem:[#allocation2 + $0x30] sm:$0x7]  ;;  %vm218_vm12 = vcmp.lt.s32.totalorder %v1562_v28, 0 }
  0x47   : > { %v220_v35 = vshrl.u32 %v219_v30, 23  ;;  %v223_v36 = vand.u32 8388607, %v216_v29  ;;  %v843_v39 = vand.u32 2139095040, %v1570_v34  ;;  %v840_v47 = vand.u32 2147483647, %v1570_v34 }
  0x48   : > { %v428_v37 = vshrl.u32 %v427_v33, 23  ;;  %v431_v38 = vand.u32 8388607, %v424_v32  ;;  %vm1673_vm14 = vcmp.le.f32.partialorder %v216_v29, 0.7853982  ;;  %p2316_p11 = scmp.ne.s32.totalorder %s2299_s18, 0 }
  0x49   : > { %v1170_v40 = vadd.s32 4294967169, %v220_v35  ;;  %v844_v42 = vshrl.u32 %v843_v39, 23  ;;  %v224_v43 = vor.u32 8388608, %v223_v36  ;;  %v1584_v56 = vand.u32 8388607, %v840_v47  ;;  %s1435_s3 = smov [#allocation6]  }
  0x4a   : > { %v1178_v41 = vadd.s32 4294967169, %v428_v37  ;;  %v432_v45 = vor.u32 8388608, %v431_v38  ;;  %p1362_p12 = pnand %p1361_p6, %p2316_p11  ;;  %s1364_s4 = sshll.u32 %s1435_s3, 4  ;;  %s1365_s4 = int_to_ptr.vmem [resolvable:$false] %s1364_s4 }
  0x4b   : > { %v226_v44 = vadd.s32 1, %v1170_v40  ;;  %v1194_v49 = vadd.s32 4294967169, %v844_v42  ;;  %v1578_v51 = vshll.u32 %v224_v43, 8  ;;  %s1366_s5 = scalar_lea.vmem %s1365_s4, 2048  ;;  %p1367_p7 = scmp.lt.s32.totalorder %s2243_s26, %s1365_s4 }
  0x4c   : > { %v434_v46 = vadd.s32 1, %v1178_v41  ;;  %v1580_v55 = vshll.u32 %v432_v45, 8  ;;  %p1363_p13 = pneg %p1362_p12  ;;  %p1368_p10 = scmp.lt.s32.totalorder %s1366_s5, %s1360_s2 }
  0x4d   : > { %vm227_vm0 = vcmp.gt.s32.totalorder %v226_v44, 0  ;;  %v1593_v5 = vadd.s32 1, %v1194_v49 }
  0x4e   : > { %v228_v48 = vsel %vm227_vm0, %v226_v44, 0  ;;  %vm435_vm1 = vcmp.gt.s32.totalorder %v434_v46, 0  ;;  %p1369_p2 = por %p1368_p10, %p1367_p7 }
  0x4f   : > { %v230_v50 = vand.u32 31, %v228_v48  ;;  %v436_v52 = vsel %vm435_vm1, %v434_v46, 0  ;;  %v229_v53 = vshrl.u32 %v228_v48, 5  ;;  %vm851_vm5 = vcmp.gt.s32.totalorder %v1593_v5, 0 }
  0x50   : > { %v438_v54 = vand.u32 31, %v436_v52  ;;  %v1591_v4 = vshrl.u32 %v436_v52, 5  ;;  %p1370_p4 = pnand %p1369_p2, %p1363_p13 }
  0x51   : > { %v231_v57 = vsub.s32 32, %v230_v50  ;;  %v233_v59 = vshll.u32 %v1429_v58, %v230_v50  ;;  %v236_v61 = vshll.u32 %v1430_v60, %v230_v50  ;;  %v239_v63 = vshll.u32 %v1431_v62, %v230_v50 }
  0x52   : > { %v242_v1 = vshll.u32 %v1432_v0, %v230_v50  ;;  %v245_v3 = vshll.u32 %v1433_v2, %v230_v50  ;;  %vm248_vm2 = vcmp.lt.s32.totalorder %v229_v53, 1  ;;  %vm250_vm3 = vcmp.lt.s32.totalorder %v229_v53, 3 }
  0x53   : > { %v232_v6 = vshrl.u32 %v1429_v58, %v231_v57  ;;  %v234_v7 = vshrl.u32 %v1430_v60, %v231_v57  ;;  %v237_v8 = vshrl.u32 %v1431_v62, %v231_v57  ;;  %v240_v9 = vshrl.u32 %v1432_v0, %v231_v57 }
  0x54   : > { %v243_v10 = vshrl.u32 %v1433_v2, %v231_v57  ;;  %v246_v12 = vshrl.u32 %v1434_v11, %v231_v57  ;;  %v439_v16 = vsub.s32 32, %v438_v54  ;;  %vm251_vm4 = vcmp.lt.s32.totalorder %v229_v53, 4 }
  0x55   : > { %v235_v13 = vor.u32 %v234_v7, %v233_v59  ;;  %v238_v14 = vor.u32 %v237_v8, %v236_v61  ;;  %v241_v15 = vor.u32 %v240_v9, %v239_v63  ;;  %v441_v19 = vshll.u32 %v1429_v58, %v438_v54 }
  0x56   : > { %v244_v17 = vor.u32 %v243_v10, %v242_v1  ;;  %v247_v18 = vor.u32 %v246_v12, %v245_v3  ;;  %v444_v27 = vshll.u32 %v1430_v60, %v438_v54  ;;  %vm249_vm6 = vcmp.lt.s32.totalorder %v229_v53, 2 }
  0x57   : > { %v252_v20 = vsel %vm248_vm2, %v232_v6, %v235_v13  ;;  %v253_v21 = vsel %vm251_vm4, %v241_v15, 2102212464  ;;  %v256_v22 = vsel %vm248_vm2, %v235_v13, %v238_v14  ;;  %v260_v23 = vsel %vm248_vm2, %v238_v14, %v241_v15 }
  0x58   : > { %v254_v24 = vsel %vm250_vm3, %v238_v14, %v253_v21  ;;  %v257_v25 = vsel %vm251_vm4, %v244_v17, 920167782  ;;  %v261_v26 = vsel %vm251_vm4, %v247_v18, 1326507024  ;;  %v442_v35 = vshrl.u32 %v1430_v60, %v439_v16  ;;  %v1634_v14 = vld [vmem:[#allocation2 + $0x8] sm:$0xf8] }
  0x59   : > { %v258_v30 = vsel %vm250_vm3, %v241_v15, %v257_v25  ;;  %v262_v33 = vsel %vm250_vm3, %v244_v17, %v261_v26  ;;  %v255_v36 = vsel %vm249_vm6, %v252_v20, %v254_v24  ;;  %v445_v39 = vshrl.u32 %v1431_v62, %v439_v16 }
  0x5a   : > { %v259_v37 = vsel %vm249_vm6, %v256_v22, %v258_v30  ;;  %v263_v38 = vsel %vm249_vm6, %v260_v23, %v262_v33  ;;  %v443_v44 = vor.u32 %v442_v35, %v441_v19  ;;  %v447_v46 = vshll.u32 %v1431_v62, %v438_v54 }
  0x5b   : > { %v1610_v40 = vmul.u32.u64.low %v1578_v51, %v263_v38  ;;  %v1611_v41 = vmul.u32.u64.high %v1578_v51, %v263_v38, %v1610_v40  ;;  %v1614_v42 = vmul.u32.u64.low %v1578_v51, %v259_v37  ;;  %v1615_v43 = vmul.u32.u64.high %v1578_v51, %v259_v37, %v1614_v42 }
  0x5c   : > { %v446_v45 = vor.u32 %v445_v39, %v444_v27  ;;  %v448_v48 = vshrl.u32 %v1432_v0, %v439_v16  ;;  %v450_v49 = vshll.u32 %v1432_v0, %v438_v54  ;;  %v451_v50 = vshrl.u32 %v1433_v2, %v439_v16 }
  0x5d   : > { %v453_v52 = vshll.u32 %v1433_v2, %v438_v54  ;;  %v454_v53 = vshrl.u32 %v1434_v11, %v439_v16  ;;  %v271_v57 = vmul.u32 %v1578_v51, %v255_v36  ;;  %v440_v59 = vshrl.u32 %v1429_v58, %v439_v16 }
  0x5e   : > { %v449_v61 = vor.u32 %v448_v48, %v447_v46  ;;  %vm456_vm7 = vcmp.lt.s32.totalorder %v1591_v4, 1  ;;  %vm273_vm8 = vc.u32 %v1611_v41, %v1614_v42  ;;  %v274_v63 = vadd.s32 1, %v1615_v43 }
  0x5f   : > { %v452_v1 = vor.u32 %v451_v50, %v450_v49  ;;  %vm457_vm9 = vcmp.lt.s32.totalorder %v1591_v4, 2  ;;  %v455_v3 = vor.u32 %v454_v53, %v453_v52  ;;  %vm458_vm10 = vcmp.lt.s32.totalorder %v1591_v4, 3 }
  0x60   : > { %vm459_vm11 = vcmp.lt.s32.totalorder %v1591_v4, 4  ;;  %v464_v54 = vsel %vm456_vm7, %v443_v44, %v446_v45  ;;  %v275_v51 = vsel %vm273_vm8, %v274_v63, %v1615_v43  ;;  %v468_v8 = vsel %vm456_vm7, %v446_v45, %v449_v61 }
  0x61   : > { %v461_v6 = vsel %vm459_vm11, %v449_v61, 2102212464  ;;  %v465_v7 = vsel %vm459_vm11, %v452_v1, 920167782  ;;  %v276_v9 = vadd.s32 %v275_v51, %v271_v57  ;;  %v460_v10 = vsel %vm456_vm7, %v440_v59, %v443_v44 }
  0x62   : > { %v466_v12 = vsel %vm458_vm10, %v449_v61, %v465_v7  ;;  %v469_v13 = vsel %vm459_vm11, %v455_v3, 1326507024  ;;  %v462_v15 = vsel %vm458_vm10, %v446_v45, %v461_v6  ;;  %v852_v18 = vsel %vm851_vm5, %v1593_v5, 0 }
  0x63   : > { %v467_v16 = vsel %vm457_vm9, %v464_v54, %v466_v12  ;;  %v470_v17 = vsel %vm458_vm10, %v452_v1, %v469_v13  ;;  %v277_v19 = vadd.s32 536870912, %v276_v9  ;;  %v848_v25 = vor.u32 8388608, %v1584_v56 }
  0x64   : > { %v471_v20 = vsel %vm457_vm9, %v468_v8, %v470_v17  ;;  %v1644_v21 = vmul.u32.u64.low %v1580_v55, %v467_v16  ;;  %v1645_v22 = vmul.u32.u64.high %v1580_v55, %v467_v16, %v1644_v21  ;;  %v320_v26 = vand.u32 2147483647, %v1634_v14 }
  0x65   : > { %v1649_v23 = vmul.u32.u64.low %v1580_v55, %v471_v20  ;;  %v1650_v24 = vmul.u32.u64.high %v1580_v55, %v471_v20, %v1649_v23  ;;  %v278_v27 = vshrl.u32 %v277_v19, 30  ;;  %v463_v5 = vsel %vm457_vm9, %v460_v10, %v462_v15 }
  0x66   : > { %v854_v30 = vand.u32 31, %v852_v18  ;;  %v323_v33 = vand.u32 2139095040, %v1634_v14  ;;  %v482_v36 = vadd.s32 1, %v1645_v22  ;;  %v479_v38 = vmul.u32 %v1580_v55, %v463_v5 }
  0x67   : > { %v279_v35 = vshll.u32 %v278_v27, 30  ;;  %vm481_vm13 = vc.u32 %v1650_v24, %v1644_v21  ;;  %v1664_v56 = vand.u32 8388607, %v320_v26  ;;  %v1669_v40 = vshll.u32 %v848_v25, 8 }
  0x68   : > { %v855_v37 = vsub.s32 32, %v854_v30  ;;  %v483_v39 = vsel %vm481_vm13, %v482_v36, %v1645_v22  ;;  %v324_v43 = vshrl.u32 %v323_v33, 23  ;;  %v857_v45 = vshll.u32 %v1429_v58, %v854_v30 }
  0x69   : > { %v1666_v4 = vsub.s32 %v276_v9, %v279_v35  ;;  %v484_v55 = vadd.s32 %v483_v39, %v479_v38  ;;  %v860_v48 = vshll.u32 %v1430_v60, %v854_v30  ;;  %v863_v52 = vshll.u32 %v1431_v62, %v854_v30 }
  0x6a   : > { %v858_v46 = vshrl.u32 %v1430_v60, %v855_v37  ;;  %v861_v50 = vshrl.u32 %v1431_v62, %v855_v37  ;;  %v864_v53 = vshrl.u32 %v1432_v0, %v855_v37  ;;  %v302_v57 = vsub.s32 4, %v278_v27 }
  0x6b   : > { %v282_v49 = vsub.s32 0, %v1666_v4  ;;  %v485_v29 = vadd.s32 536870912, %v484_v55  ;;  %v1684_v59 = vshrl.u32 %v852_v18, 5  ;;  %v866_v61 = vshll.u32 %v1432_v0, %v854_v30 }
  0x6c   : > { %v272_v63 = vadd.s32 %v1614_v42, %v1611_v41  ;;  %v867_v3 = vshrl.u32 %v1433_v2, %v855_v37  ;;  %v1174_v54 = vadd.s32 4294967169, %v324_v43  ;;  %v869_v6 = vshll.u32 %v1433_v2, %v854_v30 }
  0x6d   : > { %v1171_v1 = vmin.u32 %v282_v49, %v1666_v4  ;;  %v486_v51 = vshrl.u32 %v485_v29, 30  ;;  %v870_v7 = vshrl.u32 %v1434_v11, %v855_v37  ;;  %v328_v8 = vor.u32 8388608, %v1664_v56 }
  0x6e   : > { %v859_v10 = vor.u32 %v858_v46, %v857_v45  ;;  %v862_v12 = vor.u32 %v861_v50, %v860_v48  ;;  %v865_v13 = vor.u32 %v864_v53, %v863_v52  ;;  %v303_v15 = vsel %vm218_vm12, %v302_v57, %v278_v27 }
  0x6f   : > { %v284_v9 = vclz %v1171_v1  ;;  %v487_v41 = vshll.u32 %v486_v51, 30  ;;  %v868_v42 = vor.u32 %v867_v3, %v866_v61  ;;  %vm872_vm15 = vcmp.lt.s32.totalorder %v1684_v59, 1 }
  0x70   : > { %v871_v17 = vor.u32 %v870_v7, %v869_v6  ;;  %vm873_vm0 = vcmp.lt.s32.totalorder %v1684_v59, 2  ;;  %vm875_vm1 = vcmp.lt.s32.totalorder %v1684_v59, 4  ;;  %vm426_vm2 = vcmp.lt.s32.totalorder %v1566_v31, 0 }
  0x71   : > { %v1172_v16 = vadd.s32 4294967294, %v284_v9  ;;  %v1700_v18 = vsub.s32 %v484_v55, %v487_v41  ;;  %v856_v19 = vshrl.u32 %v1429_v58, %v855_v37  ;;  %vm874_vm3 = vcmp.lt.s32.totalorder %v1684_v59, 3 }
  0x72   : > { %v881_v20 = vsel %vm875_vm1, %v868_v42, 920167782  ;;  %v305_v22 = vsel %vm1673_vm14, 0, %v303_v15  ;;  %v880_v23 = vsel %vm872_vm15, %v859_v10, %v862_v12  ;;  %v510_v30 = vsub.s32 4, %v486_v51 }
  0x73   : > { %vm1173_vm4 = vcmp.lt.s32.totalorder %v1172_v16, 0  ;;  %v882_v25 = vsel %vm874_vm3, %v865_v13, %v881_v20  ;;  %v490_v5 = vsub.s32 0, %v1700_v18  ;;  %v884_v33 = vsel %vm872_vm15, %v862_v12, %v865_v13 }
  0x74   : > { %v287_v27 = vsel %vm1173_vm4, 0, %v1172_v16  ;;  %vm1717_vm5 = vcmp.le.f32.partialorder %v424_v32, 0.7853982  ;;  %v877_v38 = vsel %vm875_vm1, %v865_v13, 2102212464  ;;  %v883_v45 = vsel %vm873_vm0, %v880_v23, %v882_v25 }
  0x75   : > { %v288_v35 = vsub.s32 32, %v287_v27  ;;  %v292_v36 = vsub.s32 4294967266, %v287_v27  ;;  %v885_v39 = vsel %vm875_vm1, %v871_v17, 1326507024  ;;  %v289_v43 = vshll.u32 %v1666_v4, %v287_v27 }
  0x76   : > { %v1179_v55 = vmin.u32 %v490_v5, %v1700_v18  ;;  %v886_v46 = vsel %vm874_vm3, %v868_v42, %v885_v39  ;;  %v330_v50 = vadd.s32 1, %v1174_v54  ;;  %v309_v52 = vadd.s32 3, %v305_v22 }
  0x77   : > { %v290_v32 = vshrl.u32 %v272_v63, %v288_v35  ;;  %v293_v48 = vadd.s32 127, %v292_v36  ;;  %v887_v49 = vsel %vm873_vm0, %v884_v33, %v886_v46  ;;  %v876_v57 = vsel %vm872_vm15, %v856_v19, %v859_v10 }
  0x78   : > { %v492_v53 = vclz %v1179_v55  ;;  %v878_v4 = vsel %vm874_vm3, %v862_v12, %v877_v38  ;;  %v1738_v1 = vmul.u32.u64.low %v1669_v40, %v887_v49  ;;  %v1739_v3 = vmul.u32.u64.high %v1669_v40, %v887_v49, %v1738_v1 }
  0x79   : > { %v291_v29 = vor.u32 %v290_v32, %v289_v43  ;;  %v294_v61 = vshll.u32 %v293_v48, 23  ;;  %v1742_v6 = vmul.u32.u64.low %v1669_v40, %v883_v45  ;;  %v1743_v7 = vmul.u32.u64.high %v1669_v40, %v883_v45, %v1742_v6 }
  0x7a   : > { %v1180_v63 = vadd.s32 4294967294, %v492_v53  ;;  %vm331_vm6 = vcmp.gt.s32.totalorder %v330_v50, 0  ;;  %v480_v9 = vadd.s32 %v1644_v21, %v1650_v24  ;;  %v511_v10 = vsel %vm426_vm2, %v510_v30, %v486_v51 }
  0x7b   : > { %v295_v54 = vor.u32 4788187, %v294_v61  ;;  %v332_v12 = vsel %vm331_vm6, %v330_v50, 0  ;;  %v1750_v13 = vand.u32 3, %v309_v52  ;;  %v879_v15 = vsel %vm873_vm0, %v876_v57, %v878_v4 }
  0x7c   : > { %vm1181_vm7 = vcmp.lt.s32.totalorder %v1180_v63, 0  ;;  %v334_v41 = vand.u32 31, %v332_v12  ;;  %v298_v16 = vcvt.s32.f32 %v291_v29  ;;  %vm897_vm8 = vc.u32 %v1739_v3, %v1742_v6 }
  0x7d   : > { %v296_v42 = vand.u32 2147483647, %v295_v54  ;;  %v495_v17 = vsel %vm1181_vm7, 0, %v1180_v63  ;;  %v513_v21 = vsel %vm1717_vm5, 0, %v511_v10  ;;  %v898_v24 = vadd.s32 1, %v1743_v7 }
  0x7e   : > { %v496_v19 = vsub.s32 32, %v495_v17  ;;  %v500_v20 = vsub.s32 4294967266, %v495_v17  ;;  %v895_v22 = vmul.u32 %v1669_v40, %v879_v15  ;;  %v1760_v23 = vshrl.u32 %v332_v12, 5 }
  0x7f   : > { %v299_v51 = vmul.f32 %v298_v16, %v296_v42  ;;  %v335_v59 = vsub.s32 32, %v334_v41  ;;  %v497_v25 = vshll.u32 %v1700_v18, %v495_v17  ;;  %v899_v30 = vsel %vm897_vm8, %v898_v24, %v1743_v7 }
  0x80   : > { %v498_v27 = vshrl.u32 %v480_v9, %v496_v19  ;;  %v501_v5 = vadd.s32 127, %v500_v20  ;;  %v900_v35 = vadd.s32 %v899_v30, %v895_v22  ;;  %v337_v36 = vshll.u32 %v1429_v58, %v334_v41 }
  0x81   : > { %v300_v33 = vxor.u32 2147483648, %v299_v51  ;;  %v338_v38 = vshrl.u32 %v1430_v60, %v335_v59  ;;  %v340_v55 = vshll.u32 %v1430_v60, %v334_v41  ;;  %v341_v40 = vshrl.u32 %v1431_v62, %v335_v59 }
  0x82   : > { %v499_v39 = vor.u32 %v498_v27, %v497_v25  ;;  %v502_v43 = vshll.u32 %v501_v5, 23  ;;  %v901_v18 = vadd.s32 536870912, %v900_v35  ;;  %v343_v46 = vshll.u32 %v1431_v62, %v334_v41 }
  0x83   : > { %v301_v45 = vsel %vm218_vm12, %v300_v33, %v299_v51  ;;  %v344_v32 = vshrl.u32 %v1432_v0, %v335_v59  ;;  %v339_v50 = vor.u32 %v338_v38, %v337_v36  ;;  %v346_v52 = vshll.u32 %v1432_v0, %v334_v41  ;;  %v1829_v36 = vld [vmem:[#allocation2 + $0x18] sm:$0xff] }
  0x84   : > { %v304_v48 = vsel %vm1673_vm14, %v1562_v28, %v301_v45  ;;  %v503_v49 = vor.u32 4788187, %v502_v43  ;;  %v506_v53 = vcvt.s32.f32 %v499_v39  ;;  %v902_v57 = vshrl.u32 %v901_v18, 30 }
  0x85   : > { %1298 = vcosq.f32 %v304_v48  ;;  %v347_v4 = vshrl.u32 %v1433_v2, %v335_v59  ;;  %v342_v61 = vor.u32 %v341_v40, %v340_v55  ;;  %v350_v1 = vshrl.u32 %v1434_v11, %v335_v59 }
  0x86   : > { %1300 = vsinq.f32 %v304_v48  ;;  %v504_v29 = vand.u32 2147483647, %v503_v49  ;;  %v903_v63 = vshll.u32 %v902_v57, 30  ;;  %v517_v9 = vadd.s32 3, %v513_v21 }
  0x87   : > { %v348_v7 = vor.u32 %v347_v4, %v346_v52  ;;  %vm842_vm9 = vcmp.lt.s32.totalorder %v1570_v34, 0  ;;  %v345_v44 = vor.u32 %v344_v32, %v343_v46  ;;  %v349_v10 = vshll.u32 %v1433_v2, %v334_v41 }
  0x88   : > { %v507_v54 = vmul.f32 %v506_v53, %v504_v29  ;;  %v1780_v12 = vsub.s32 %v900_v35, %v903_v63  ;;  %v336_v15 = vshrl.u32 %v1429_v58, %v335_v59  ;;  %vm352_vm10 = vcmp.lt.s32.totalorder %v1760_v23, 1 }
  0x89   : > { %v1786_v42 = vshll.u32 %v328_v8, 8  ;;  %vm312_vm11 = vcmp.eq.s32.totalorder %v1750_v13, 0  ;;  %v351_v17 = vor.u32 %v350_v1, %v349_v10  ;;  %vm355_vm12 = vcmp.lt.s32.totalorder %v1760_v23, 4 }
  0x8a   : > { %v508_v16 = vxor.u32 2147483648, %v507_v54  ;;  %v360_v19 = vsel %vm352_vm10, %v339_v50, %v342_v61  ;;  %vm311_vm13 = vcmp.lt.s32.totalorder %v1750_v13, 2  ;;  %v906_v41 = vsub.s32 0, %v1780_v12 }
  0x8b   : > { %v926_v20 = vsub.s32 4, %v902_v57  ;;  %vm354_vm14 = vcmp.lt.s32.totalorder %v1760_v23, 3  ;;  %v361_v56 = vsel %vm355_vm12, %v348_v7, 920167782  ;;  %vm308_vm15 = vweird.f32 %v1562_v28 }
  0x8c   : > { %v509_v8 = vsel %vm426_vm2, %v508_v16, %v507_v54  ;;  %vm1802_vm0 = vcmp.le.f32.partialorder %v840_v47, 0.7853982  ;;  %vm353_vm1 = vcmp.lt.s32.totalorder %v1760_v23, 2  ;;  %v357_v24 = vsel %vm355_vm12, %v345_v44, 2102212464 }
  0x8d   : > { %v362_v51 = vsel %vm354_vm14, %v345_v44, %v361_v56  ;;  %v512_v22 = vsel %vm1717_vm5, %v1566_v31, %v509_v8  ;;  %v1195_v59 = vmin.u32 %v906_v41, %v1780_v12  ;;  %v364_v25 = vsel %vm352_vm10, %v342_v61, %v345_v44  ;;  %v1867_v44 = vld [vmem:[#allocation2 + $0x20] sm:$0xff] }
  0x8e   : > { %v363_v47 = vsel %vm353_vm1, %v360_v19, %v362_v51  ;;  %1302 = vcosq.f32 %v512_v22  ;;  %v365_v27 = vsel %vm355_vm12, %v351_v17, 1326507024  ;;  %vm315_vm2 = vcmp.eq.s32.totalorder %v1750_v13, 2 }
  0x8f   : > { %v1822_v5 = vmul.u32.u64.low %v1786_v42, %v363_v47  ;;  %v1823_v30 = vmul.u32.u64.high %v1786_v42, %v363_v47, %v1822_v5  ;;  %v1299_v33 = vpop.eup %1298  ;;  %1304 = vsinq.f32 %v512_v22  ;;  %v1827_v37 = vand.u32 3, %v517_v9 }
  0x90   : > { %v908_v35 = vclz %v1195_v59  ;;  %v1301_v38 = vpop.eup %1300  ;;  %v316_v39 = vxor.u32 2147483648, %v1299_v33  ;;  %v356_v43 = vsel %vm352_vm10, %v336_v15, %v339_v50  ;;  %v358_v55 = vsel %vm354_vm14, %v342_v61, %v357_v24 }
  0x91   : > { %v366_v40 = vsel %vm354_vm14, %v348_v7, %v365_v27  ;;  %v313_v45 = vxor.u32 2147483648, %v1301_v38  ;;  %v927_v46 = vsel %vm842_vm9, %v926_v20, %v902_v57  ;;  %v528_v50 = vand.u32 2147483647, %v1829_v36 }
  0x92   : > { %v1196_v18 = vadd.s32 4294967294, %v908_v35  ;;  %v367_v32 = vsel %vm353_vm1, %v364_v25, %v366_v40  ;;  %v317_v48 = vsel %vm315_vm2, %v316_v39, %v1301_v38  ;;  %v359_v4 = vsel %vm353_vm1, %v356_v43, %v358_v55 }
  0x93   : > { %v1842_v49 = vmul.u32.u64.low %v1786_v42, %v367_v32  ;;  %v1843_v52 = vmul.u32.u64.high %v1786_v42, %v367_v32, %v1842_v49  ;;  %v314_v53 = vsel %vm312_vm11, %v1299_v33, %v313_v45  ;;  %v378_v29 = vadd.s32 1, %v1823_v30 }
  0x94   : > { %vm1197_vm3 = vcmp.lt.s32.totalorder %v1196_v18, 0  ;;  %v318_v57 = vsel %vm311_vm13, %v314_v53, %v317_v48  ;;  %vm519_vm4 = vcmp.lt.s32.totalorder %v1827_v37, 2  ;;  %v896_v61 = vadd.s32 %v1742_v6, %v1739_v3 }
  0x95   : > { %v911_v1 = vsel %vm1197_vm3, 0, %v1196_v18  ;;  %v531_v63 = vand.u32 2139095040, %v1829_v36  ;;  %v319_v7 = vsel %vm308_vm15, nan, %v318_v57  ;;  %vm516_vm5 = vweird.f32 %v1566_v31 }
  0x96   : > { %v912_v23 = vsub.s32 32, %v911_v1  ;;  %v916_v54 = vsub.s32 4294967266, %v911_v1  ;;  %v929_v9 = vsel %vm1802_vm0, 0, %v927_v46  ;;  %1048 = vst [vmem:[#allocation2] sm:$0xf8] %v319_v7  ;;  %v375_v13 = vmul.u32 %v1786_v42, %v359_v4 }
  0x97   : > { %vm377_vm6 = vc.u32 %v1843_v52, %v1822_v5  ;;  %v532_v3 = vshrl.u32 %v531_v63, 23  ;;  %v535_v6 = vand.u32 8388607, %v528_v50  ;;  %v913_v28 = vshll.u32 %v1780_v12, %v911_v1 }
  0x98   : > { %v914_v10 = vshrl.u32 %v896_v61, %v912_v23  ;;  %v917_v15 = vadd.s32 127, %v916_v54  ;;  %v379_v16 = vsel %vm377_vm6, %v378_v29, %v1823_v30  ;;  %v1303_v17 = vpop.eup %1302  ;;  %vm520_vm7 = vcmp.eq.s32.totalorder %v1827_v37, 0 }
  0x99   : > { %vm523_vm8 = vcmp.eq.s32.totalorder %v1827_v37, 2  ;;  %v380_v42 = vadd.s32 %v379_v16, %v375_v13  ;;  %v1182_v19 = vadd.s32 4294967169, %v532_v3  ;;  %v1305_v41 = vpop.eup %1304  ;;  %v524_v20 = vxor.u32 2147483648, %v1303_v17 }
  0x9a   : > { %v915_v56 = vor.u32 %v914_v10, %v913_v28  ;;  %v918_v8 = vshll.u32 %v917_v15, 23  ;;  %v632_v24 = vand.u32 2147483647, %v1867_v44  ;;  %v521_v51 = vxor.u32 2147483648, %v1305_v41 }
  0x9b   : > { %v933_v22 = vadd.s32 3, %v929_v9  ;;  %v381_v12 = vadd.s32 536870912, %v380_v42  ;;  %v538_v59 = vadd.s32 1, %v1182_v19  ;;  %v525_v47 = vsel %vm523_vm8, %v524_v20, %v1305_v41 }
  0x9c   : > { %v919_v25 = vor.u32 4788187, %v918_v8  ;;  %v536_v27 = vor.u32 8388608, %v535_v6  ;;  %v635_v30 = vand.u32 2139095040, %v1867_v44  ;;  %v522_v33 = vsel %vm520_vm7, %v1303_v17, %v521_v51 }
  0x9d   : > { %v922_v35 = vcvt.s32.f32 %v915_v56  ;;  %v382_v38 = vshrl.u32 %v381_v12, 30  ;;  %vm539_vm10 = vcmp.gt.s32.totalorder %v538_v59, 0  ;;  %v526_v39 = vsel %vm519_vm4, %v522_v33, %v525_v47 }
  0x9e   : > { %v920_v43 = vand.u32 2147483647, %v919_v25  ;;  %v540_v55 = vsel %vm539_vm10, %v538_v59, 0  ;;  %v1881_v40 = vand.u32 8388607, %v632_v24  ;;  %v527_v45 = vsel %vm516_vm5, nan, %v526_v39 }
  0x9f   : > { %v383_v18 = vshll.u32 %v382_v38, 30  ;;  %v406_v46 = vsub.s32 4, %v382_v38  ;;  %v636_v32 = vshrl.u32 %v635_v30, 23  ;;  %1050 = vst [vmem:[#allocation2 + $0x10] sm:$0xff] %v527_v45  ;;  %v542_v49 = vand.u32 31, %v540_v55 }
  0xa0   : > { %v923_v48 = vmul.f32 %v922_v35, %v920_v43  ;;  %v1885_v53 = vand.u32 3, %v933_v22  ;;  %vm1889_vm11 = vcmp.le.f32.partialorder %v320_v26, 0.7853982  ;;  %vm322_vm12 = vcmp.lt.s32.totalorder %v1634_v14, 0 }
  0xa1   : > { %v376_v31 = vadd.s32 %v1822_v5, %v1843_v52  ;;  %v1896_v4 = vsub.s32 %v380_v42, %v383_v18  ;;  %v1898_v57 = vshrl.u32 %v540_v55, 5  ;;  %v543_v61 = vsub.s32 32, %v542_v49 }
  0xa2   : > { %v924_v29 = vxor.u32 2147483648, %v923_v48  ;;  %v1900_v1 = vshll.u32 %v536_v27, 8  ;;  %v1905_v26 = vsel %vm322_vm12, %v406_v46, %v382_v38  ;;  %v1186_v7 = vadd.s32 4294967169, %v636_v32 }
  0xa3   : > { %v386_v63 = vsub.s32 0, %v1896_v4  ;;  %v640_v23 = vor.u32 8388608, %v1881_v40  ;;  %v545_v52 = vshll.u32 %v1429_v58, %v542_v49  ;;  %v546_v54 = vshrl.u32 %v1430_v60, %v543_v61 }
  0xa4   : > { %v925_v5 = vsel %vm842_vm9, %v924_v29, %v923_v48  ;;  %v549_v9 = vshrl.u32 %v1431_v62, %v543_v61  ;;  %v548_v6 = vshll.u32 %v1430_v60, %v542_v49  ;;  %v552_v28 = vshrl.u32 %v1432_v0, %v543_v61 }
  0xa5   : > { %v928_v13 = vsel %vm1802_vm0, %v1570_v34, %v925_v5  ;;  %v1175_v3 = vmin.u32 %v386_v63, %v1896_v4  ;;  %v551_v10 = vshll.u32 %v1431_v62, %v542_v49  ;;  %vm560_vm9 = vcmp.lt.s32.totalorder %v1898_v57, 1 }
  0xa6   : > { %1306 = vcosq.f32 %v928_v13  ;;  %vm561_vm13 = vcmp.lt.s32.totalorder %v1898_v57, 2  ;;  %v547_v16 = vor.u32 %v546_v54, %v545_v52  ;;  %v550_v17 = vor.u32 %v549_v9, %v548_v6 }
  0xa7   : > { %1308 = vsinq.f32 %v928_v13  ;;  %v388_v15 = vclz %v1175_v3  ;;  %v544_v21 = vshrl.u32 %v1429_v58, %v543_v61  ;;  %v553_v42 = vor.u32 %v552_v28, %v551_v10 }
  0xa8   : > { %v554_v19 = vshll.u32 %v1432_v0, %v542_v49  ;;  %v555_v41 = vshrl.u32 %v1433_v2, %v543_v61  ;;  %v557_v56 = vshll.u32 %v1433_v2, %v542_v49  ;;  %v558_v8 = vshrl.u32 %v1434_v11, %v543_v61 }
  0xa9   : > { %v1176_v20 = vadd.s32 4294967294, %v388_v15  ;;  %vm563_vm14 = vcmp.lt.s32.totalorder %v1898_v57, 4  ;;  %vm939_vm15 = vcmp.eq.s32.totalorder %v1885_v53, 2  ;;  %v409_v51 = vsel %vm1889_vm11, 0, %v1905_v26 }
  0xaa   : > { %v556_v22 = vor.u32 %v555_v41, %v554_v19  ;;  %vm562_vm0 = vcmp.lt.s32.totalorder %v1898_v57, 3  ;;  %v565_v12 = vsel %vm563_vm14, %v553_v42, 2102212464  ;;  %vm936_vm1 = vcmp.eq.s32.totalorder %v1885_v53, 0 }
  0xab   : > { %vm1177_vm2 = vcmp.lt.s32.totalorder %v1176_v20, 0  ;;  %v559_v59 = vor.u32 %v558_v8, %v557_v56  ;;  %v564_v47 = vsel %vm560_vm9, %v544_v21, %v547_v16  ;;  %v568_v25 = vsel %vm560_vm9, %v547_v16, %v550_v17  ;;  %v1060_v21 = vld [vmem:[#allocation2 + $0x10] sm:$0xff] }
  0xac   : > { %vm935_vm3 = vcmp.lt.s32.totalorder %v1885_v53, 2  ;;  %v391_v27 = vsel %vm1177_vm2, 0, %v1176_v20  ;;  %v566_v30 = vsel %vm562_vm0, %v550_v17, %v565_v12  ;;  %v569_v33 = vsel %vm563_vm14, %v556_v22, 920167782  ;;  %1068 = vst [vmem:[%s1981_s25 + $0x10] sm:$0xff] %v1060_v21 }
  0xad   : > { %v642_v35 = vadd.s32 1, %v1186_v7  ;;  %vm932_vm4 = vweird.f32 %v1570_v34  ;;  %v392_v38 = vsub.s32 32, %v391_v27  ;;  %v396_v39 = vsub.s32 4294967266, %v391_v27 }
  0xae   : > { %v570_v43 = vsel %vm562_vm0, %v553_v42, %v569_v33  ;;  %v572_v55 = vsel %vm560_vm9, %v550_v17, %v553_v42  ;;  %v393_v45 = vshll.u32 %v1896_v4, %v391_v27  ;;  %v573_v46 = vsel %vm563_vm14, %v559_v59, 1326507024  ;;  %v1058_v17 = vld [vmem:[#allocation2] sm:$0xff] }
  0xaf   : > { %v571_v18 = vsel %vm561_vm13, %v568_v25, %v570_v43  ;;  %vm643_vm5 = vcmp.gt.s32.totalorder %v642_v35, 0  ;;  %v394_v32 = vshrl.u32 %v376_v31, %v392_v38  ;;  %v397_v48 = vadd.s32 127, %v396_v39  ;;  %1066 = vst [vmem:[%s1981_s25] sm:$0xff] %v1058_v17 }
  0xb0   : > { %v574_v49 = vsel %vm562_vm0, %v556_v22, %v573_v46  ;;  %v644_v29 = vsel %vm643_vm5, %v642_v35, 0  ;;  %v1307_v61 = vpop.eup %1306  ;;  %v567_v63 = vsel %vm561_vm13, %v564_v47, %v566_v30  ;;  %v1967_v3 = vadd.s32 3, %v409_v51 }
  0xb1   : > { %v575_v4 = vsel %vm561_vm13, %v572_v55, %v574_v49  ;;  %v1962_v26 = vmul.u32.u64.low %v1900_v1, %v571_v18  ;;  %v1963_v7 = vmul.u32.u64.high %v1900_v1, %v571_v18, %v1962_v26  ;;  %v1309_v5 = vpop.eup %1308  ;;  %v940_v31 = vxor.u32 2147483648, %v1307_v61 }
  0xb2   : > { %v395_v52 = vor.u32 %v394_v32, %v393_v45  ;;  %v398_v54 = vshll.u32 %v397_v48, 23  ;;  %v646_v9 = vand.u32 31, %v644_v29  ;;  %v937_v13 = vxor.u32 2147483648, %v1309_v5 }
  0xb3   : > { %v1970_v6 = vmul.u32.u64.low %v1900_v1, %v575_v4  ;;  %v1971_v28 = vmul.u32.u64.high %v1900_v1, %v575_v4, %v1970_v6  ;;  %v941_v57 = vsel %vm939_vm15, %v940_v31, %v1309_v5  ;;  %v583_v15 = vmul.u32 %v1900_v1, %v567_v63 }
  0xb4   : > { %v399_v10 = vor.u32 4788187, %v398_v54  ;;  %v647_v16 = vsub.s32 32, %v646_v9  ;;  %v938_v42 = vsel %vm936_vm1, %v1307_v61, %v937_v13  ;;  %v402_v19 = vcvt.s32.f32 %v395_v52 }
  0xb5   : > { %v586_v41 = vadd.s32 1, %v1963_v7  ;;  %v1979_v20 = vshrl.u32 %v644_v29, 5  ;;  %v942_v1 = vsel %vm935_vm3, %v938_v42, %v941_v57  ;;  %v649_v8 = vshll.u32 %v1429_v58, %v646_v9 }
  0xb6   : > { %v400_v56 = vand.u32 2147483647, %v399_v10  ;;  %v650_v51 = vshrl.u32 %v1430_v60, %v647_v16  ;;  %v943_v22 = vsel %vm932_vm4, nan, %v942_v1  ;;  %vm585_vm6 = vc.u32 %v1971_v28, %v1962_v26 }
  0xb7   : > { %v652_v12 = vshll.u32 %v1430_v60, %v646_v9  ;;  %v653_v59 = vshrl.u32 %v1431_v62, %v647_v16  ;;  %1054 = vst [vmem:[#allocation2 + $0x30] sm:$0x7] %v943_v22  ;;  %v587_v53 = vsel %vm585_vm6, %v586_v41, %v1963_v7  ;;  %v655_v27 = vshll.u32 %v1431_v62, %v646_v9 }
  0xb8   : > { %v403_v47 = vmul.f32 %v402_v19, %v400_v56  ;;  %v651_v25 = vor.u32 %v650_v51, %v649_v8  ;;  %v588_v30 = vadd.s32 %v587_v53, %v583_v15  ;;  %v656_v35 = vshrl.u32 %v1432_v0, %v647_v16  ;;  %v2043_v19 = vld [vmem:[#allocation2 + $0x38] sm:$0x7] }
  0xb9   : > { %v654_v33 = vor.u32 %v653_v59, %v652_v12  ;;  %v658_v34 = vshll.u32 %v1432_v0, %v646_v9  ;;  %v659_v39 = vshrl.u32 %v1433_v2, %v647_v16  ;;  %v661_v43 = vshll.u32 %v1433_v2, %v646_v9 }
  0xba   : > { %v404_v38 = vxor.u32 2147483648, %v403_v47  ;;  %v662_v55 = vshrl.u32 %v1434_v11, %v647_v16  ;;  %v589_v45 = vadd.s32 536870912, %v588_v30  ;;  %v648_v18 = vshrl.u32 %v1429_v58, %v647_v16 }
  0xbb   : > { %v657_v46 = vor.u32 %v656_v35, %v655_v27  ;;  %vm664_vm7 = vcmp.lt.s32.totalorder %v1979_v20, 1  ;;  %v660_v48 = vor.u32 %v659_v39, %v658_v34  ;;  %vm667_vm8 = vcmp.lt.s32.totalorder %v1979_v20, 4 }
  0xbc   : > { %v405_v32 = vsel %vm322_vm12, %v404_v38, %v403_v47  ;;  %v663_v49 = vor.u32 %v662_v55, %v661_v43  ;;  %v590_v61 = vshrl.u32 %v589_v45, 30  ;;  %vm665_vm10 = vcmp.lt.s32.totalorder %v1979_v20, 2 }
  0xbd   : > { %v408_v29 = vsel %vm1889_vm11, %v1634_v14, %v405_v32  ;;  %v669_v63 = vsel %vm667_vm8, %v657_v46, 2102212464  ;;  %vm666_vm9 = vcmp.lt.s32.totalorder %v1979_v20, 3  ;;  %v672_v4 = vsel %vm664_vm7, %v651_v25, %v654_v33 }
  0xbe   : > { %1310 = vcosq.f32 %v408_v29  ;;  %v673_v7 = vsel %vm667_vm8, %v660_v48, 920167782  ;;  %v591_v5 = vshll.u32 %v590_v61, 30  ;;  %v668_v37 = vsel %vm664_vm7, %v648_v18, %v651_v25  ;;  %v1064_v52 = vld [vmem:[#allocation2 + $0x30] sm:$0x7] }
  0xbf   : > { %1312 = vsinq.f32 %v408_v29  ;;  %v670_v31 = vsel %vm666_vm9, %v654_v33, %v669_v63  ;;  %v674_v54 = vsel %vm666_vm9, %v657_v46, %v673_v7  ;;  %v676_v9 = vsel %vm664_vm7, %v654_v33, %v657_v46  ;;  %1072 = vst [vmem:[%s1981_s25 + $0x30] sm:$0x7] %v1064_v52  ;;  %v2075_v46 = vld [vmem:[#allocation2 + $0x28] sm:$0xff] }
  0xc0   : > { %v677_v13 = vsel %vm667_vm8, %v663_v49, 1326507024  ;;  %v680_v6 = vshll.u32 %v640_v23, 8  ;;  %v2031_v57 = vsub.s32 %v588_v30, %v591_v5  ;;  %v614_v10 = vsub.s32 4, %v590_v61 }
  0xc1   : > { %v675_v15 = vsel %vm665_vm10, %v672_v4, %v674_v54  ;;  %v678_v16 = vsel %vm666_vm9, %v660_v48, %v677_v13  ;;  %v414_v40 = vand.u32 3, %v1967_v3  ;;  %vm530_vm11 = vcmp.lt.s32.totalorder %v1829_v36, 0 }
  0xc2   : > { %v679_v17 = vsel %vm665_vm10, %v676_v9, %v678_v16  ;;  %v2039_v21 = vmul.u32.u64.low %v680_v6, %v675_v15  ;;  %v2040_v42 = vmul.u32.u64.high %v680_v6, %v675_v15, %v2039_v21  ;;  %v594_v23 = vsub.s32 0, %v2031_v57 }
  0xc3   : > { %v2047_v41 = vmul.u32.u64.low %v680_v6, %v679_v17  ;;  %v2048_v1 = vmul.u32.u64.high %v680_v6, %v679_v17, %v2047_v41  ;;  %v671_v56 = vsel %vm665_vm10, %v668_v37, %v670_v31  ;;  %v615_v51 = vsel %vm530_vm11, %v614_v10, %v590_v61 }
  0xc4   : > { %v1183_v8 = vmin.u32 %v594_v23, %v2031_v57  ;;  %v944_v22 = vand.u32 2147483647, %v2043_v19  ;;  %v947_v12 = vand.u32 2139095040, %v2043_v19  ;;  %vm412_vm12 = vweird.f32 %v1634_v14 }
  0xc5   : > { %v690_v3 = vadd.s32 1, %v2040_v42  ;;  %vm415_vm13 = vcmp.lt.s32.totalorder %v414_v40, 2  ;;  %vm416_vm14 = vcmp.eq.s32.totalorder %v414_v40, 0  ;;  %vm2062_vm15 = vcmp.le.f32.partialorder %v528_v50, 0.7853982 }
  0xc6   : > { %v596_v59 = vclz %v1183_v8  ;;  %v617_v53 = vsel %vm2062_vm15, 0, %v615_v51  ;;  %v687_v25 = vmul.u32 %v680_v6, %v671_v56  ;;  %vm689_vm0 = vc.u32 %v2048_v1, %v2039_v21 }
  0xc7   : > { %v948_v27 = vshrl.u32 %v947_v12, 23  ;;  %v691_v34 = vsel %vm689_vm0, %v690_v3, %v2040_v42  ;;  %v951_v50 = vand.u32 8388607, %v944_v22  ;;  %vm419_vm1 = vcmp.eq.s32.totalorder %v414_v40, 2 }
  0xc8   : > { %v1311_v47 = vpop.eup %1310  ;;  %v1184_v35 = vadd.s32 4294967294, %v596_v59  ;;  %v692_v39 = vadd.s32 %v691_v34, %v687_v25  ;;  %v584_v45 = vadd.s32 %v1962_v26, %v1971_v28  ;;  %v621_v18 = vadd.s32 3, %v617_v53 }
  0xc9   : > { %v1313_v30 = vpop.eup %1312  ;;  %v420_v33 = vxor.u32 2147483648, %v1311_v47  ;;  %v1198_v43 = vadd.s32 4294967169, %v948_v27  ;;  %v952_v7 = vor.u32 8388608, %v951_v50  ;;  %v739_v26 = vand.u32 2139095040, %v2075_v46 }
  0xca   : > { %v417_v38 = vxor.u32 2147483648, %v1313_v30  ;;  %vm1185_vm2 = vcmp.lt.s32.totalorder %v1184_v35, 0  ;;  %v693_v49 = vadd.s32 536870912, %v692_v39  ;;  %v2086_v15 = vand.u32 3, %v621_v18 }
  0xcb   : > { %v421_v55 = vsel %vm419_vm1, %v420_v33, %v1313_v30  ;;  %v599_v48 = vsel %vm1185_vm2, 0, %v1184_v35  ;;  %v954_v29 = vadd.s32 1, %v1198_v43  ;;  %v688_v42 = vadd.s32 %v2039_v21, %v2048_v1 }
  0xcc   : > { %v418_v32 = vsel %vm416_vm14, %v1311_v47, %v417_v38  ;;  %v600_v63 = vsub.s32 32, %v599_v48  ;;  %v604_v4 = vsub.s32 4294967266, %v599_v48  ;;  %v2081_v37 = vshrl.u32 %v693_v49, 30 }
  0xcd   : > { %v422_v61 = vsel %vm415_vm13, %v418_v32, %v421_v55  ;;  %vm955_vm3 = vcmp.gt.s32.totalorder %v954_v29, 0  ;;  %v601_v28 = vshll.u32 %v2031_v57, %v599_v48  ;;  %v2092_v40 = vshll.u32 %v952_v7, 8 }
  0xce   : > { %v423_v5 = vsel %vm412_vm12, nan, %v422_v61  ;;  %v602_v31 = vshrl.u32 %v584_v45, %v600_v63  ;;  %v605_v52 = vadd.s32 127, %v604_v4  ;;  %v956_v54 = vsel %vm955_vm3, %v954_v29, 0 }
  0xcf   : > { %1049 = vst [vmem:[#allocation2 + $0x8] sm:$0xf8] %v423_v5  ;;  %v695_v9 = vshll.u32 %v2081_v37, 30  ;;  %v958_v13 = vand.u32 31, %v956_v54  ;;  %v740_v57 = vshrl.u32 %v739_v26, 23  ;;  %v718_v41 = vsub.s32 4, %v2081_v37 }
  0xd0   : > { %v603_v6 = vor.u32 %v602_v31, %v601_v28  ;;  %v606_v10 = vshll.u32 %v605_v52, 23  ;;  %v957_v56 = vshrl.u32 %v956_v54, 5  ;;  %vm634_vm10 = vcmp.lt.s32.totalorder %v1867_v44, 0 }
  0xd1   : > { %v2088_v14 = vsub.s32 %v692_v39, %v695_v9  ;;  %v959_v16 = vsub.s32 32, %v958_v13  ;;  %v961_v21 = vshll.u32 %v1429_v58, %v958_v13  ;;  %v964_v1 = vshll.u32 %v1430_v60, %v958_v13 }
  0xd2   : > { %v607_v17 = vor.u32 4788187, %v606_v10  ;;  %v610_v12 = vcvt.s32.f32 %v603_v6  ;;  %v967_v53 = vshll.u32 %v1431_v62, %v958_v13  ;;  %v970_v30 = vshll.u32 %v1432_v0, %v958_v13 }
  0xd3   : > { %v698_v23 = vsub.s32 0, %v2088_v14  ;;  %v962_v8 = vshrl.u32 %v1430_v60, %v959_v16  ;;  %v965_v3 = vshrl.u32 %v1431_v62, %v959_v16  ;;  %v968_v59 = vshrl.u32 %v1432_v0, %v959_v16 }
  0xd4   : > { %v608_v51 = vand.u32 2147483647, %v607_v17  ;;  %v971_v33 = vshrl.u32 %v1433_v2, %v959_v16  ;;  %v1190_v35 = vadd.s32 4294967169, %v740_v57  ;;  %v973_v45 = vshll.u32 %v1433_v2, %v958_v13 }
  0xd5   : > { %v1187_v47 = vmin.u32 %v698_v23, %v2088_v14  ;;  %v963_v50 = vor.u32 %v962_v8, %v961_v21  ;;  %v966_v38 = vor.u32 %v965_v3, %v964_v1  ;;  %v969_v39 = vor.u32 %v968_v59, %v967_v53 }
  0xd6   : > { %v1059_v25 = vld [vmem:[#allocation2 + $0x8] sm:$0xff]  ;;  %v611_v27 = vmul.f32 %v610_v12, %v608_v51  ;;  %v972_v55 = vor.u32 %v971_v33, %v970_v30  ;;  %v974_v18 = vshrl.u32 %v1434_v11, %v959_v16  ;;  %v960_v48 = vshrl.u32 %v1429_v58, %v959_v16 }
  0xd7   : > { %1067 = vst [vmem:[%s1981_s25 + $0x8] sm:$0xff] %v1059_v25  ;;  %v700_v34 = vclz %v1187_v47  ;;  %vm976_vm4 = vcmp.lt.s32.totalorder %v957_v56, 1  ;;  %vm977_vm5 = vcmp.lt.s32.totalorder %v957_v56, 2  ;;  %vm978_vm6 = vcmp.lt.s32.totalorder %v957_v56, 3 }
  0xd8   : > { %v612_v43 = vxor.u32 2147483648, %v611_v27  ;;  %v975_v29 = vor.u32 %v974_v18, %v973_v45  ;;  %vm979_vm7 = vcmp.lt.s32.totalorder %v957_v56, 4  ;;  %v980_v63 = vsel %vm976_vm4, %v960_v48, %v963_v50 }
  0xd9   : > { %v1188_v32 = vadd.s32 4294967294, %v700_v34  ;;  %v981_v4 = vsel %vm979_vm7, %v969_v39, 2102212464  ;;  %v984_v5 = vsel %vm976_vm4, %v963_v50, %v966_v38  ;;  %v985_v26 = vsel %vm979_vm7, %v972_v55, 920167782 }
  0xda   : > { %v613_v49 = vsel %vm530_vm11, %v612_v43, %v611_v27  ;;  %v982_v52 = vsel %vm978_vm6, %v966_v38, %v981_v4  ;;  %v986_v20 = vsel %vm978_vm6, %v969_v39, %v985_v26  ;;  %v988_v9 = vsel %vm976_vm4, %v966_v38, %v969_v39 }
  0xdb   : > { %v616_v61 = vsel %vm2062_vm15, %v1829_v36, %v613_v49  ;;  %vm1189_vm8 = vcmp.lt.s32.totalorder %v1188_v32, 0  ;;  %v989_v13 = vsel %vm979_vm7, %v975_v29, 1326507024  ;;  %v987_v16 = vsel %vm977_vm5, %v984_v5, %v986_v20 }
  0xdc   : > { %1314 = vcosq.f32 %v616_v61  ;;  %v703_v7 = vsel %vm1189_vm8, 0, %v1188_v32  ;;  %v990_v17 = vsel %vm978_vm6, %v972_v55, %v989_v13  ;;  %v983_v57 = vsel %vm977_vm5, %v980_v63, %v982_v52 }
  0xdd   : > { %1316 = vsinq.f32 %v616_v61  ;;  %v704_v28 = vsub.s32 32, %v703_v7  ;;  %v708_v31 = vsub.s32 4294967266, %v703_v7  ;;  %v705_v54 = vshll.u32 %v2088_v14, %v703_v7 }
  0xde   : > { %v991_v23 = vsel %vm977_vm5, %v988_v9, %v990_v17  ;;  %v2128_v8 = vmul.u32.u64.low %v2092_v40, %v987_v16  ;;  %v2129_v51 = vmul.u32.u64.high %v2092_v40, %v987_v16, %v2128_v8  ;;  %vm620_vm9 = vweird.f32 %v1829_v36 }
  0xdf   : > { %v706_v6 = vshrl.u32 %v688_v42, %v704_v28  ;;  %v709_v10 = vadd.s32 127, %v708_v31  ;;  %v2133_v3 = vmul.u32.u64.low %v2092_v40, %v991_v23  ;;  %v2134_v59 = vmul.u32.u64.high %v2092_v40, %v991_v23, %v2133_v3 }
  0xe0   : > { %v746_v42 = vadd.s32 1, %v1190_v35  ;;  %vm623_vm11 = vcmp.lt.s32.totalorder %v2086_v15, 2  ;;  %vm624_vm12 = vcmp.eq.s32.totalorder %v2086_v15, 0  ;;  %vm2142_vm13 = vcmp.le.f32.partialorder %v632_v24, 0.7853982 }
  0xe1   : > { %v707_v14 = vor.u32 %v706_v6, %v705_v54  ;;  %v710_v12 = vshll.u32 %v709_v10, 23  ;;  %v719_v21 = vsel %vm634_vm10, %v718_v41, %v2081_v37  ;;  %v999_v1 = vmul.u32 %v2092_v40, %v983_v57 }
  0xe2   : > { %v1002_v53 = vadd.s32 1, %v2129_v51  ;;  %vm747_vm14 = vcmp.gt.s32.totalorder %v746_v42, 0  ;;  %vm1001_vm15 = vc.u32 %v2134_v59, %v2128_v8  ;;  %vm627_vm0 = vcmp.eq.s32.totalorder %v2086_v15, 2 }
  0xe3   : > { %v711_v47 = vor.u32 4788187, %v710_v12  ;;  %v714_v27 = vcvt.s32.f32 %v707_v14  ;;  %v748_v24 = vsel %vm747_vm14, %v746_v42, 0  ;;  %v736_v35 = vand.u32 2147483647, %v2075_v46 }
  0xe4   : > { %v1003_v33 = vsel %vm1001_vm15, %v1002_v53, %v2129_v51  ;;  %v750_v34 = vand.u32 31, %v748_v24  ;;  %v721_v50 = vsel %vm2142_vm13, 0, %v719_v21  ;;  %v2160_v43 = vshrl.u32 %v748_v24, 5 }
  0xe5   : > { %v712_v25 = vand.u32 2147483647, %v711_v47  ;;  %v1004_v38 = vadd.s32 %v1003_v33, %v999_v1  ;;  %v725_v52 = vadd.s32 3, %v721_v50  ;;  %vm724_vm5 = vweird.f32 %v1867_v44 }
  0xe6   : > { %v1315_v30 = vpop.eup %1314  ;;  %v751_v55 = vsub.s32 32, %v750_v34  ;;  %v753_v45 = vshll.u32 %v1429_v58, %v750_v34  ;;  %v756_v49 = vshll.u32 %v1430_v60, %v750_v34  ;;  %v759_v4 = vshll.u32 %v1431_v62, %v750_v34 }
  0xe7   : > { %v1317_v37 = vpop.eup %1316  ;;  %v628_v41 = vxor.u32 2147483648, %v1315_v30  ;;  %v715_v40 = vmul.f32 %v714_v27, %v712_v25  ;;  %v1005_v48 = vadd.s32 536870912, %v1004_v38  ;;  %v762_v9 = vshll.u32 %v1432_v0, %v750_v34 }
  0xe8   : > { %v625_v39 = vxor.u32 2147483648, %v1317_v37  ;;  %v754_v61 = vshrl.u32 %v1430_v60, %v751_v55  ;;  %v757_v63 = vshrl.u32 %v1431_v62, %v751_v55  ;;  %v760_v28 = vshrl.u32 %v1432_v0, %v751_v55 }
  0xe9   : > { %v629_v18 = vsel %vm627_vm0, %v628_v41, %v1317_v37  ;;  %v716_v32 = vxor.u32 2147483648, %v715_v40  ;;  %v2173_v26 = vshrl.u32 %v1005_v48, 30  ;;  %v743_v62 = vand.u32 8388607, %v736_v35 }
  0xea   : > { %v626_v29 = vsel %vm624_vm12, %v1315_v30, %v625_v39  ;;  %v755_v54 = vor.u32 %v754_v61, %v753_v45  ;;  %v758_v20 = vor.u32 %v757_v63, %v756_v49  ;;  %v763_v36 = vshrl.u32 %v1433_v2, %v751_v55 }
  0xeb   : > { %v630_v7 = vsel %vm623_vm11, %v626_v29, %v629_v18  ;;  %v717_v5 = vsel %vm634_vm10, %v716_v32, %v715_v40  ;;  %v1007_v15 = vshll.u32 %v2173_v26, 30  ;;  %v765_v13 = vshll.u32 %v1433_v2, %v750_v34 }
  0xec   : > { %v631_v31 = vsel %vm620_vm9, nan, %v630_v7  ;;  %v720_v60 = vsel %vm2142_vm13, %v1867_v44, %v717_v5  ;;  %v761_v10 = vor.u32 %v760_v28, %v759_v4  ;;  %v766_v16 = vshrl.u32 %v1434_v11, %v751_v55 }
  0xed   : > { %1051 = vst [vmem:[#allocation2 + $0x18] sm:$0xff] %v631_v31  ;;  %1318 = vcosq.f32 %v720_v60  ;;  %1069 = vst [vmem:[%s1981_s25 + $0x18] sm:$0xff] %v631_v31  ;;  %v1008_v6 = vsub.s32 %v1004_v38, %v1007_v15  ;;  %vm768_vm1 = vcmp.lt.s32.totalorder %v2160_v43, 1  ;;  %v744_v17 = vor.u32 8388608, %v743_v62 }
  0xee   : > { %1320 = vsinq.f32 %v720_v60  ;;  %v764_v57 = vor.u32 %v763_v36, %v762_v9  ;;  %vm770_vm2 = vcmp.lt.s32.totalorder %v2160_v43, 3  ;;  %v752_v51 = vshrl.u32 %v1429_v58, %v751_v55 }
  0xef   : > { %v1010_v23 = vsub.s32 0, %v1008_v6  ;;  %v767_v14 = vor.u32 %v766_v16, %v765_v13  ;;  %vm771_vm3 = vcmp.lt.s32.totalorder %v2160_v43, 4  ;;  %v726_v0 = vand.u32 3, %v725_v52 }
  0xf0   : > { %v776_v2 = vsel %vm768_vm1, %v755_v54, %v758_v20  ;;  %v777_v12 = vsel %vm771_vm3, %v764_v57, 920167782  ;;  %vm769_vm4 = vcmp.lt.s32.totalorder %v2160_v43, 2  ;;  %v773_v11 = vsel %vm771_vm3, %v761_v10, 2102212464 }
  0xf1   : > { %v1199_v3 = vmin.u32 %v1010_v23, %v1008_v6  ;;  %v778_v42 = vsel %vm770_vm2, %v761_v10, %v777_v12  ;;  %v780_v58 = vsel %vm768_vm1, %v758_v20, %v761_v10  ;;  %v781_v47 = vsel %vm771_vm3, %v767_v14, 1326507024 }
  0xf2   : > { %v779_v56 = vsel %vm769_vm4, %v776_v2, %v778_v42  ;;  %v784_v21 = vshll.u32 %v744_v17, 8  ;;  %v772_v53 = vsel %vm768_vm1, %v752_v51, %v755_v54  ;;  %v774_v25 = vsel %vm770_vm2, %v758_v20, %v773_v11 }
  0xf3   : > { %v1012_v1 = vclz %v1199_v3  ;;  %v782_v27 = vsel %vm770_vm2, %v764_v57, %v781_v47  ;;  %vm727_vm6 = vcmp.lt.s32.totalorder %v726_v0, 2  ;;  %vm731_vm7 = vcmp.eq.s32.totalorder %v726_v0, 2 }
  0xf4   : > { %v2208_v24 = vmul.u32.u64.low %v784_v21, %v779_v56  ;;  %v2209_v30 = vmul.u32.u64.high %v784_v21, %v779_v56, %v2208_v24  ;;  %v783_v37 = vsel %vm769_vm4, %v780_v58, %v782_v27  ;;  %v775_v55 = vsel %vm769_vm4, %v772_v53, %v774_v25 }
  0xf5   : > { %v1200_v34 = vadd.s32 4294967294, %v1012_v1  ;;  %v2214_v50 = vmul.u32.u64.low %v784_v21, %v783_v37  ;;  %v2215_v38 = vmul.u32.u64.high %v784_v21, %v783_v37, %v2214_v50  ;;  %vm728_vm10 = vcmp.eq.s32.totalorder %v726_v0, 0 }
  0xf6   : > { %v794_v32 = vadd.s32 1, %v2209_v30  ;;  %v1000_v49 = vadd.s32 %v2128_v8, %v2134_v59  ;;  %v791_v7 = vmul.u32 %v784_v21, %v775_v55  ;;  %v1030_v13 = vsub.s32 4, %v2173_v26 }
  0xf7   : > { %v1319_v33 = vpop.eup %1318  ;;  %vm1201_vm8 = vcmp.lt.s32.totalorder %v1200_v34, 0  ;;  %vm793_vm9 = vc.u32 %v2215_v38, %v2208_v24  ;;  %vm946_vm11 = vcmp.lt.s32.totalorder %v2043_v19, 0  ;;  %vm945_vm12 = vcmp.le.f32.partialorder %v944_v22, 0.7853982 }
  0xf8   : > { %v1321_v41 = vpop.eup %1320  ;;  %v732_v40 = vxor.u32 2147483648, %v1319_v33  ;;  %v1015_v18 = vsel %vm1201_vm8, 0, %v1200_v34  ;;  %v795_v31 = vsel %vm793_vm9, %v794_v32, %v2209_v30  ;;  %v1031_v17 = vsel %vm946_vm11, %v1030_v13, %v2173_v26 }
  0xf9   : > { %v729_v39 = vxor.u32 2147483648, %v1321_v41  ;;  %v1016_v29 = vsub.s32 32, %v1015_v18  ;;  %v1020_v61 = vsub.s32 4294967266, %v1015_v18  ;;  %v1017_v4 = vshll.u32 %v1008_v6, %v1015_v18 }
  0xfa   : > { %v733_v45 = vsel %vm731_vm7, %v732_v40, %v1321_v41  ;;  %v796_v60 = vadd.s32 %v795_v31, %v791_v7  ;;  %v1033_v51 = vsel %vm945_vm12, 0, %v1031_v17  ;;  %v792_v3 = vadd.s32 %v2208_v24, %v2215_v38 }
  0xfb   : > { %v730_v48 = vsel %vm728_vm10, %v1319_v33, %v729_v39  ;;  %v1018_v5 = vshrl.u32 %v1000_v49, %v1016_v29  ;;  %v1021_v28 = vadd.s32 127, %v1020_v61  ;;  %v1037_v2 = vadd.s32 3, %v1033_v51 }
  0xfc   : > { %v734_v63 = vsel %vm727_vm6, %v730_v48, %v733_v45  ;;  %v797_v59 = vadd.s32 536870912, %v796_v60  ;;  %vm1036_vm1 = vweird.f32 %v2043_v19  ;;  %vm738_vm2 = vcmp.lt.s32.totalorder %v2075_v46, 0 }
  0xfd   : > { %v735_v43 = vsel %vm724_vm5, nan, %v734_v63  ;;  %v1019_v52 = vor.u32 %v1018_v5, %v1017_v4  ;;  %v1022_v8 = vshll.u32 %v1021_v28, 23  ;;  %v1038_v56 = vand.u32 3, %v1037_v2 }
  0xfe   : > { %1052 = vst [vmem:[#allocation2 + $0x20] sm:$0xff] %v735_v43  ;;  %1070 = vst [vmem:[%s1981_s25 + $0x20] sm:$0xff] %v735_v43  ;;  %v798_v15 = vshrl.u32 %v797_v59, 30  ;;  %vm737_vm3 = vcmp.le.f32.partialorder %v736_v35, 0.7853982  ;;  %vm828_vm7 = vweird.f32 %v2075_v46 }
  0xff   : > { %v1023_v62 = vor.u32 4788187, %v1022_v8  ;;  %v1026_v20 = vcvt.s32.f32 %v1019_v52  ;;  %vm1043_vm14 = vcmp.eq.s32.totalorder %v1038_v56, 2  ;;  %vm1040_vm15 = vcmp.eq.s32.totalorder %v1038_v56, 0 }
 0x100   : > { %v799_v9 = vshll.u32 %v798_v15, 30  ;;  %vm1039_vm0 = vcmp.lt.s32.totalorder %v1038_v56, 2  ;;  %v822_v38 = vsub.s32 4, %v798_v15 }
 0x101   : > { %v1024_v54 = vand.u32 2147483647, %v1023_v62 }
 0x102   : > { %v800_v44 = vsub.s32 %v796_v60, %v799_v9  ;;  %v823_v45 = vsel %vm738_vm2, %v822_v38, %v798_v15 }
 0x103   : > { %v1027_v36 = vmul.f32 %v1026_v20, %v1024_v54  ;;  %v825_v18 = vsel %vm737_vm3, 0, %v823_v45 }
 0x104   : > { %v802_v10 = vsub.s32 0, %v800_v44  ;;  %v829_v48 = vadd.s32 3, %v825_v18 }
 0x105   : > { %v1028_v6 = vxor.u32 2147483648, %v1027_v36 }
 0x106   : > { %v1191_v23 = vmin.u32 %v802_v10, %v800_v44  ;;  %v830_v49 = vand.u32 3, %v829_v48 }
 0x107   : > { %v1029_v16 = vsel %vm946_vm11, %v1028_v6, %v1027_v36 }
 0x108   : > { %v1032_v57 = vsel %vm945_vm12, %v2043_v19, %v1029_v16  ;;  %v804_v14 = vclz %v1191_v23  ;;  %vm835_vm4 = vcmp.eq.s32.totalorder %v830_v49, 2  ;;  %vm832_vm5 = vcmp.eq.s32.totalorder %v830_v49, 0 }
 0x109   : > { %1322 = vcosq.f32 %v1032_v57  ;;  %vm831_vm6 = vcmp.lt.s32.totalorder %v830_v49, 2 }
 0x10a   : > { %1324 = vsinq.f32 %v1032_v57  ;;  %v1192_v0 = vadd.s32 4294967294, %v804_v14 }
 0x10c   : > { %vm1193_vm13 = vcmp.lt.s32.totalorder %v1192_v0, 0 }
 0x10d   : > { %v807_v12 = vsel %vm1193_vm13, 0, %v1192_v0 }
 0x10e   : > { %v808_v11 = vsub.s32 32, %v807_v12  ;;  %v812_v42 = vsub.s32 4294967266, %v807_v12  ;;  %v809_v22 = vshll.u32 %v800_v44, %v807_v12 }
 0x110   : > { %v810_v58 = vshrl.u32 %v792_v3, %v808_v11  ;;  %v813_v47 = vadd.s32 127, %v812_v42 }
 0x112   : > { %v811_v53 = vor.u32 %v810_v58, %v809_v22  ;;  %v814_v25 = vshll.u32 %v813_v47, 23 }
 0x113   : > { %v1323_v26 = vpop.eup %1322 }
 0x114   : > { %v1325_v21 = vpop.eup %1324  ;;  %v1044_v1 = vxor.u32 2147483648, %v1323_v26  ;;  %v815_v33 = vor.u32 4788187, %v814_v25  ;;  %v818_v41 = vcvt.s32.f32 %v811_v53 }
 0x115   : > { %v1041_v27 = vxor.u32 2147483648, %v1325_v21 }
 0x116   : > { %v1045_v30 = vsel %vm1043_vm14, %v1044_v1, %v1325_v21  ;;  %v816_v37 = vand.u32 2147483647, %v815_v33 }
 0x117   : > { %v1042_v34 = vsel %vm1040_vm15, %v1323_v26, %v1041_v27 }
 0x118   : > { %v1046_v24 = vsel %vm1039_vm0, %v1042_v34, %v1045_v30  ;;  %v819_v50 = vmul.f32 %v818_v41, %v816_v37 }
 0x119   : > { %v1047_v40 = vsel %vm1036_vm1, nan, %v1046_v24 }
 0x11a   : > { %1055 = vst [vmem:[#allocation2 + $0x38] sm:$0x7] %v1047_v40  ;;  %v820_v39 = vxor.u32 2147483648, %v819_v50 }
 0x11c   : > { %v821_v55 = vsel %vm738_vm2, %v820_v39, %v819_v50 }
 0x11d   : > { %v824_v19 = vsel %vm737_vm3, %v2075_v46, %v821_v55 }
 0x11e   : > { %1326 = vcosq.f32 %v824_v19 }
 0x11f   : > { %1328 = vsinq.f32 %v824_v19 }
 0x121   : > { %v1065_v32 = vld [vmem:[#allocation2 + $0x38] sm:$0x7] }
 0x122   : > { %1073 = vst [vmem:[%s1981_s25 + $0x38] sm:$0x7] %v1065_v32 }
 0x128   : > { %v1327_v29 = vpop.eup %1326 }
 0x129   : > { %v1329_v61 = vpop.eup %1328  ;;  %v836_v63 = vxor.u32 2147483648, %v1327_v29 }
 0x12a   : > { %v833_v4 = vxor.u32 2147483648, %v1329_v61 }
 0x12b   : > { %v837_v35 = vsel %vm835_vm4, %v836_v63, %v1329_v61 }
 0x12c   : > { %v834_v7 = vsel %vm832_vm5, %v1327_v29, %v833_v4 }
 0x12d   : > { %v838_v43 = vsel %vm831_vm6, %v834_v7, %v837_v35 }
 0x12e   : > { %v839_v5 = vsel %vm828_vm7, nan, %v838_v43 }
 0x12f   : > { %1053 = vst [vmem:[#allocation2 + $0x28] sm:$0xff] %v839_v5  ;;  %1071 = vst [vmem:[%s1981_s25 + $0x28] sm:$0xff] %v839_v5 }
 0x130   : > { %1373 = shalt.err (!%p1370_p4)
}
 0x131   : > { %s1374_s11 = scalar_lea.hbm %s2248_s30, 1024  ;;  %s1378_s16 = scalar_lea.hbm %s2295_s1, 2048 }
 0x132   : > { %p1375_p5 = scmp.ne.s32.totalorder %s2248_s30, %s1374_s11  ;;  %p1379_p0 = scmp.lt.u32.totalorder %s2248_s30, %s2295_s1 }
 0x133   : > { %p1380_p1 = scmp.lt.u32.totalorder %s1378_s16, %s1374_s11  ;;  %p1382_p6 = scmp.lt.u32.totalorder %s1374_s11, %s2248_s30 }
 0x134   : > { %p1376_p8 = pnand %p1375_p5, %p2316_p11 }
 0x135   : > { %p1381_p3 = por %p1380_p1, %p1379_p0 }
 0x136   : > { %p1377_p9 = pneg %p1376_p8 }
 0x137   : > { %p1383_p12 = por %p1382_p6, %p1381_p3 }
 0x139   : > { %p1384_p13 = pnand %p1383_p12, %p1377_p9 }
 0x13b   : > { %1387 = shalt.err (!%p1384_p13)
}
 0x13c   : > { %s1436_s23 = smov 256   ;;  %s1437_s24 = smov 512  }
 0x13d   : > { %s1438_s17 = smov 16  }
 0x13e   : > { %1243 = dma.vmem_to_hbm [thread:$0]  (%p2316_p11), %s2243_s26, 1024, %s2248_s30, %s1075_s10, %s1436_s23, %s1437_s24, %s1438_s17  }
 0x13f PF: > { %s1103_s25 = sand.u32 1, %s1414_s6   ;;  %p2317_p7 = scmp.ne.s32.totalorder %s2300_s19, 0 }
 0x140   : > { %p2318_p10 = scmp.ge.s32.totalorder %s1426_s9, 2  ;;  %s1104_s27 = scalar_lea.sflag [#allocation5], %s1103_s25 }
 0x142   : > { %p1250_p2 = pnand %p2318_p10, %p2317_p7 }
 0x144   : > { %1409 = dma.done.wait (!%p1250_p2), %s1104_s27, 1024  }
 0x145   : > { %1411 = vsyncadd (!%p1250_p2), %s1104_s27, 4294966272  ;;  %p14_p4 = scmp.ge.s32.totalorder %s1474_s12, 4   ;;  %s2319_s6 = smov %s1418_s7 }
 0x146   : > { %s2320_s7 = smov %s1422_s8  ;;  %s2321_s8 = smov %s1486_s15 }
 0x147   : > { %s2322_s9 = smov %s1474_s12  ;;  %16 = sbr.rel (!%p14_p4) target bundleno = 5 (0x5), region = 69 }
 0x14e   :  { %1109 = vsyncpa [#allocation4], 1 }
 0x14f   :  { %1111 = vsyncpa [#allocation4 + $0x1], 1 }
 0x150   :  { %1112 = vsyncpa [#allocation5], 1 }
 0x151   :  { %1114 = vsyncpa [#allocation5 + $0x1], 1 }

</bundles_post_ra>
